<compile_context>
chip_gen: v5e
topology: v5e:2x2
jax: 0.10.0
libtpu: 0.0.40
codegen_flags: <defaults>
</compile_context>

<pallas_src>
import jax
import jax.numpy as jnp
from jax.experimental import pallas as pl
from jax.experimental.pallas import tpu as pltpu


# ---------------------------------------------------------------------------
# Pallas kernels
# ---------------------------------------------------------------------------
def _conv_bias_relu_pool_kernel(p00_ref, p01_ref, p10_ref, p11_ref,
                                w_ref, b_ref, o_ref):
    """Fused conv (as 4 pool-tap matmuls) + bias + ReLU + 2x2 max-pool.

    p??_ref : [TM, K*K*Cin] bf16 im2col rows for one pool-tap position
    w_ref   : [K*K*Cin, C]  bf16 (resident across the M grid)
    b_ref   : [1, C]        f32
    o_ref   : [TM, C]       pooled activation (bf16)
    """
    w = w_ref[...]
    b = b_ref[...]

    def tap(p_ref):
        acc = jnp.dot(p_ref[...], w, preferred_element_type=jnp.float32)  # MXU
        return jnp.maximum(acc + b, 0.0)                                  # VPU, f32

    pooled = jnp.maximum(jnp.maximum(tap(p00_ref), tap(p01_ref)),
                         jnp.maximum(tap(p10_ref), tap(p11_ref)))
    o_ref[...] = pooled.astype(o_ref.dtype)


def _fc1_relu_fc2_kernel(x_ref, w1_ref, b1_ref, w2_ref, b2_ref, o_ref):
    """Fused fc1 + ReLU + fc2 (fc2 N zero-padded to 128 for a lane-dense store)."""
    h = jnp.dot(x_ref[...], w1_ref[...], preferred_element_type=jnp.float32)
    h = jnp.maximum(h + b1_ref[...], 0.0)
    y = jnp.dot(h.astype(w2_ref.dtype), w2_ref[...],
                preferred_element_type=jnp.float32)
    o_ref[...] = y + b2_ref[...]


# ---------------------------------------------------------------------------
# Small helpers
# ---------------------------------------------------------------------------
def _round_up(x, m):
    return (x + m - 1) // m * m


def _pad_rows(a, mp):
    m = a.shape[0]
    if m == mp:
        return a
    return jnp.pad(a, ((0, mp - m), (0, 0)))


# ---------------------------------------------------------------------------
# im2col split by 2x2 pool-tap position (plain-JAX glue: pad/slice/stack)
# ---------------------------------------------------------------------------
def im2col_pool_taps(x_nhwc, k=3, pad=1):
    """Returns 4 matrices [B*Ho*Wo, k*k*Cin], one per pool-tap (ti, tj)."""
    B, H, W, C = x_nhwc.shape
    assert H % 2 == 0 and W % 2 == 0, "2x2 max-pool needs even H, W"
    Ho, Wo = H // 2, W // 2
    xp = jnp.pad(x_nhwc, ((0, 0), (pad, pad), (pad, pad), (0, 0)))
    taps = []
    for ti in range(2):
        for tj in range(2):
            patches = []
            for ki in range(k):
                for kj in range(k):
                    # conv output position (2*ho+ti, 2*wo+tj), neighbor (ki, kj)
                    sl = xp[:, ti + ki: ti + ki + H: 2,
                               tj + kj: tj + kj + W: 2, :]      # [B,Ho,Wo,C]
                    patches.append(sl)
            p = jnp.stack(patches, axis=3)                      # [B,Ho,Wo,9,C]
            taps.append(p.reshape(B * Ho * Wo, k * k * C))
    return taps


# ---------------------------------------------------------------------------
# Pallas wrappers
# ---------------------------------------------------------------------------
def conv_relu_pool(x_nhwc, w, b, out_c, *, tm_max=1024):
    """Fused conv3x3(pad=1) + bias + ReLU + maxpool2x2.  NHWC in/out (bf16 out)."""
    B, H, W, Cin = x_nhwc.shape
    Ho, Wo = H // 2, W // 2
    Kc = 9 * Cin
    M = B * Ho * Wo

    TM = min(tm_max, _round_up(M, 8))
    Mp = _round_up(M, TM)
    grid = (Mp // TM,)

    taps = [_pad_rows(t.astype(jnp.bfloat16), Mp)
            for t in im2col_pool_taps(x_nhwc)]
    wb = w.astype(jnp.bfloat16)
    bb = b.reshape(1, out_c).astype(jnp.float32)

    cost = pl.CostEstimate(
        flops=2 * 4 * Mp * Kc * out_c,
        transcendentals=0,
        bytes_accessed=4 * Mp * Kc * 2 + Kc * out_c * 2 + out_c * 4 + Mp * out_c * 2,
    )

    pooled = pl.pallas_call(
        _conv_bias_relu_pool_kernel,
        out_shape=jax.ShapeDtypeStruct((Mp, out_c), jnp.bfloat16),
        grid=grid,
        in_specs=[pl.BlockSpec((TM, Kc), lambda i: (i, 0)) for _ in range(4)] + [
            pl.BlockSpec((Kc, out_c), lambda i: (0, 0)),   # weights stay resident
            pl.BlockSpec((1, out_c), lambda i: (0, 0)),
        ],
        out_specs=pl.BlockSpec((TM, out_c), lambda i: (i, 0)),
        compiler_params=pltpu.CompilerParams(dimension_semantics=("parallel",)),
        cost_estimate=cost,
    )(*taps, wb, bb)

    return pooled[:M].reshape(B, Ho, Wo, out_c)


def fc1_relu_fc2(flat, w1, b1, w2, b2, *, tm_max=256):
    """Fused fc1 + ReLU + fc2.  flat: [B, 1568] -> [B, 10] (f32)."""
    Bn, K1 = flat.shape
    H1 = w1.shape[1]          # 128
    N2 = w2.shape[1]          # 10
    Np = 128                  # lane-dense padded fc2 output width

    TM = min(tm_max, _round_up(Bn, 8))
    Mp = _round_up(Bn, TM)

    x = _pad_rows(flat.astype(jnp.bfloat16), Mp)
    w1b = w1.astype(jnp.bfloat16)
    b1f = b1.reshape(1, H1).astype(jnp.float32)
    w2p = jnp.zeros((H1, Np), jnp.bfloat16).at[:, :N2].set(w2.astype(jnp.bfloat16))
    b2p = jnp.zeros((1, Np), jnp.float32).at[:, :N2].set(b2.astype(jnp.float32))

    cost = pl.CostEstimate(
        flops=2 * Mp * (K1 * H1 + H1 * Np),
        transcendentals=0,
        bytes_accessed=Mp * K1 * 2 + K1 * H1 * 2 + H1 * Np * 2 + Mp * Np * 4,
    )

    out = pl.pallas_call(
        _fc1_relu_fc2_kernel,
        out_shape=jax.ShapeDtypeStruct((Mp, Np), jnp.float32),
        grid=(Mp // TM,),
        in_specs=[
            pl.BlockSpec((TM, K1), lambda i: (i, 0)),
            pl.BlockSpec((K1, H1), lambda i: (0, 0)),
            pl.BlockSpec((1, H1), lambda i: (0, 0)),
            pl.BlockSpec((H1, Np), lambda i: (0, 0)),
            pl.BlockSpec((1, Np), lambda i: (0, 0)),
        ],
        out_specs=pl.BlockSpec((TM, Np), lambda i: (i, 0)),
        compiler_params=pltpu.CompilerParams(dimension_semantics=("parallel",)),
        cost_estimate=cost,
    )(x, w1b, b1f, w2p, b2p)

    return out[:Bn, :N2]


# ---------------------------------------------------------------------------
# Parameters (deterministic synthetic init, shapes from the PyTorch module)
# ---------------------------------------------------------------------------
def init_params(key):
    ks = jax.random.split(key, 8)
    scale = 0.1
    return {
        # conv1: 1 -> 16, 3x3   (stored as [k*k*Cin, OutC], im2col (ki,kj,cin) order)
        "w1": scale * jax.random.normal(ks[0], (9 * 1, 16), jnp.float32),
        "b1": scale * jax.random.normal(ks[1], (16,), jnp.float32),
        # conv2: 16 -> 32, 3x3
        "w2": scale * jax.random.normal(ks[2], (9 * 16, 32), jnp.float32),
        "b2": scale * jax.random.normal(ks[3], (32,), jnp.float32),
        # fc1: 32*7*7 -> 128
        "wfc1": scale * jax.random.normal(ks[4], (32 * 7 * 7, 128), jnp.float32),
        "bfc1": scale * jax.random.normal(ks[5], (128,), jnp.float32),
        # fc2: 128 -> 10
        "wfc2": scale * jax.random.normal(ks[6], (128, 10), jnp.float32),
        "bfc2": scale * jax.random.normal(ks[7], (10,), jnp.float32),
    }


# ---------------------------------------------------------------------------
# Forward pass (mirrors CNN.forward)
# ---------------------------------------------------------------------------
def cnn_forward(x_nchw, params):
    B = x_nchw.shape[0]
    x = jnp.transpose(x_nchw, (0, 2, 3, 1)).astype(jnp.float32)   # NCHW -> NHWC

    # conv1 + relu + pool  (fused)                    [B,28,28,1] -> [B,14,14,16]
    y = conv_relu_pool(x, params["w1"], params["b1"], 16)
    # conv2 + relu + pool  (fused)                    [B,14,14,16] -> [B,7,7,32]
    y = conv_relu_pool(y, params["w2"], params["b2"], 32)

    # flatten in PyTorch NCHW order (C, H, W)
    flat = jnp.transpose(y, (0, 3, 1, 2)).reshape(B, 32 * 7 * 7)

    # fc1 + relu + fc2  (fused)                       [B,1568] -> [B,10]
    return fc1_relu_fc2(flat, params["wfc1"], params["bfc1"],
                        params["wfc2"], params["bfc2"])


if __name__ == "__main__":
    key = jax.random.PRNGKey(0)
    pkey, xkey = jax.random.split(key)
    params = init_params(pkey)

    # MNIST-shaped input required by fc1 (32*7*7): [B=2, C=1, H=28, W=28]
    x = jax.random.normal(xkey, (2, 1, 28, 28), jnp.float32)

    out = jax.jit(cnn_forward)(x, params)
    out = jax.block_until_ready(out)
    assert out.shape == (2, 10), out.shape
    print("KERNEL_OK")
</pallas_src>

<mosaic_0001>
module attributes {stable_mosaic.version = 11 : i64} {
  func.func @_conv_bias_relu_pool_kernel(%arg0: i32, %arg1: memref<392x9xbf16, #tpu.memory_space<vmem>>, %arg2: memref<392x9xbf16, #tpu.memory_space<vmem>>, %arg3: memref<392x9xbf16, #tpu.memory_space<vmem>>, %arg4: memref<392x9xbf16, #tpu.memory_space<vmem>>, %arg5: memref<9x16xbf16, #tpu.memory_space<vmem>>, %arg6: memref<1x16xf32, #tpu.memory_space<vmem>>, %arg7: memref<392x16xbf16, #tpu.memory_space<vmem>>) attributes {dimension_semantics = [#tpu.dimension_semantics<parallel>], iteration_bounds = array<i64: 1>, scalar_prefetch = 0 : i64, scratch_operands = 0 : i64, tpu.core_type = #tpu.core_type<tc>, window_params = [{transform_indices = @transform_0, window_bounds = array<i64: 392, 9>}, {transform_indices = @transform_1, window_bounds = array<i64: 392, 9>}, {transform_indices = @transform_2, window_bounds = array<i64: 392, 9>}, {transform_indices = @transform_3, window_bounds = array<i64: 392, 9>}, {pipeline_mode = #tpu.pipeline_mode<synchronous>, transform_indices = @transform_4, window_bounds = array<i64: 9, 16>}, {pipeline_mode = #tpu.pipeline_mode<synchronous>, transform_indices = @transform_5, window_bounds = array<i64: 1, 16>}, {transform_indices = @transform_6, window_bounds = array<i64: 392, 16>}]} {
    %c0 = arith.constant 0 : index
    %c0_0 = arith.constant 0 : index
    %0 = vector.load %arg5[%c0, %c0_0] : memref<9x16xbf16, #tpu.memory_space<vmem>>, vector<9x16xbf16>
    %c0_1 = arith.constant 0 : index
    %c0_2 = arith.constant 0 : index
    %1 = vector.load %arg6[%c0_1, %c0_2] : memref<1x16xf32, #tpu.memory_space<vmem>>, vector<1x16xf32>
    %c0_3 = arith.constant 0 : index
    %c0_4 = arith.constant 0 : index
    %2 = vector.load %arg1[%c0_3, %c0_4] : memref<392x9xbf16, #tpu.memory_space<vmem>>, vector<392x9xbf16>
    %cst = arith.constant dense<0.000000e+00> : vector<392x16xf32>
    %3 = tpu.matmul %2, %0, %cst {dimension_numbers = #tpu.dot_dimension_numbers<[1], [0], [0], [1], [0, 0, 1, 1], [], []>} : vector<392x9xbf16>, vector<9x16xbf16>, vector<392x16xf32> -> vector<392x16xf32>
    %4 = vector.broadcast %1 : vector<1x16xf32> to vector<392x16xf32>
    %5 = arith.addf %3, %4 : vector<392x16xf32>
    %cst_5 = arith.constant 0.000000e+00 : f32
    %6 = vector.broadcast %cst_5 : f32 to vector<392x16xf32>
    %7 = arith.maximumf %5, %6 : vector<392x16xf32>
    %c0_6 = arith.constant 0 : index
    %c0_7 = arith.constant 0 : index
    %8 = vector.load %arg2[%c0_6, %c0_7] : memref<392x9xbf16, #tpu.memory_space<vmem>>, vector<392x9xbf16>
    %cst_8 = arith.constant dense<0.000000e+00> : vector<392x16xf32>
    %9 = tpu.matmul %8, %0, %cst_8 {dimension_numbers = #tpu.dot_dimension_numbers<[1], [0], [0], [1], [0, 0, 1, 1], [], []>} : vector<392x9xbf16>, vector<9x16xbf16>, vector<392x16xf32> -> vector<392x16xf32>
    %10 = vector.broadcast %1 : vector<1x16xf32> to vector<392x16xf32>
    %11 = arith.addf %9, %10 : vector<392x16xf32>
    %cst_9 = arith.constant 0.000000e+00 : f32
    %12 = vector.broadcast %cst_9 : f32 to vector<392x16xf32>
    %13 = arith.maximumf %11, %12 : vector<392x16xf32>
    %14 = arith.maximumf %7, %13 : vector<392x16xf32>
    %c0_10 = arith.constant 0 : index
    %c0_11 = arith.constant 0 : index
    %15 = vector.load %arg3[%c0_10, %c0_11] : memref<392x9xbf16, #tpu.memory_space<vmem>>, vector<392x9xbf16>
    %cst_12 = arith.constant dense<0.000000e+00> : vector<392x16xf32>
    %16 = tpu.matmul %15, %0, %cst_12 {dimension_numbers = #tpu.dot_dimension_numbers<[1], [0], [0], [1], [0, 0, 1, 1], [], []>} : vector<392x9xbf16>, vector<9x16xbf16>, vector<392x16xf32> -> vector<392x16xf32>
    %17 = vector.broadcast %1 : vector<1x16xf32> to vector<392x16xf32>
    %18 = arith.addf %16, %17 : vector<392x16xf32>
    %cst_13 = arith.constant 0.000000e+00 : f32
    %19 = vector.broadcast %cst_13 : f32 to vector<392x16xf32>
    %20 = arith.maximumf %18, %19 : vector<392x16xf32>
    %c0_14 = arith.constant 0 : index
    %c0_15 = arith.constant 0 : index
    %21 = vector.load %arg4[%c0_14, %c0_15] : memref<392x9xbf16, #tpu.memory_space<vmem>>, vector<392x9xbf16>
    %cst_16 = arith.constant dense<0.000000e+00> : vector<392x16xf32>
    %22 = tpu.matmul %21, %0, %cst_16 {dimension_numbers = #tpu.dot_dimension_numbers<[1], [0], [0], [1], [0, 0, 1, 1], [], []>} : vector<392x9xbf16>, vector<9x16xbf16>, vector<392x16xf32> -> vector<392x16xf32>
    %23 = vector.broadcast %1 : vector<1x16xf32> to vector<392x16xf32>
    %24 = arith.addf %22, %23 : vector<392x16xf32>
    %cst_17 = arith.constant 0.000000e+00 : f32
    %25 = vector.broadcast %cst_17 : f32 to vector<392x16xf32>
    %26 = arith.maximumf %24, %25 : vector<392x16xf32>
    %27 = arith.maximumf %20, %26 : vector<392x16xf32>
    %28 = arith.maximumf %14, %27 : vector<392x16xf32>
    %29 = arith.truncf %28 : vector<392x16xf32> to vector<392x16xbf16>
    %c0_18 = arith.constant 0 : index
    %c0_19 = arith.constant 0 : index
    %30 = vector.load %arg7[%c0_18, %c0_19] : memref<392x16xbf16, #tpu.memory_space<vmem>>, vector<392x16xbf16>
    tpu.vector_store %arg7[%c0_18, %c0_19], %29 {strides = array<i32>} : memref<392x16xbf16, #tpu.memory_space<vmem>>, vector<392x16xbf16>,
    return
  }
  func.func @transform_0(%arg0: i32) -> (i32, i32) {
    %c0_i32 = arith.constant 0 : i32
    %c0_i32_0 = arith.constant 0 : i32
    return %arg0, %c0_i32 : i32, i32
  }
  func.func @transform_1(%arg0: i32) -> (i32, i32) {
    %c0_i32 = arith.constant 0 : i32
    %c0_i32_0 = arith.constant 0 : i32
    return %arg0, %c0_i32 : i32, i32
  }
  func.func @transform_2(%arg0: i32) -> (i32, i32) {
    %c0_i32 = arith.constant 0 : i32
    %c0_i32_0 = arith.constant 0 : i32
    return %arg0, %c0_i32 : i32, i32
  }
  func.func @transform_3(%arg0: i32) -> (i32, i32) {
    %c0_i32 = arith.constant 0 : i32
    %c0_i32_0 = arith.constant 0 : i32
    return %arg0, %c0_i32 : i32, i32
  }
  func.func @transform_4(%arg0: i32) -> (i32, i32) {
    %c0_i32 = arith.constant 0 : i32
    %c0_i32_0 = arith.constant 0 : i32
    %c0_i32_1 = arith.constant 0 : i32
    return %c0_i32, %c0_i32_0 : i32, i32
  }
  func.func @transform_5(%arg0: i32) -> (i32, i32) {
    %c0_i32 = arith.constant 0 : i32
    %c0_i32_0 = arith.constant 0 : i32
    %c0_i32_1 = arith.constant 0 : i32
    return %c0_i32, %c0_i32_0 : i32, i32
  }
  func.func @transform_6(%arg0: i32) -> (i32, i32) {
    %c0_i32 = arith.constant 0 : i32
    %c0_i32_0 = arith.constant 0 : i32
    return %arg0, %c0_i32 : i32, i32
  }
}

module attributes {stable_mosaic.version = 11 : i64} {
  func.func @_conv_bias_relu_pool_kernel(%arg0: i32, %arg1: memref<104x144xbf16, #tpu.memory_space<vmem>>, %arg2: memref<104x144xbf16, #tpu.memory_space<vmem>>, %arg3: memref<104x144xbf16, #tpu.memory_space<vmem>>, %arg4: memref<104x144xbf16, #tpu.memory_space<vmem>>, %arg5: memref<144x32xbf16, #tpu.memory_space<vmem>>, %arg6: memref<1x32xf32, #tpu.memory_space<vmem>>, %arg7: memref<104x32xbf16, #tpu.memory_space<vmem>>) attributes {dimension_semantics = [#tpu.dimension_semantics<parallel>], iteration_bounds = array<i64: 1>, scalar_prefetch = 0 : i64, scratch_operands = 0 : i64, tpu.core_type = #tpu.core_type<tc>, window_params = [{transform_indices = @transform_0, window_bounds = array<i64: 104, 144>}, {transform_indices = @transform_1, window_bounds = array<i64: 104, 144>}, {transform_indices = @transform_2, window_bounds = array<i64: 104, 144>}, {transform_indices = @transform_3, window_bounds = array<i64: 104, 144>}, {pipeline_mode = #tpu.pipeline_mode<synchronous>, transform_indices = @transform_4, window_bounds = array<i64: 144, 32>}, {pipeline_mode = #tpu.pipeline_mode<synchronous>, transform_indices = @transform_5, window_bounds = array<i64: 1, 32>}, {transform_indices = @transform_6, window_bounds = array<i64: 104, 32>}]} {
    %c0 = arith.constant 0 : index
    %c0_0 = arith.constant 0 : index
    %0 = vector.load %arg5[%c0, %c0_0] : memref<144x32xbf16, #tpu.memory_space<vmem>>, vector<144x32xbf16>
    %c0_1 = arith.constant 0 : index
    %c0_2 = arith.constant 0 : index
    %1 = vector.load %arg6[%c0_1, %c0_2] : memref<1x32xf32, #tpu.memory_space<vmem>>, vector<1x32xf32>
    %c0_3 = arith.constant 0 : index
    %c0_4 = arith.constant 0 : index
    %2 = vector.load %arg1[%c0_3, %c0_4] : memref<104x144xbf16, #tpu.memory_space<vmem>>, vector<104x144xbf16>
    %cst = arith.constant dense<0.000000e+00> : vector<104x32xf32>
    %3 = tpu.matmul %2, %0, %cst {dimension_numbers = #tpu.dot_dimension_numbers<[1], [0], [0], [1], [0, 0, 1, 1], [], []>} : vector<104x144xbf16>, vector<144x32xbf16>, vector<104x32xf32> -> vector<104x32xf32>
    %4 = vector.broadcast %1 : vector<1x32xf32> to vector<104x32xf32>
    %5 = arith.addf %3, %4 : vector<104x32xf32>
    %cst_5 = arith.constant 0.000000e+00 : f32
    %6 = vector.broadcast %cst_5 : f32 to vector<104x32xf32>
    %7 = arith.maximumf %5, %6 : vector<104x32xf32>
    %c0_6 = arith.constant 0 : index
    %c0_7 = arith.constant 0 : index
    %8 = vector.load %arg2[%c0_6, %c0_7] : memref<104x144xbf16, #tpu.memory_space<vmem>>, vector<104x144xbf16>
    %cst_8 = arith.constant dense<0.000000e+00> : vector<104x32xf32>
    %9 = tpu.matmul %8, %0, %cst_8 {dimension_numbers = #tpu.dot_dimension_numbers<[1], [0], [0], [1], [0, 0, 1, 1], [], []>} : vector<104x144xbf16>, vector<144x32xbf16>, vector<104x32xf32> -> vector<104x32xf32>
    %10 = vector.broadcast %1 : vector<1x32xf32> to vector<104x32xf32>
    %11 = arith.addf %9, %10 : vector<104x32xf32>
    %cst_9 = arith.constant 0.000000e+00 : f32
    %12 = vector.broadcast %cst_9 : f32 to vector<104x32xf32>
    %13 = arith.maximumf %11, %12 : vector<104x32xf32>
    %14 = arith.maximumf %7, %13 : vector<104x32xf32>
    %c0_10 = arith.constant 0 : index
    %c0_11 = arith.constant 0 : index
    %15 = vector.load %arg3[%c0_10, %c0_11] : memref<104x144xbf16, #tpu.memory_space<vmem>>, vector<104x144xbf16>
    %cst_12 = arith.constant dense<0.000000e+00> : vector<104x32xf32>
    %16 = tpu.matmul %15, %0, %cst_12 {dimension_numbers = #tpu.dot_dimension_numbers<[1], [0], [0], [1], [0, 0, 1, 1], [], []>} : vector<104x144xbf16>, vector<144x32xbf16>, vector<104x32xf32> -> vector<104x32xf32>
    %17 = vector.broadcast %1 : vector<1x32xf32> to vector<104x32xf32>
    %18 = arith.addf %16, %17 : vector<104x32xf32>
    %cst_13 = arith.constant 0.000000e+00 : f32
    %19 = vector.broadcast %cst_13 : f32 to vector<104x32xf32>
    %20 = arith.maximumf %18, %19 : vector<104x32xf32>
    %c0_14 = arith.constant 0 : index
    %c0_15 = arith.constant 0 : index
    %21 = vector.load %arg4[%c0_14, %c0_15] : memref<104x144xbf16, #tpu.memory_space<vmem>>, vector<104x144xbf16>
    %cst_16 = arith.constant dense<0.000000e+00> : vector<104x32xf32>
    %22 = tpu.matmul %21, %0, %cst_16 {dimension_numbers = #tpu.dot_dimension_numbers<[1], [0], [0], [1], [0, 0, 1, 1], [], []>} : vector<104x144xbf16>, vector<144x32xbf16>, vector<104x32xf32> -> vector<104x32xf32>
    %23 = vector.broadcast %1 : vector<1x32xf32> to vector<104x32xf32>
    %24 = arith.addf %22, %23 : vector<104x32xf32>
    %cst_17 = arith.constant 0.000000e+00 : f32
    %25 = vector.broadcast %cst_17 : f32 to vector<104x32xf32>
    %26 = arith.maximumf %24, %25 : vector<104x32xf32>
    %27 = arith.maximumf %20, %26 : vector<104x32xf32>
    %28 = arith.maximumf %14, %27 : vector<104x32xf32>
    %29 = arith.truncf %28 : vector<104x32xf32> to vector<104x32xbf16>
    %c0_18 = arith.constant 0 : index
    %c0_19 = arith.constant 0 : index
    %30 = vector.load %arg7[%c0_18, %c0_19] : memref<104x32xbf16, #tpu.memory_space<vmem>>, vector<104x32xbf16>
    tpu.vector_store %arg7[%c0_18, %c0_19], %29 {strides = array<i32>} : memref<104x32xbf16, #tpu.memory_space<vmem>>, vector<104x32xbf16>,
    return
  }
  func.func @transform_0(%arg0: i32) -> (i32, i32) {
    %c0_i32 = arith.constant 0 : i32
    %c0_i32_0 = arith.constant 0 : i32
    return %arg0, %c0_i32 : i32, i32
  }
  func.func @transform_1(%arg0: i32) -> (i32, i32) {
    %c0_i32 = arith.constant 0 : i32
    %c0_i32_0 = arith.constant 0 : i32
    return %arg0, %c0_i32 : i32, i32
  }
  func.func @transform_2(%arg0: i32) -> (i32, i32) {
    %c0_i32 = arith.constant 0 : i32
    %c0_i32_0 = arith.constant 0 : i32
    return %arg0, %c0_i32 : i32, i32
  }
  func.func @transform_3(%arg0: i32) -> (i32, i32) {
    %c0_i32 = arith.constant 0 : i32
    %c0_i32_0 = arith.constant 0 : i32
    return %arg0, %c0_i32 : i32, i32
  }
  func.func @transform_4(%arg0: i32) -> (i32, i32) {
    %c0_i32 = arith.constant 0 : i32
    %c0_i32_0 = arith.constant 0 : i32
    %c0_i32_1 = arith.constant 0 : i32
    return %c0_i32, %c0_i32_0 : i32, i32
  }
  func.func @transform_5(%arg0: i32) -> (i32, i32) {
    %c0_i32 = arith.constant 0 : i32
    %c0_i32_0 = arith.constant 0 : i32
    %c0_i32_1 = arith.constant 0 : i32
    return %c0_i32, %c0_i32_0 : i32, i32
  }
  func.func @transform_6(%arg0: i32) -> (i32, i32) {
    %c0_i32 = arith.constant 0 : i32
    %c0_i32_0 = arith.constant 0 : i32
    return %arg0, %c0_i32 : i32, i32
  }
}

module attributes {stable_mosaic.version = 11 : i64} {
  func.func @_fc1_relu_fc2_kernel(%arg0: i32, %arg1: memref<8x1568xbf16, #tpu.memory_space<vmem>>, %arg2: memref<1568x128xbf16, #tpu.memory_space<vmem>>, %arg3: memref<1x128xf32, #tpu.memory_space<vmem>>, %arg4: memref<128x128xbf16, #tpu.memory_space<vmem>>, %arg5: memref<1x128xf32, #tpu.memory_space<vmem>>, %arg6: memref<8x128xf32, #tpu.memory_space<vmem>>) attributes {dimension_semantics = [#tpu.dimension_semantics<parallel>], iteration_bounds = array<i64: 1>, scalar_prefetch = 0 : i64, scratch_operands = 0 : i64, tpu.core_type = #tpu.core_type<tc>, window_params = [{transform_indices = @transform_0, window_bounds = array<i64: 8, 1568>}, {pipeline_mode = #tpu.pipeline_mode<synchronous>, transform_indices = @transform_1, window_bounds = array<i64: 1568, 128>}, {pipeline_mode = #tpu.pipeline_mode<synchronous>, transform_indices = @transform_2, window_bounds = array<i64: 1, 128>}, {pipeline_mode = #tpu.pipeline_mode<synchronous>, transform_indices = @transform_3, window_bounds = array<i64: 128, 128>}, {pipeline_mode = #tpu.pipeline_mode<synchronous>, transform_indices = @transform_4, window_bounds = array<i64: 1, 128>}, {transform_indices = @transform_5, window_bounds = array<i64: 8, 128>}]} {
    %c0 = arith.constant 0 : index
    %c0_0 = arith.constant 0 : index
    %0 = vector.load %arg1[%c0, %c0_0] : memref<8x1568xbf16, #tpu.memory_space<vmem>>, vector<8x1568xbf16>
    %c0_1 = arith.constant 0 : index
    %c0_2 = arith.constant 0 : index
    %1 = vector.load %arg2[%c0_1, %c0_2] : memref<1568x128xbf16, #tpu.memory_space<vmem>>, vector<1568x128xbf16>
    %cst = arith.constant dense<0.000000e+00> : vector<8x128xf32>
    %2 = tpu.matmul %0, %1, %cst {dimension_numbers = #tpu.dot_dimension_numbers<[1], [0], [0], [1], [0, 0, 1, 1], [], []>} : vector<8x1568xbf16>, vector<1568x128xbf16>, vector<8x128xf32> -> vector<8x128xf32>
    %c0_3 = arith.constant 0 : index
    %c0_4 = arith.constant 0 : index
    %3 = vector.load %arg3[%c0_3, %c0_4] : memref<1x128xf32, #tpu.memory_space<vmem>>, vector<1x128xf32>
    %4 = vector.broadcast %3 : vector<1x128xf32> to vector<8x128xf32>
    %5 = arith.addf %2, %4 : vector<8x128xf32>
    %cst_5 = arith.constant 0.000000e+00 : f32
    %6 = vector.broadcast %cst_5 : f32 to vector<8x128xf32>
    %7 = arith.maximumf %5, %6 : vector<8x128xf32>
    %8 = arith.truncf %7 : vector<8x128xf32> to vector<8x128xbf16>
    %c0_6 = arith.constant 0 : index
    %c0_7 = arith.constant 0 : index
    %9 = vector.load %arg4[%c0_6, %c0_7] : memref<128x128xbf16, #tpu.memory_space<vmem>>, vector<128x128xbf16>
    %cst_8 = arith.constant dense<0.000000e+00> : vector<8x128xf32>
    %10 = tpu.matmul %8, %9, %cst_8 {dimension_numbers = #tpu.dot_dimension_numbers<[1], [0], [0], [1], [0, 0, 1, 1], [], []>} : vector<8x128xbf16>, vector<128x128xbf16>, vector<8x128xf32> -> vector<8x128xf32>
    %c0_9 = arith.constant 0 : index
    %c0_10 = arith.constant 0 : index
    %11 = vector.load %arg5[%c0_9, %c0_10] : memref<1x128xf32, #tpu.memory_space<vmem>>, vector<1x128xf32>
    %12 = vector.broadcast %11 : vector<1x128xf32> to vector<8x128xf32>
    %13 = arith.addf %10, %12 : vector<8x128xf32>
    %c0_11 = arith.constant 0 : index
    %c0_12 = arith.constant 0 : index
    %14 = vector.load %arg6[%c0_11, %c0_12] : memref<8x128xf32, #tpu.memory_space<vmem>>, vector<8x128xf32>
    tpu.vector_store %arg6[%c0_11, %c0_12], %13 {strides = array<i32>} : memref<8x128xf32, #tpu.memory_space<vmem>>, vector<8x128xf32>,
    return
  }
  func.func @transform_0(%arg0: i32) -> (i32, i32) {
    %c0_i32 = arith.constant 0 : i32
    %c0_i32_0 = arith.constant 0 : i32
    return %arg0, %c0_i32 : i32, i32
  }
  func.func @transform_1(%arg0: i32) -> (i32, i32) {
    %c0_i32 = arith.constant 0 : i32
    %c0_i32_0 = arith.constant 0 : i32
    %c0_i32_1 = arith.constant 0 : i32
    return %c0_i32, %c0_i32_0 : i32, i32
  }
  func.func @transform_2(%arg0: i32) -> (i32, i32) {
    %c0_i32 = arith.constant 0 : i32
    %c0_i32_0 = arith.constant 0 : i32
    %c0_i32_1 = arith.constant 0 : i32
    return %c0_i32, %c0_i32_0 : i32, i32
  }
  func.func @transform_3(%arg0: i32) -> (i32, i32) {
    %c0_i32 = arith.constant 0 : i32
    %c0_i32_0 = arith.constant 0 : i32
    %c0_i32_1 = arith.constant 0 : i32
    return %c0_i32, %c0_i32_0 : i32, i32
  }
  func.func @transform_4(%arg0: i32) -> (i32, i32) {
    %c0_i32 = arith.constant 0 : i32
    %c0_i32_0 = arith.constant 0 : i32
    %c0_i32_1 = arith.constant 0 : i32
    return %c0_i32, %c0_i32_0 : i32, i32
  }
  func.func @transform_5(%arg0: i32) -> (i32, i32) {
    %c0_i32 = arith.constant 0 : i32
    %c0_i32_0 = arith.constant 0 : i32
    return %arg0, %c0_i32 : i32, i32
  }
}

</mosaic_0001>

<bundles_post_ra>
// kernel: cnn_forward.3
= control target key start
LH: loop header
LB: loop body
LE: loop exit
PB: predicated region body
PF: predicated region fallthrough
CT: control target
= control target key end

     0   :  { %vm283_vm0 = vcmask 1043456   ;;  %vm284_vm1 = vcmask 1044480   ;;  %v2597_v2 = vmov 65535   ;;  %vm207_vm2 = vcmask 72704   ;;  %s3441_s4 = inlined_call_operand.vmem [shape: bf16[9,16], index: 4, kind: input, shape index: {}]   ;;  %s3442_s0 = inlined_call_operand.vmem [shape: bf16[392,9], index: 0, kind: input, shape index: {}]   ;;  %s3443_s1 = inlined_call_operand.vmem [shape: bf16[392,9], index: 1, kind: input, shape index: {}]   ;;  %s3444_s2 = inlined_call_operand.vmem [shape: bf16[392,9], index: 2, kind: input, shape index: {}]   ;;  %s3445_s3 = inlined_call_operand.vmem [shape: bf16[392,9], index: 3, kind: input, shape index: {}]   ;;  %s3446_s5 = inlined_call_operand.vmem [shape: f32[1,16], index: 5, kind: input, shape index: {}]   ;;  %s3447_s6 = inlined_call_operand.vmem [shape: bf16[392,16], index: 6, kind: output, shape index: {}]  }
   0x1   :  { %v2107_v0 = vld [vmem:[%s3441_s4] sm:$0xf]  ;;  %v2497_v1 = vld [vmem:[%s3441_s4] sm:$0x10]  ;;  %v285_v3 = vsel %vm283_vm0, 4294967295, %v2597_v2  ;;  %v2499_v11 = vld [vmem:[%s3442_s0 + $0x8] sm:$0xff] }
   0x2   :  { %v2108_v4 = vor.u32 %v2497_v1, %v2107_v0  ;;  %v286_v5 = vsel %vm284_vm1, %v285_v3, 0  ;;  %v2498_v7 = vld [vmem:[%s3442_s0] sm:$0xff]  ;;  %v2523_v12 = vld [vmem:[%s3443_s1 + $0x8] sm:$0xff]  ;;  %v2500_v15 = vld [vmem:[%s3442_s0 + $0x10] sm:$0xff]  ;;  %vm1955_vm3 = vcmask 125952  }
   0x3   :  { %v2522_v8 = vld [vmem:[%s3443_s1] sm:$0xff]  ;;  %v2547_v13 = vld [vmem:[%s3444_s2 + $0x8] sm:$0xff]  ;;  %v2524_v16 = vld [vmem:[%s3443_s1 + $0x10] sm:$0xff] }
   0x4   :  { %v288_v6 = vand.u32 %v2108_v4, %v286_v5  ;;  %v2546_v9 = vld [vmem:[%s3444_s2] sm:$0xff]  ;;  %v2571_v14 = vld [vmem:[%s3445_s3 + $0x8] sm:$0xff]  ;;  %v2548_v17 = vld [vmem:[%s3444_s2 + $0x10] sm:$0xff] }
   0x5   :  { %v2570_v10 = vld [vmem:[%s3445_s3] sm:$0xff]  ;;  %v2572_v18 = vld [vmem:[%s3445_s3 + $0x10] sm:$0xff]  ;;  %v2501_v19 = vld [vmem:[%s3442_s0 + $0x18] sm:$0xff] }
   0x6   :  { %297 = vmatpush.bf16.msra.mxu0 %v288_v6  ;;  %726 = vmatpush.bf16.msra.mxu1 %v288_v6  ;;  %v2525_v20 = vld [vmem:[%s3443_s1 + $0x18] sm:$0xff]  ;;  %v2502_v23 = vld [vmem:[%s3442_s0 + $0x20] sm:$0xff]  ;;  %v2503_v27 = vld [vmem:[%s3442_s0 + $0x28] sm:$0xff] }
   0x7   :  { %1204 = vmatpush.bf16.msra.mxu2 %v288_v6  ;;  %1633 = vmatpush.bf16.msra.mxu3 %v288_v6  ;;  %v2549_v21 = vld [vmem:[%s3444_s2 + $0x18] sm:$0xff]  ;;  %v2526_v24 = vld [vmem:[%s3443_s1 + $0x20] sm:$0xff]  ;;  %v2527_v28 = vld [vmem:[%s3443_s1 + $0x28] sm:$0xff] }
   0x8   :  { %v2573_v22 = vld [vmem:[%s3445_s3 + $0x18] sm:$0xff]  ;;  %v2550_v25 = vld [vmem:[%s3444_s2 + $0x20] sm:$0xff]  ;;  %v2551_v29 = vld [vmem:[%s3444_s2 + $0x28] sm:$0xff] }
   0x9   :  { %2109 = vmatmul.msk.bf16.vlgmr.msra.gmra.mxu0 %vm207_vm2, %v2498_v7  ;;  %2230 = vmatmul.msk.bf16.vlgmr.msra.gmra.mxu1 %vm207_vm2, %v2522_v8  ;;  %v2574_v26 = vld [vmem:[%s3445_s3 + $0x20] sm:$0xff]  ;;  %v2575_v30 = vld [vmem:[%s3445_s3 + $0x28] sm:$0xff]  ;;  %v2504_v31 = vld [vmem:[%s3442_s0 + $0x30] sm:$0xff] }
   0xa   :  { %2351 = vmatmul.msk.bf16.vlgmr.msra.gmra.mxu2 %vm207_vm2, %v2546_v9  ;;  %2472 = vmatmul.msk.bf16.vlgmr.msra.gmra.mxu3 %vm207_vm2, %v2570_v10  ;;  %v2528_v32 = vld [vmem:[%s3443_s1 + $0x30] sm:$0xff]  ;;  %v2505_v35 = vld [vmem:[%s3442_s0 + $0x38] sm:$0xff]  ;;  %v2770_v39 = vld [vmem:[%s3446_s5] ss:$0 sm:$0xff] }
   0xb   :  { %v2552_v33 = vld [vmem:[%s3444_s2 + $0x30] sm:$0xff]  ;;  %v2529_v36 = vld [vmem:[%s3443_s1 + $0x38] sm:$0xff]  ;;  %v2506_v40 = vld [vmem:[%s3442_s0 + $0x40] sm:$0xff] }
   0xc   :  { %v2576_v34 = vld [vmem:[%s3445_s3 + $0x30] sm:$0xff]  ;;  %v2553_v37 = vld [vmem:[%s3444_s2 + $0x38] sm:$0xff]  ;;  %v2530_v41 = vld [vmem:[%s3443_s1 + $0x40] sm:$0xff] }
   0xd   :  { %v2577_v38 = vld [vmem:[%s3445_s3 + $0x38] sm:$0xff]  ;;  %v2554_v44 = vld [vmem:[%s3444_s2 + $0x40] sm:$0xff]  ;;  %v2507_v2 = vld [vmem:[%s3442_s0 + $0x48] sm:$0xff] }
   0xe   :  { %v2578_v45 = vld [vmem:[%s3445_s3 + $0x40] sm:$0xff]  ;;  %v2531_v3 = vld [vmem:[%s3443_s1 + $0x48] sm:$0xff] }
   0xf   :  { %v2555_v10 = vld [vmem:[%s3444_s2 + $0x48] sm:$0xff] }
  0x19   :  { %2110 = vmatmul.msk.bf16.gmra.mxu0 %vm207_vm2, %v2499_v11  ;;  %2231 = vmatmul.msk.bf16.gmra.mxu1 %vm207_vm2, %v2523_v12  ;;  %v2579_v11 = vld [vmem:[%s3445_s3 + $0x48] sm:$0xff] }
  0x1a   :  { %2352 = vmatmul.msk.bf16.gmra.mxu2 %vm207_vm2, %v2547_v13  ;;  %2473 = vmatmul.msk.bf16.gmra.mxu3 %vm207_vm2, %v2571_v14 }
  0x29   :  { %2111 = vmatmul.msk.bf16.gmra.mxu0 %vm207_vm2, %v2500_v15  ;;  %2232 = vmatmul.msk.bf16.gmra.mxu1 %vm207_vm2, %v2524_v16 }
  0x2a   :  { %2353 = vmatmul.msk.bf16.gmra.mxu2 %vm207_vm2, %v2548_v17  ;;  %2474 = vmatmul.msk.bf16.gmra.mxu3 %vm207_vm2, %v2572_v18 }
  0x39   :  { %2112 = vmatmul.msk.bf16.gmra.mxu0 %vm207_vm2, %v2501_v19  ;;  %2233 = vmatmul.msk.bf16.gmra.mxu1 %vm207_vm2, %v2525_v20 }
  0x3a   :  { %2354 = vmatmul.msk.bf16.gmra.mxu2 %vm207_vm2, %v2549_v21  ;;  %2475 = vmatmul.msk.bf16.gmra.mxu3 %vm207_vm2, %v2573_v22 }
  0x49   :  { %2113 = vmatmul.msk.bf16.gmra.mxu0 %vm207_vm2, %v2502_v23  ;;  %2234 = vmatmul.msk.bf16.gmra.mxu1 %vm207_vm2, %v2526_v24 }
  0x4a   :  { %2355 = vmatmul.msk.bf16.gmra.mxu2 %vm207_vm2, %v2550_v25  ;;  %2476 = vmatmul.msk.bf16.gmra.mxu3 %vm207_vm2, %v2574_v26 }
  0x59   :  { %2114 = vmatmul.msk.bf16.gmra.mxu0 %vm207_vm2, %v2503_v27  ;;  %2235 = vmatmul.msk.bf16.gmra.mxu1 %vm207_vm2, %v2527_v28 }
  0x5a   :  { %2356 = vmatmul.msk.bf16.gmra.mxu2 %vm207_vm2, %v2551_v29  ;;  %2477 = vmatmul.msk.bf16.gmra.mxu3 %vm207_vm2, %v2575_v30 }
  0x69   :  { %2115 = vmatmul.msk.bf16.gmra.mxu0 %vm207_vm2, %v2504_v31  ;;  %2236 = vmatmul.msk.bf16.gmra.mxu1 %vm207_vm2, %v2528_v32 }
  0x6a   :  { %2357 = vmatmul.msk.bf16.gmra.mxu2 %vm207_vm2, %v2552_v33  ;;  %2478 = vmatmul.msk.bf16.gmra.mxu3 %vm207_vm2, %v2576_v34 }
  0x79   :  { %2116 = vmatmul.msk.bf16.gmra.mxu0 %vm207_vm2, %v2505_v35  ;;  %2237 = vmatmul.msk.bf16.gmra.mxu1 %vm207_vm2, %v2529_v36 }
  0x7a   :  { %2358 = vmatmul.msk.bf16.gmra.mxu2 %vm207_vm2, %v2553_v37  ;;  %2479 = vmatmul.msk.bf16.gmra.mxu3 %vm207_vm2, %v2577_v38  ;;  %v2508_v38 = vld [vmem:[%s3442_s0 + $0x50] sm:$0xff] }
  0x86   :  { %v299_v42 = vpop.f32.mrf.mxu0  ;;  %v728_v43 = vpop.f32.mrf.mxu1 }
  0x87   :  { %v300_v46 = vadd.f32 %v2770_v39, %v299_v42  ;;  %v729_v47 = vadd.f32 %v2770_v39, %v728_v43 }
  0x89   :  { %2117 = vmatmul.msk.bf16.gmra.mxu0 %vm207_vm2, %v2506_v40  ;;  %2238 = vmatmul.msk.bf16.gmra.mxu1 %vm207_vm2, %v2530_v41  ;;  %v423_v48 = vmax.f32 %v300_v46, 0.0  ;;  %v852_v49 = vmax.f32 %v729_v47, 0.0  ;;  %v2532_v40 = vld [vmem:[%s3443_s1 + $0x50] sm:$0xff] }
  0x8a   :  { %2359 = vmatmul.msk.bf16.gmra.mxu2 %vm207_vm2, %v2554_v44  ;;  %2480 = vmatmul.msk.bf16.gmra.mxu3 %vm207_vm2, %v2578_v45  ;;  %v2556_v47 = vld [vmem:[%s3444_s2 + $0x50] sm:$0xff] }
  0x8b   :  { %v901_v56 = vmax.f32 %v423_v48, %v852_v49  ;;  %v2580_v48 = vld [vmem:[%s3445_s3 + $0x50] sm:$0xff] }
  0x8d   :  { %v1206_v50 = vpop.f32.mrf.mxu2  ;;  %v1635_v51 = vpop.f32.mrf.mxu3 }
  0x8e   :  { %v1207_v52 = vadd.f32 %v2770_v39, %v1206_v50  ;;  %v1636_v53 = vadd.f32 %v2770_v39, %v1635_v51  ;;  %v301_v54 = vpop.f32.mrf.mxu0  ;;  %v730_v55 = vpop.f32.mrf.mxu1 }
  0x8f   :  { %v302_v59 = vadd.f32 %v2770_v39, %v301_v54  ;;  %v731_v61 = vadd.f32 %v2770_v39, %v730_v55 }
  0x90   :  { %v1330_v57 = vmax.f32 %v1207_v52, 0.0  ;;  %v1759_v58 = vmax.f32 %v1636_v53, 0.0 }
  0x91   :  { %v424_v63 = vmax.f32 %v302_v59, 0.0  ;;  %v853_v5 = vmax.f32 %v731_v61, 0.0 }
  0x92   :  { %v1808_v60 = vmax.f32 %v1330_v57, %v1759_v58 }
  0x93   :  { %v902_v16 = vmax.f32 %v424_v63, %v853_v5 }
  0x94   :  { %v1857_v62 = vmax.f32 %v901_v56, %v1808_v60 }
  0x95   :  { %v1208_v0 = vpop.f32.mrf.mxu2  ;;  %v1637_v1 = vpop.f32.mrf.mxu3 }
  0x96   :  { %v1906_v4 = vpack.c.bf16 %v1857_v62, %v1857_v62  ;;  %v1209_v6 = vadd.f32 %v2770_v39, %v1208_v0  ;;  %v1638_v7 = vadd.f32 %v2770_v39, %v1637_v1  ;;  %v304_v8 = vpop.f32.mrf.mxu0  ;;  %v733_v9 = vpop.f32.mrf.mxu1 }
  0x97   :  { %v305_v14 = vadd.f32 %v2770_v39, %v304_v8  ;;  %v734_v15 = vadd.f32 %v2770_v39, %v733_v9 }
  0x98   :  { %1956 = vst.msk [vmem:[%s3447_s6] sm:$0xf] %vm1955_vm3, %v1906_v4  ;;  %v1331_v12 = vmax.f32 %v1209_v6, 0.0  ;;  %v1760_v13 = vmax.f32 %v1638_v7, 0.0 }
  0x99   :  { %2118 = vmatmul.msk.bf16.gmra.mxu0 %vm207_vm2, %v2507_v2  ;;  %2239 = vmatmul.msk.bf16.gmra.mxu1 %vm207_vm2, %v2531_v3  ;;  %v425_v19 = vmax.f32 %v305_v14, 0.0  ;;  %v854_v20 = vmax.f32 %v734_v15, 0.0 }
  0x9a   :  { %v1809_v17 = vmax.f32 %v1331_v12, %v1760_v13  ;;  %2360 = vmatmul.msk.bf16.gmra.mxu2 %vm207_vm2, %v2555_v10  ;;  %2481 = vmatmul.msk.bf16.gmra.mxu3 %vm207_vm2, %v2579_v11  ;;  %v2509_v11 = vld [vmem:[%s3442_s0 + $0x58] sm:$0xff] }
  0x9b   :  { %v903_v28 = vmax.f32 %v425_v19, %v854_v20  ;;  %v2533_v12 = vld [vmem:[%s3443_s1 + $0x58] sm:$0xff] }
  0x9c   :  { %v1858_v18 = vmax.f32 %v902_v16, %v1809_v17  ;;  %v2557_v19 = vld [vmem:[%s3444_s2 + $0x58] sm:$0xff] }
  0x9d   :  { %v1211_v21 = vpop.f32.mrf.mxu2  ;;  %v1640_v22 = vpop.f32.mrf.mxu3  ;;  %v2581_v20 = vld [vmem:[%s3445_s3 + $0x58] sm:$0xff] }
  0x9e   :  { %v1907_v23 = vpack.c.bf16 %v1858_v18, %v1858_v18  ;;  %v1212_v24 = vadd.f32 %v2770_v39, %v1211_v21  ;;  %v1641_v25 = vadd.f32 %v2770_v39, %v1640_v22  ;;  %v306_v26 = vpop.f32.mrf.mxu0  ;;  %v735_v27 = vpop.f32.mrf.mxu1 }
  0x9f   :  { %v307_v31 = vadd.f32 %v2770_v39, %v306_v26  ;;  %v736_v33 = vadd.f32 %v2770_v39, %v735_v27 }
  0xa0   :  { %1957 = vst.msk [vmem:[%s3447_s6 + $0x4] sm:$0xf] %vm1955_vm3, %v1907_v23  ;;  %v1332_v29 = vmax.f32 %v1212_v24, 0.0  ;;  %v1761_v30 = vmax.f32 %v1641_v25, 0.0 }
  0xa1   :  { %v426_v35 = vmax.f32 %v307_v31, 0.0  ;;  %v855_v42 = vmax.f32 %v736_v33, 0.0 }
  0xa2   :  { %v1810_v32 = vmax.f32 %v1332_v29, %v1761_v30 }
  0xa3   :  { %v904_v53 = vmax.f32 %v426_v35, %v855_v42 }
  0xa4   :  { %v1859_v34 = vmax.f32 %v903_v28, %v1810_v32 }
  0xa5   :  { %v1213_v36 = vpop.f32.mrf.mxu2  ;;  %v1642_v37 = vpop.f32.mrf.mxu3 }
  0xa6   :  { %v1908_v41 = vpack.c.bf16 %v1859_v34, %v1859_v34  ;;  %v1214_v43 = vadd.f32 %v2770_v39, %v1213_v36  ;;  %v1643_v44 = vadd.f32 %v2770_v39, %v1642_v37  ;;  %v309_v45 = vpop.f32.mrf.mxu0  ;;  %v738_v46 = vpop.f32.mrf.mxu1 }
  0xa7   :  { %v310_v51 = vadd.f32 %v2770_v39, %v309_v45  ;;  %v739_v52 = vadd.f32 %v2770_v39, %v738_v46 }
  0xa8   :  { %1958 = vst.msk [vmem:[%s3447_s6 + $0x8] sm:$0xf] %vm1955_vm3, %v1908_v41  ;;  %v1333_v49 = vmax.f32 %v1214_v43, 0.0  ;;  %v1762_v50 = vmax.f32 %v1643_v44, 0.0 }
  0xa9   :  { %2119 = vmatmul.msk.bf16.gmra.mxu0 %vm207_vm2, %v2508_v38  ;;  %2240 = vmatmul.msk.bf16.gmra.mxu1 %vm207_vm2, %v2532_v40  ;;  %v427_v56 = vmax.f32 %v310_v51, 0.0  ;;  %v856_v57 = vmax.f32 %v739_v52, 0.0 }
  0xaa   :  { %v1811_v54 = vmax.f32 %v1333_v49, %v1762_v50  ;;  %2361 = vmatmul.msk.bf16.gmra.mxu2 %vm207_vm2, %v2556_v47  ;;  %2482 = vmatmul.msk.bf16.gmra.mxu3 %vm207_vm2, %v2580_v48  ;;  %v2510_v48 = vld [vmem:[%s3442_s0 + $0x60] sm:$0xff] }
  0xab   :  { %v905_v1 = vmax.f32 %v427_v56, %v856_v57  ;;  %v2534_v49 = vld [vmem:[%s3443_s1 + $0x60] sm:$0xff] }
  0xac   :  { %v1860_v55 = vmax.f32 %v904_v53, %v1811_v54  ;;  %v2558_v56 = vld [vmem:[%s3444_s2 + $0x60] sm:$0xff] }
  0xad   :  { %v1216_v58 = vpop.f32.mrf.mxu2  ;;  %v1645_v59 = vpop.f32.mrf.mxu3  ;;  %v2582_v57 = vld [vmem:[%s3445_s3 + $0x60] sm:$0xff] }
  0xae   :  { %v1909_v60 = vpack.c.bf16 %v1860_v55, %v1860_v55  ;;  %v1217_v61 = vadd.f32 %v2770_v39, %v1216_v58  ;;  %v1646_v62 = vadd.f32 %v2770_v39, %v1645_v59  ;;  %v311_v63 = vpop.f32.mrf.mxu0  ;;  %v740_v0 = vpop.f32.mrf.mxu1 }
  0xaf   :  { %v312_v4 = vadd.f32 %v2770_v39, %v311_v63  ;;  %v741_v6 = vadd.f32 %v2770_v39, %v740_v0 }
  0xb0   :  { %1959 = vst.msk [vmem:[%s3447_s6 + $0xc] sm:$0xf] %vm1955_vm3, %v1909_v60  ;;  %v1334_v2 = vmax.f32 %v1217_v61, 0.0  ;;  %v1763_v3 = vmax.f32 %v1646_v62, 0.0 }
  0xb1   :  { %v428_v8 = vmax.f32 %v312_v4, 0.0  ;;  %v857_v14 = vmax.f32 %v741_v6, 0.0 }
  0xb2   :  { %v1812_v5 = vmax.f32 %v1334_v2, %v1763_v3 }
  0xb3   :  { %v906_v25 = vmax.f32 %v428_v8, %v857_v14 }
  0xb4   :  { %v1861_v7 = vmax.f32 %v905_v1, %v1812_v5 }
  0xb5   :  { %v1218_v9 = vpop.f32.mrf.mxu2  ;;  %v1647_v10 = vpop.f32.mrf.mxu3 }
  0xb6   :  { %v1910_v13 = vpack.c.bf16 %v1861_v7, %v1861_v7  ;;  %v1219_v15 = vadd.f32 %v2770_v39, %v1218_v9  ;;  %v1648_v16 = vadd.f32 %v2770_v39, %v1647_v10  ;;  %v314_v17 = vpop.f32.mrf.mxu0  ;;  %v743_v18 = vpop.f32.mrf.mxu1 }
  0xb7   :  { %v315_v23 = vadd.f32 %v2770_v39, %v314_v17  ;;  %v744_v24 = vadd.f32 %v2770_v39, %v743_v18 }
  0xb8   :  { %1960 = vst.msk [vmem:[%s3447_s6 + $0x10] sm:$0xf] %vm1955_vm3, %v1910_v13  ;;  %v1335_v21 = vmax.f32 %v1219_v15, 0.0  ;;  %v1764_v22 = vmax.f32 %v1648_v16, 0.0 }
  0xb9   :  { %2120 = vmatmul.msk.bf16.gmra.mxu0 %vm207_vm2, %v2509_v11  ;;  %2241 = vmatmul.msk.bf16.gmra.mxu1 %vm207_vm2, %v2533_v12  ;;  %v429_v28 = vmax.f32 %v315_v23, 0.0  ;;  %v858_v29 = vmax.f32 %v744_v24, 0.0 }
  0xba   :  { %v1813_v26 = vmax.f32 %v1335_v21, %v1764_v22  ;;  %2362 = vmatmul.msk.bf16.gmra.mxu2 %vm207_vm2, %v2557_v19  ;;  %2483 = vmatmul.msk.bf16.gmra.mxu3 %vm207_vm2, %v2581_v20  ;;  %v2511_v20 = vld [vmem:[%s3442_s0 + $0x68] sm:$0xff] }
  0xbb   :  { %v907_v37 = vmax.f32 %v429_v28, %v858_v29  ;;  %v2535_v21 = vld [vmem:[%s3443_s1 + $0x68] sm:$0xff] }
  0xbc   :  { %v1862_v27 = vmax.f32 %v906_v25, %v1813_v26  ;;  %v2559_v28 = vld [vmem:[%s3444_s2 + $0x68] sm:$0xff] }
  0xbd   :  { %v1221_v30 = vpop.f32.mrf.mxu2  ;;  %v1650_v31 = vpop.f32.mrf.mxu3  ;;  %v2583_v29 = vld [vmem:[%s3445_s3 + $0x68] sm:$0xff] }
  0xbe   :  { %v1911_v32 = vpack.c.bf16 %v1862_v27, %v1862_v27  ;;  %v1222_v33 = vadd.f32 %v2770_v39, %v1221_v30  ;;  %v1651_v34 = vadd.f32 %v2770_v39, %v1650_v31  ;;  %v316_v35 = vpop.f32.mrf.mxu0  ;;  %v745_v36 = vpop.f32.mrf.mxu1 }
  0xbf   :  { %v317_v41 = vadd.f32 %v2770_v39, %v316_v35  ;;  %v746_v43 = vadd.f32 %v2770_v39, %v745_v36 }
  0xc0   :  { %1961 = vst.msk [vmem:[%s3447_s6 + $0x14] sm:$0xf] %vm1955_vm3, %v1911_v32  ;;  %v1336_v38 = vmax.f32 %v1222_v33, 0.0  ;;  %v1765_v40 = vmax.f32 %v1651_v34, 0.0 }
  0xc1   :  { %v430_v45 = vmax.f32 %v317_v41, 0.0  ;;  %v859_v51 = vmax.f32 %v746_v43, 0.0 }
  0xc2   :  { %v1814_v42 = vmax.f32 %v1336_v38, %v1765_v40 }
  0xc3   :  { %v908_v62 = vmax.f32 %v430_v45, %v859_v51 }
  0xc4   :  { %v1863_v44 = vmax.f32 %v907_v37, %v1814_v42 }
  0xc5   :  { %v1223_v46 = vpop.f32.mrf.mxu2  ;;  %v1652_v47 = vpop.f32.mrf.mxu3 }
  0xc6   :  { %v1912_v50 = vpack.c.bf16 %v1863_v44, %v1863_v44  ;;  %v1224_v52 = vadd.f32 %v2770_v39, %v1223_v46  ;;  %v1653_v53 = vadd.f32 %v2770_v39, %v1652_v47  ;;  %v319_v54 = vpop.f32.mrf.mxu0  ;;  %v748_v55 = vpop.f32.mrf.mxu1 }
  0xc7   :  { %v320_v60 = vadd.f32 %v2770_v39, %v319_v54  ;;  %v749_v61 = vadd.f32 %v2770_v39, %v748_v55 }
  0xc8   :  { %1962 = vst.msk [vmem:[%s3447_s6 + $0x18] sm:$0xf] %vm1955_vm3, %v1912_v50  ;;  %v1337_v58 = vmax.f32 %v1224_v52, 0.0  ;;  %v1766_v59 = vmax.f32 %v1653_v53, 0.0 }
  0xc9   :  { %2121 = vmatmul.msk.bf16.gmra.mxu0 %vm207_vm2, %v2510_v48  ;;  %2242 = vmatmul.msk.bf16.gmra.mxu1 %vm207_vm2, %v2534_v49  ;;  %v431_v1 = vmax.f32 %v320_v60, 0.0  ;;  %v860_v2 = vmax.f32 %v749_v61, 0.0 }
  0xca   :  { %v1815_v63 = vmax.f32 %v1337_v58, %v1766_v59  ;;  %2363 = vmatmul.msk.bf16.gmra.mxu2 %vm207_vm2, %v2558_v56  ;;  %2484 = vmatmul.msk.bf16.gmra.mxu3 %vm207_vm2, %v2582_v57  ;;  %v2512_v57 = vld [vmem:[%s3442_s0 + $0x70] sm:$0xff] }
  0xcb   :  { %v909_v10 = vmax.f32 %v431_v1, %v860_v2  ;;  %v2536_v58 = vld [vmem:[%s3443_s1 + $0x70] sm:$0xff] }
  0xcc   :  { %v1864_v0 = vmax.f32 %v908_v62, %v1815_v63  ;;  %v2560_v1 = vld [vmem:[%s3444_s2 + $0x70] sm:$0xff] }
  0xcd   :  { %v1226_v3 = vpop.f32.mrf.mxu2  ;;  %v1655_v4 = vpop.f32.mrf.mxu3  ;;  %v2584_v2 = vld [vmem:[%s3445_s3 + $0x70] sm:$0xff] }
  0xce   :  { %v1913_v5 = vpack.c.bf16 %v1864_v0, %v1864_v0  ;;  %v1227_v6 = vadd.f32 %v2770_v39, %v1226_v3  ;;  %v1656_v7 = vadd.f32 %v2770_v39, %v1655_v4  ;;  %v321_v8 = vpop.f32.mrf.mxu0  ;;  %v750_v9 = vpop.f32.mrf.mxu1 }
  0xcf   :  { %v322_v13 = vadd.f32 %v2770_v39, %v321_v8  ;;  %v751_v15 = vadd.f32 %v2770_v39, %v750_v9 }
  0xd0   :  { %1963 = vst.msk [vmem:[%s3447_s6 + $0x1c] sm:$0xf] %vm1955_vm3, %v1913_v5  ;;  %v1338_v11 = vmax.f32 %v1227_v6, 0.0  ;;  %v1767_v12 = vmax.f32 %v1656_v7, 0.0 }
  0xd1   :  { %v432_v17 = vmax.f32 %v322_v13, 0.0  ;;  %v861_v23 = vmax.f32 %v751_v15, 0.0 }
  0xd2   :  { %v1816_v14 = vmax.f32 %v1338_v11, %v1767_v12 }
  0xd3   :  { %v910_v34 = vmax.f32 %v432_v17, %v861_v23 }
  0xd4   :  { %v1865_v16 = vmax.f32 %v909_v10, %v1816_v14 }
  0xd5   :  { %v1228_v18 = vpop.f32.mrf.mxu2  ;;  %v1657_v19 = vpop.f32.mrf.mxu3 }
  0xd6   :  { %v1914_v22 = vpack.c.bf16 %v1865_v16, %v1865_v16  ;;  %v1229_v24 = vadd.f32 %v2770_v39, %v1228_v18  ;;  %v1658_v25 = vadd.f32 %v2770_v39, %v1657_v19  ;;  %v324_v26 = vpop.f32.mrf.mxu0  ;;  %v753_v27 = vpop.f32.mrf.mxu1 }
  0xd7   :  { %v325_v32 = vadd.f32 %v2770_v39, %v324_v26  ;;  %v754_v33 = vadd.f32 %v2770_v39, %v753_v27 }
  0xd8   :  { %1964 = vst.msk [vmem:[%s3447_s6 + $0x20] sm:$0xf] %vm1955_vm3, %v1914_v22  ;;  %v1339_v30 = vmax.f32 %v1229_v24, 0.0  ;;  %v1768_v31 = vmax.f32 %v1658_v25, 0.0 }
  0xd9   :  { %2122 = vmatmul.msk.bf16.gmra.mxu0 %vm207_vm2, %v2511_v20  ;;  %2243 = vmatmul.msk.bf16.gmra.mxu1 %vm207_vm2, %v2535_v21  ;;  %v433_v37 = vmax.f32 %v325_v32, 0.0  ;;  %v862_v38 = vmax.f32 %v754_v33, 0.0 }
  0xda   :  { %v1817_v35 = vmax.f32 %v1339_v30, %v1768_v31  ;;  %2364 = vmatmul.msk.bf16.gmra.mxu2 %vm207_vm2, %v2559_v28  ;;  %2485 = vmatmul.msk.bf16.gmra.mxu3 %vm207_vm2, %v2583_v29  ;;  %v2513_v29 = vld [vmem:[%s3442_s0 + $0x78] sm:$0xff] }
  0xdb   :  { %v911_v47 = vmax.f32 %v433_v37, %v862_v38  ;;  %v2537_v30 = vld [vmem:[%s3443_s1 + $0x78] sm:$0xff] }
  0xdc   :  { %v1866_v36 = vmax.f32 %v910_v34, %v1817_v35  ;;  %v2561_v37 = vld [vmem:[%s3444_s2 + $0x78] sm:$0xff] }
  0xdd   :  { %v1231_v40 = vpop.f32.mrf.mxu2  ;;  %v1660_v41 = vpop.f32.mrf.mxu3  ;;  %v2585_v38 = vld [vmem:[%s3445_s3 + $0x78] sm:$0xff] }
  0xde   :  { %v1915_v42 = vpack.c.bf16 %v1866_v36, %v1866_v36  ;;  %v1232_v43 = vadd.f32 %v2770_v39, %v1231_v40  ;;  %v1661_v44 = vadd.f32 %v2770_v39, %v1660_v41  ;;  %v326_v45 = vpop.f32.mrf.mxu0  ;;  %v755_v46 = vpop.f32.mrf.mxu1 }
  0xdf   :  { %v327_v50 = vadd.f32 %v2770_v39, %v326_v45  ;;  %v756_v52 = vadd.f32 %v2770_v39, %v755_v46 }
  0xe0   :  { %1965 = vst.msk [vmem:[%s3447_s6 + $0x24] sm:$0xf] %vm1955_vm3, %v1915_v42  ;;  %v1340_v48 = vmax.f32 %v1232_v43, 0.0  ;;  %v1769_v49 = vmax.f32 %v1661_v44, 0.0 }
  0xe1   :  { %v434_v54 = vmax.f32 %v327_v50, 0.0  ;;  %v863_v60 = vmax.f32 %v756_v52, 0.0 }
  0xe2   :  { %v1818_v51 = vmax.f32 %v1340_v48, %v1769_v49 }
  0xe3   :  { %v912_v7 = vmax.f32 %v434_v54, %v863_v60 }
  0xe4   :  { %v1867_v53 = vmax.f32 %v911_v47, %v1818_v51 }
  0xe5   :  { %v1233_v55 = vpop.f32.mrf.mxu2  ;;  %v1662_v56 = vpop.f32.mrf.mxu3 }
  0xe6   :  { %v1916_v59 = vpack.c.bf16 %v1867_v53, %v1867_v53  ;;  %v1234_v61 = vadd.f32 %v2770_v39, %v1233_v55  ;;  %v1663_v62 = vadd.f32 %v2770_v39, %v1662_v56  ;;  %v329_v63 = vpop.f32.mrf.mxu0  ;;  %v758_v0 = vpop.f32.mrf.mxu1 }
  0xe7   :  { %v330_v5 = vadd.f32 %v2770_v39, %v329_v63  ;;  %v759_v6 = vadd.f32 %v2770_v39, %v758_v0 }
  0xe8   :  { %1966 = vst.msk [vmem:[%s3447_s6 + $0x28] sm:$0xf] %vm1955_vm3, %v1916_v59  ;;  %v1341_v3 = vmax.f32 %v1234_v61, 0.0  ;;  %v1770_v4 = vmax.f32 %v1663_v62, 0.0 }
  0xe9   :  { %2123 = vmatmul.msk.bf16.gmra.mxu0 %vm207_vm2, %v2512_v57  ;;  %2244 = vmatmul.msk.bf16.gmra.mxu1 %vm207_vm2, %v2536_v58  ;;  %v435_v10 = vmax.f32 %v330_v5, 0.0  ;;  %v864_v11 = vmax.f32 %v759_v6, 0.0 }
  0xea   :  { %v1819_v8 = vmax.f32 %v1341_v3, %v1770_v4  ;;  %2365 = vmatmul.msk.bf16.gmra.mxu2 %vm207_vm2, %v2560_v1  ;;  %2486 = vmatmul.msk.bf16.gmra.mxu3 %vm207_vm2, %v2584_v2  ;;  %v2514_v2 = vld [vmem:[%s3442_s0 + $0x80] sm:$0xff] }
  0xeb   :  { %v913_v19 = vmax.f32 %v435_v10, %v864_v11  ;;  %v2538_v3 = vld [vmem:[%s3443_s1 + $0x80] sm:$0xff] }
  0xec   :  { %v1868_v9 = vmax.f32 %v912_v7, %v1819_v8  ;;  %v2562_v10 = vld [vmem:[%s3444_s2 + $0x80] sm:$0xff] }
  0xed   :  { %v1236_v12 = vpop.f32.mrf.mxu2  ;;  %v1665_v13 = vpop.f32.mrf.mxu3  ;;  %v2586_v11 = vld [vmem:[%s3445_s3 + $0x80] sm:$0xff] }
  0xee   :  { %v1917_v14 = vpack.c.bf16 %v1868_v9, %v1868_v9  ;;  %v1237_v15 = vadd.f32 %v2770_v39, %v1236_v12  ;;  %v1666_v16 = vadd.f32 %v2770_v39, %v1665_v13  ;;  %v331_v17 = vpop.f32.mrf.mxu0  ;;  %v760_v18 = vpop.f32.mrf.mxu1 }
  0xef   :  { %v332_v22 = vadd.f32 %v2770_v39, %v331_v17  ;;  %v761_v24 = vadd.f32 %v2770_v39, %v760_v18 }
  0xf0   :  { %1967 = vst.msk [vmem:[%s3447_s6 + $0x2c] sm:$0xf] %vm1955_vm3, %v1917_v14  ;;  %v1342_v20 = vmax.f32 %v1237_v15, 0.0  ;;  %v1771_v21 = vmax.f32 %v1666_v16, 0.0 }
  0xf1   :  { %v436_v26 = vmax.f32 %v332_v22, 0.0  ;;  %v865_v32 = vmax.f32 %v761_v24, 0.0 }
  0xf2   :  { %v1820_v23 = vmax.f32 %v1342_v20, %v1771_v21 }
  0xf3   :  { %v914_v44 = vmax.f32 %v436_v26, %v865_v32 }
  0xf4   :  { %v1869_v25 = vmax.f32 %v913_v19, %v1820_v23 }
  0xf5   :  { %v1238_v27 = vpop.f32.mrf.mxu2  ;;  %v1667_v28 = vpop.f32.mrf.mxu3 }
  0xf6   :  { %v1918_v31 = vpack.c.bf16 %v1869_v25, %v1869_v25  ;;  %v1239_v33 = vadd.f32 %v2770_v39, %v1238_v27  ;;  %v1668_v34 = vadd.f32 %v2770_v39, %v1667_v28  ;;  %v334_v35 = vpop.f32.mrf.mxu0  ;;  %v763_v36 = vpop.f32.mrf.mxu1 }
  0xf7   :  { %v335_v42 = vadd.f32 %v2770_v39, %v334_v35  ;;  %v764_v43 = vadd.f32 %v2770_v39, %v763_v36 }
  0xf8   :  { %1968 = vst.msk [vmem:[%s3447_s6 + $0x30] sm:$0xf] %vm1955_vm3, %v1918_v31  ;;  %v1343_v40 = vmax.f32 %v1239_v33, 0.0  ;;  %v1772_v41 = vmax.f32 %v1668_v34, 0.0 }
  0xf9   :  { %2124 = vmatmul.msk.bf16.gmra.mxu0 %vm207_vm2, %v2513_v29  ;;  %2245 = vmatmul.msk.bf16.gmra.mxu1 %vm207_vm2, %v2537_v30  ;;  %v437_v47 = vmax.f32 %v335_v42, 0.0  ;;  %v866_v48 = vmax.f32 %v764_v43, 0.0 }
  0xfa   :  { %v1821_v45 = vmax.f32 %v1343_v40, %v1772_v41  ;;  %2366 = vmatmul.msk.bf16.gmra.mxu2 %vm207_vm2, %v2561_v37  ;;  %2487 = vmatmul.msk.bf16.gmra.mxu3 %vm207_vm2, %v2585_v38  ;;  %v2515_v38 = vld [vmem:[%s3442_s0 + $0x88] sm:$0xff] }
  0xfb   :  { %v915_v56 = vmax.f32 %v437_v47, %v866_v48  ;;  %v2539_v40 = vld [vmem:[%s3443_s1 + $0x88] sm:$0xff] }
  0xfc   :  { %v1870_v46 = vmax.f32 %v914_v44, %v1821_v45  ;;  %v2563_v47 = vld [vmem:[%s3444_s2 + $0x88] sm:$0xff] }
  0xfd   :  { %v1241_v49 = vpop.f32.mrf.mxu2  ;;  %v1670_v50 = vpop.f32.mrf.mxu3  ;;  %v2587_v48 = vld [vmem:[%s3445_s3 + $0x88] sm:$0xff] }
  0xfe   :  { %v1919_v51 = vpack.c.bf16 %v1870_v46, %v1870_v46  ;;  %v1242_v52 = vadd.f32 %v2770_v39, %v1241_v49  ;;  %v1671_v53 = vadd.f32 %v2770_v39, %v1670_v50  ;;  %v336_v54 = vpop.f32.mrf.mxu0  ;;  %v765_v55 = vpop.f32.mrf.mxu1 }
  0xff   :  { %v337_v59 = vadd.f32 %v2770_v39, %v336_v54  ;;  %v766_v61 = vadd.f32 %v2770_v39, %v765_v55 }
 0x100   :  { %1969 = vst.msk [vmem:[%s3447_s6 + $0x34] sm:$0xf] %vm1955_vm3, %v1919_v51  ;;  %v1344_v57 = vmax.f32 %v1242_v52, 0.0  ;;  %v1773_v58 = vmax.f32 %v1671_v53, 0.0 }
 0x101   :  { %v438_v63 = vmax.f32 %v337_v59, 0.0  ;;  %v867_v5 = vmax.f32 %v766_v61, 0.0 }
 0x102   :  { %v1822_v60 = vmax.f32 %v1344_v57, %v1773_v58 }
 0x103   :  { %v916_v16 = vmax.f32 %v438_v63, %v867_v5 }
 0x104   :  { %v1871_v62 = vmax.f32 %v915_v56, %v1822_v60 }
 0x105   :  { %v1243_v0 = vpop.f32.mrf.mxu2  ;;  %v1672_v1 = vpop.f32.mrf.mxu3 }
 0x106   :  { %v1920_v4 = vpack.c.bf16 %v1871_v62, %v1871_v62  ;;  %v1244_v6 = vadd.f32 %v2770_v39, %v1243_v0  ;;  %v1673_v7 = vadd.f32 %v2770_v39, %v1672_v1  ;;  %v339_v8 = vpop.f32.mrf.mxu0  ;;  %v768_v9 = vpop.f32.mrf.mxu1 }
 0x107   :  { %v340_v14 = vadd.f32 %v2770_v39, %v339_v8  ;;  %v769_v15 = vadd.f32 %v2770_v39, %v768_v9 }
 0x108   :  { %1970 = vst.msk [vmem:[%s3447_s6 + $0x38] sm:$0xf] %vm1955_vm3, %v1920_v4  ;;  %v1345_v12 = vmax.f32 %v1244_v6, 0.0  ;;  %v1774_v13 = vmax.f32 %v1673_v7, 0.0 }
 0x109   :  { %2125 = vmatmul.msk.bf16.gmra.mxu0 %vm207_vm2, %v2514_v2  ;;  %2246 = vmatmul.msk.bf16.gmra.mxu1 %vm207_vm2, %v2538_v3  ;;  %v439_v19 = vmax.f32 %v340_v14, 0.0  ;;  %v868_v20 = vmax.f32 %v769_v15, 0.0 }
 0x10a   :  { %v1823_v17 = vmax.f32 %v1345_v12, %v1774_v13  ;;  %2367 = vmatmul.msk.bf16.gmra.mxu2 %vm207_vm2, %v2562_v10  ;;  %2488 = vmatmul.msk.bf16.gmra.mxu3 %vm207_vm2, %v2586_v11  ;;  %v2516_v11 = vld [vmem:[%s3442_s0 + $0x90] sm:$0xff] }
 0x10b   :  { %v917_v28 = vmax.f32 %v439_v19, %v868_v20  ;;  %v2540_v12 = vld [vmem:[%s3443_s1 + $0x90] sm:$0xff] }
 0x10c   :  { %v1872_v18 = vmax.f32 %v916_v16, %v1823_v17  ;;  %v2564_v19 = vld [vmem:[%s3444_s2 + $0x90] sm:$0xff] }
 0x10d   :  { %v1246_v21 = vpop.f32.mrf.mxu2  ;;  %v1675_v22 = vpop.f32.mrf.mxu3  ;;  %v2588_v20 = vld [vmem:[%s3445_s3 + $0x90] sm:$0xff] }
 0x10e   :  { %v1921_v23 = vpack.c.bf16 %v1872_v18, %v1872_v18  ;;  %v1247_v24 = vadd.f32 %v2770_v39, %v1246_v21  ;;  %v1676_v25 = vadd.f32 %v2770_v39, %v1675_v22  ;;  %v341_v26 = vpop.f32.mrf.mxu0  ;;  %v770_v27 = vpop.f32.mrf.mxu1 }
 0x10f   :  { %v342_v31 = vadd.f32 %v2770_v39, %v341_v26  ;;  %v771_v33 = vadd.f32 %v2770_v39, %v770_v27 }
 0x110   :  { %1971 = vst.msk [vmem:[%s3447_s6 + $0x3c] sm:$0xf] %vm1955_vm3, %v1921_v23  ;;  %v1346_v29 = vmax.f32 %v1247_v24, 0.0  ;;  %v1775_v30 = vmax.f32 %v1676_v25, 0.0 }
 0x111   :  { %v440_v35 = vmax.f32 %v342_v31, 0.0  ;;  %v869_v42 = vmax.f32 %v771_v33, 0.0 }
 0x112   :  { %v1824_v32 = vmax.f32 %v1346_v29, %v1775_v30 }
 0x113   :  { %v918_v53 = vmax.f32 %v440_v35, %v869_v42 }
 0x114   :  { %v1873_v34 = vmax.f32 %v917_v28, %v1824_v32 }
 0x115   :  { %v1248_v36 = vpop.f32.mrf.mxu2  ;;  %v1677_v37 = vpop.f32.mrf.mxu3 }
 0x116   :  { %v1922_v41 = vpack.c.bf16 %v1873_v34, %v1873_v34  ;;  %v1249_v43 = vadd.f32 %v2770_v39, %v1248_v36  ;;  %v1678_v44 = vadd.f32 %v2770_v39, %v1677_v37  ;;  %v344_v45 = vpop.f32.mrf.mxu0  ;;  %v773_v46 = vpop.f32.mrf.mxu1 }
 0x117   :  { %v345_v51 = vadd.f32 %v2770_v39, %v344_v45  ;;  %v774_v52 = vadd.f32 %v2770_v39, %v773_v46 }
 0x118   :  { %1972 = vst.msk [vmem:[%s3447_s6 + $0x40] sm:$0xf] %vm1955_vm3, %v1922_v41  ;;  %v1347_v49 = vmax.f32 %v1249_v43, 0.0  ;;  %v1776_v50 = vmax.f32 %v1678_v44, 0.0 }
 0x119   :  { %2126 = vmatmul.msk.bf16.gmra.mxu0 %vm207_vm2, %v2515_v38  ;;  %2247 = vmatmul.msk.bf16.gmra.mxu1 %vm207_vm2, %v2539_v40  ;;  %v441_v56 = vmax.f32 %v345_v51, 0.0  ;;  %v870_v57 = vmax.f32 %v774_v52, 0.0 }
 0x11a   :  { %v1825_v54 = vmax.f32 %v1347_v49, %v1776_v50  ;;  %2368 = vmatmul.msk.bf16.gmra.mxu2 %vm207_vm2, %v2563_v47  ;;  %2489 = vmatmul.msk.bf16.gmra.mxu3 %vm207_vm2, %v2587_v48  ;;  %v2517_v48 = vld [vmem:[%s3442_s0 + $0x98] sm:$0xff] }
 0x11b   :  { %v919_v1 = vmax.f32 %v441_v56, %v870_v57  ;;  %v2541_v49 = vld [vmem:[%s3443_s1 + $0x98] sm:$0xff] }
 0x11c   :  { %v1874_v55 = vmax.f32 %v918_v53, %v1825_v54  ;;  %v2565_v56 = vld [vmem:[%s3444_s2 + $0x98] sm:$0xff] }
 0x11d   :  { %v1251_v58 = vpop.f32.mrf.mxu2  ;;  %v1680_v59 = vpop.f32.mrf.mxu3  ;;  %v2589_v57 = vld [vmem:[%s3445_s3 + $0x98] sm:$0xff] }
 0x11e   :  { %v1923_v60 = vpack.c.bf16 %v1874_v55, %v1874_v55  ;;  %v1252_v61 = vadd.f32 %v2770_v39, %v1251_v58  ;;  %v1681_v62 = vadd.f32 %v2770_v39, %v1680_v59  ;;  %v346_v63 = vpop.f32.mrf.mxu0  ;;  %v775_v0 = vpop.f32.mrf.mxu1 }
 0x11f   :  { %v347_v4 = vadd.f32 %v2770_v39, %v346_v63  ;;  %v776_v6 = vadd.f32 %v2770_v39, %v775_v0 }
 0x120   :  { %1973 = vst.msk [vmem:[%s3447_s6 + $0x44] sm:$0xf] %vm1955_vm3, %v1923_v60  ;;  %v1348_v2 = vmax.f32 %v1252_v61, 0.0  ;;  %v1777_v3 = vmax.f32 %v1681_v62, 0.0 }
 0x121   :  { %v442_v8 = vmax.f32 %v347_v4, 0.0  ;;  %v871_v14 = vmax.f32 %v776_v6, 0.0 }
 0x122   :  { %v1826_v5 = vmax.f32 %v1348_v2, %v1777_v3 }
 0x123   :  { %v920_v25 = vmax.f32 %v442_v8, %v871_v14 }
 0x124   :  { %v1875_v7 = vmax.f32 %v919_v1, %v1826_v5 }
 0x125   :  { %v1253_v9 = vpop.f32.mrf.mxu2  ;;  %v1682_v10 = vpop.f32.mrf.mxu3 }
 0x126   :  { %v1924_v13 = vpack.c.bf16 %v1875_v7, %v1875_v7  ;;  %v1254_v15 = vadd.f32 %v2770_v39, %v1253_v9  ;;  %v1683_v16 = vadd.f32 %v2770_v39, %v1682_v10  ;;  %v349_v17 = vpop.f32.mrf.mxu0  ;;  %v778_v18 = vpop.f32.mrf.mxu1 }
 0x127   :  { %v350_v23 = vadd.f32 %v2770_v39, %v349_v17  ;;  %v779_v24 = vadd.f32 %v2770_v39, %v778_v18 }
 0x128   :  { %1974 = vst.msk [vmem:[%s3447_s6 + $0x48] sm:$0xf] %vm1955_vm3, %v1924_v13  ;;  %v1349_v21 = vmax.f32 %v1254_v15, 0.0  ;;  %v1778_v22 = vmax.f32 %v1683_v16, 0.0 }
 0x129   :  { %2127 = vmatmul.msk.bf16.gmra.mxu0 %vm207_vm2, %v2516_v11  ;;  %2248 = vmatmul.msk.bf16.gmra.mxu1 %vm207_vm2, %v2540_v12  ;;  %v443_v28 = vmax.f32 %v350_v23, 0.0  ;;  %v872_v29 = vmax.f32 %v779_v24, 0.0 }
 0x12a   :  { %v1827_v26 = vmax.f32 %v1349_v21, %v1778_v22  ;;  %2369 = vmatmul.msk.bf16.gmra.mxu2 %vm207_vm2, %v2564_v19  ;;  %2490 = vmatmul.msk.bf16.gmra.mxu3 %vm207_vm2, %v2588_v20  ;;  %v2518_v20 = vld [vmem:[%s3442_s0 + $0xa0] sm:$0xff] }
 0x12b   :  { %v921_v37 = vmax.f32 %v443_v28, %v872_v29  ;;  %v2542_v21 = vld [vmem:[%s3443_s1 + $0xa0] sm:$0xff] }
 0x12c   :  { %v1876_v27 = vmax.f32 %v920_v25, %v1827_v26  ;;  %v2566_v28 = vld [vmem:[%s3444_s2 + $0xa0] sm:$0xff] }
 0x12d   :  { %v1256_v30 = vpop.f32.mrf.mxu2  ;;  %v1685_v31 = vpop.f32.mrf.mxu3  ;;  %v2590_v29 = vld [vmem:[%s3445_s3 + $0xa0] sm:$0xff] }
 0x12e   :  { %v1925_v32 = vpack.c.bf16 %v1876_v27, %v1876_v27  ;;  %v1257_v33 = vadd.f32 %v2770_v39, %v1256_v30  ;;  %v1686_v34 = vadd.f32 %v2770_v39, %v1685_v31  ;;  %v351_v35 = vpop.f32.mrf.mxu0  ;;  %v780_v36 = vpop.f32.mrf.mxu1 }
 0x12f   :  { %v352_v41 = vadd.f32 %v2770_v39, %v351_v35  ;;  %v781_v43 = vadd.f32 %v2770_v39, %v780_v36 }
 0x130   :  { %1975 = vst.msk [vmem:[%s3447_s6 + $0x4c] sm:$0xf] %vm1955_vm3, %v1925_v32  ;;  %v1350_v38 = vmax.f32 %v1257_v33, 0.0  ;;  %v1779_v40 = vmax.f32 %v1686_v34, 0.0 }
 0x131   :  { %v444_v45 = vmax.f32 %v352_v41, 0.0  ;;  %v873_v51 = vmax.f32 %v781_v43, 0.0 }
 0x132   :  { %v1828_v42 = vmax.f32 %v1350_v38, %v1779_v40 }
 0x133   :  { %v922_v62 = vmax.f32 %v444_v45, %v873_v51 }
 0x134   :  { %v1877_v44 = vmax.f32 %v921_v37, %v1828_v42 }
 0x135   :  { %v1258_v46 = vpop.f32.mrf.mxu2  ;;  %v1687_v47 = vpop.f32.mrf.mxu3 }
 0x136   :  { %v1926_v50 = vpack.c.bf16 %v1877_v44, %v1877_v44  ;;  %v1259_v52 = vadd.f32 %v2770_v39, %v1258_v46  ;;  %v1688_v53 = vadd.f32 %v2770_v39, %v1687_v47  ;;  %v354_v54 = vpop.f32.mrf.mxu0  ;;  %v783_v55 = vpop.f32.mrf.mxu1 }
 0x137   :  { %v355_v60 = vadd.f32 %v2770_v39, %v354_v54  ;;  %v784_v61 = vadd.f32 %v2770_v39, %v783_v55 }
 0x138   :  { %1976 = vst.msk [vmem:[%s3447_s6 + $0x50] sm:$0xf] %vm1955_vm3, %v1926_v50  ;;  %v1351_v58 = vmax.f32 %v1259_v52, 0.0  ;;  %v1780_v59 = vmax.f32 %v1688_v53, 0.0 }
 0x139   :  { %2128 = vmatmul.msk.bf16.gmra.mxu0 %vm207_vm2, %v2517_v48  ;;  %2249 = vmatmul.msk.bf16.gmra.mxu1 %vm207_vm2, %v2541_v49  ;;  %v445_v1 = vmax.f32 %v355_v60, 0.0  ;;  %v874_v2 = vmax.f32 %v784_v61, 0.0 }
 0x13a   :  { %v1829_v63 = vmax.f32 %v1351_v58, %v1780_v59  ;;  %2370 = vmatmul.msk.bf16.gmra.mxu2 %vm207_vm2, %v2565_v56  ;;  %2491 = vmatmul.msk.bf16.gmra.mxu3 %vm207_vm2, %v2589_v57  ;;  %v2519_v57 = vld [vmem:[%s3442_s0 + $0xa8] sm:$0xff] }
 0x13b   :  { %v923_v10 = vmax.f32 %v445_v1, %v874_v2  ;;  %v2543_v58 = vld [vmem:[%s3443_s1 + $0xa8] sm:$0xff] }
 0x13c   :  { %v1878_v0 = vmax.f32 %v922_v62, %v1829_v63  ;;  %v2567_v1 = vld [vmem:[%s3444_s2 + $0xa8] sm:$0xff] }
 0x13d   :  { %v1261_v3 = vpop.f32.mrf.mxu2  ;;  %v1690_v4 = vpop.f32.mrf.mxu3  ;;  %v2591_v2 = vld [vmem:[%s3445_s3 + $0xa8] sm:$0xff] }
 0x13e   :  { %v1927_v5 = vpack.c.bf16 %v1878_v0, %v1878_v0  ;;  %v1262_v6 = vadd.f32 %v2770_v39, %v1261_v3  ;;  %v1691_v7 = vadd.f32 %v2770_v39, %v1690_v4  ;;  %v356_v8 = vpop.f32.mrf.mxu0  ;;  %v785_v9 = vpop.f32.mrf.mxu1 }
 0x13f   :  { %v357_v13 = vadd.f32 %v2770_v39, %v356_v8  ;;  %v786_v15 = vadd.f32 %v2770_v39, %v785_v9 }
 0x140   :  { %1977 = vst.msk [vmem:[%s3447_s6 + $0x54] sm:$0xf] %vm1955_vm3, %v1927_v5  ;;  %v1352_v11 = vmax.f32 %v1262_v6, 0.0  ;;  %v1781_v12 = vmax.f32 %v1691_v7, 0.0 }
 0x141   :  { %v446_v17 = vmax.f32 %v357_v13, 0.0  ;;  %v875_v23 = vmax.f32 %v786_v15, 0.0 }
 0x142   :  { %v1830_v14 = vmax.f32 %v1352_v11, %v1781_v12 }
 0x143   :  { %v924_v34 = vmax.f32 %v446_v17, %v875_v23 }
 0x144   :  { %v1879_v16 = vmax.f32 %v923_v10, %v1830_v14 }
 0x145   :  { %v1263_v18 = vpop.f32.mrf.mxu2  ;;  %v1692_v19 = vpop.f32.mrf.mxu3 }
 0x146   :  { %v1928_v22 = vpack.c.bf16 %v1879_v16, %v1879_v16  ;;  %v1264_v24 = vadd.f32 %v2770_v39, %v1263_v18  ;;  %v1693_v25 = vadd.f32 %v2770_v39, %v1692_v19  ;;  %v359_v26 = vpop.f32.mrf.mxu0  ;;  %v788_v27 = vpop.f32.mrf.mxu1 }
 0x147   :  { %v360_v32 = vadd.f32 %v2770_v39, %v359_v26  ;;  %v789_v33 = vadd.f32 %v2770_v39, %v788_v27  ;;  %v3173_v39 = vld [vmem:[%s3446_s5] ss:$0 sm:$0xff] }
 0x148   :  { %1978 = vst.msk [vmem:[%s3447_s6 + $0x58] sm:$0xf] %vm1955_vm3, %v1928_v22  ;;  %v1353_v30 = vmax.f32 %v1264_v24, 0.0  ;;  %v1782_v31 = vmax.f32 %v1693_v25, 0.0 }
 0x149   :  { %2129 = vmatmul.msk.bf16.gmra.mxu0 %vm207_vm2, %v2518_v20  ;;  %2250 = vmatmul.msk.bf16.gmra.mxu1 %vm207_vm2, %v2542_v21  ;;  %v447_v37 = vmax.f32 %v360_v32, 0.0  ;;  %v876_v38 = vmax.f32 %v789_v33, 0.0 }
 0x14a   :  { %v1831_v35 = vmax.f32 %v1353_v30, %v1782_v31  ;;  %2371 = vmatmul.msk.bf16.gmra.mxu2 %vm207_vm2, %v2566_v28  ;;  %2492 = vmatmul.msk.bf16.gmra.mxu3 %vm207_vm2, %v2590_v29  ;;  %v2520_v29 = vld [vmem:[%s3442_s0 + $0xb0] sm:$0xff] }
 0x14b   :  { %v925_v47 = vmax.f32 %v447_v37, %v876_v38  ;;  %v2544_v30 = vld [vmem:[%s3443_s1 + $0xb0] sm:$0xff] }
 0x14c   :  { %v1880_v36 = vmax.f32 %v924_v34, %v1831_v35  ;;  %v2568_v37 = vld [vmem:[%s3444_s2 + $0xb0] sm:$0xff] }
 0x14d   :  { %v1266_v40 = vpop.f32.mrf.mxu2  ;;  %v1695_v41 = vpop.f32.mrf.mxu3  ;;  %v2592_v38 = vld [vmem:[%s3445_s3 + $0xb0] sm:$0xff] }
 0x14e   :  { %v1929_v42 = vpack.c.bf16 %v1880_v36, %v1880_v36  ;;  %v1267_v43 = vadd.f32 %v3173_v39, %v1266_v40  ;;  %v1696_v44 = vadd.f32 %v3173_v39, %v1695_v41  ;;  %v361_v45 = vpop.f32.mrf.mxu0  ;;  %v790_v46 = vpop.f32.mrf.mxu1 }
 0x14f   :  { %v362_v50 = vadd.f32 %v3173_v39, %v361_v45  ;;  %v791_v52 = vadd.f32 %v3173_v39, %v790_v46 }
 0x150   :  { %1979 = vst.msk [vmem:[%s3447_s6 + $0x5c] sm:$0xf] %vm1955_vm3, %v1929_v42  ;;  %v1354_v48 = vmax.f32 %v1267_v43, 0.0  ;;  %v1783_v49 = vmax.f32 %v1696_v44, 0.0 }
 0x151   :  { %v448_v54 = vmax.f32 %v362_v50, 0.0  ;;  %v877_v60 = vmax.f32 %v791_v52, 0.0 }
 0x152   :  { %v1832_v51 = vmax.f32 %v1354_v48, %v1783_v49 }
 0x153   :  { %v926_v7 = vmax.f32 %v448_v54, %v877_v60 }
 0x154   :  { %v1881_v53 = vmax.f32 %v925_v47, %v1832_v51 }
 0x155   :  { %v1268_v55 = vpop.f32.mrf.mxu2  ;;  %v1697_v56 = vpop.f32.mrf.mxu3 }
 0x156   :  { %v1930_v59 = vpack.c.bf16 %v1881_v53, %v1881_v53  ;;  %v1269_v61 = vadd.f32 %v3173_v39, %v1268_v55  ;;  %v1698_v62 = vadd.f32 %v3173_v39, %v1697_v56  ;;  %v364_v63 = vpop.f32.mrf.mxu0  ;;  %v793_v0 = vpop.f32.mrf.mxu1 }
 0x157   :  { %v365_v5 = vadd.f32 %v3173_v39, %v364_v63  ;;  %v794_v6 = vadd.f32 %v3173_v39, %v793_v0 }
 0x158   :  { %1980 = vst.msk [vmem:[%s3447_s6 + $0x60] sm:$0xf] %vm1955_vm3, %v1930_v59  ;;  %v1355_v3 = vmax.f32 %v1269_v61, 0.0  ;;  %v1784_v4 = vmax.f32 %v1698_v62, 0.0 }
 0x159   :  { %2130 = vmatmul.msk.bf16.gmra.mxu0 %vm207_vm2, %v2519_v57  ;;  %2251 = vmatmul.msk.bf16.gmra.mxu1 %vm207_vm2, %v2543_v58  ;;  %v449_v10 = vmax.f32 %v365_v5, 0.0  ;;  %v878_v11 = vmax.f32 %v794_v6, 0.0 }
 0x15a   :  { %v1833_v8 = vmax.f32 %v1355_v3, %v1784_v4  ;;  %2372 = vmatmul.msk.bf16.gmra.mxu2 %vm207_vm2, %v2567_v1  ;;  %2493 = vmatmul.msk.bf16.gmra.mxu3 %vm207_vm2, %v2591_v2  ;;  %v2521_v2 = vld [vmem:[%s3442_s0 + $0xb8] sm:$0xff] }
 0x15b   :  { %v927_v19 = vmax.f32 %v449_v10, %v878_v11  ;;  %v2545_v3 = vld [vmem:[%s3443_s1 + $0xb8] sm:$0xff] }
 0x15c   :  { %v1882_v9 = vmax.f32 %v926_v7, %v1833_v8  ;;  %v2569_v10 = vld [vmem:[%s3444_s2 + $0xb8] sm:$0xff] }
 0x15d   :  { %v1271_v12 = vpop.f32.mrf.mxu2  ;;  %v1700_v13 = vpop.f32.mrf.mxu3  ;;  %v2593_v11 = vld [vmem:[%s3445_s3 + $0xb8] sm:$0xff] }
 0x15e   :  { %v1931_v14 = vpack.c.bf16 %v1882_v9, %v1882_v9  ;;  %v1272_v15 = vadd.f32 %v3173_v39, %v1271_v12  ;;  %v1701_v16 = vadd.f32 %v3173_v39, %v1700_v13  ;;  %v366_v17 = vpop.f32.mrf.mxu0  ;;  %v795_v18 = vpop.f32.mrf.mxu1 }
 0x15f   :  { %v367_v22 = vadd.f32 %v3173_v39, %v366_v17  ;;  %v796_v24 = vadd.f32 %v3173_v39, %v795_v18 }
 0x160   :  { %1981 = vst.msk [vmem:[%s3447_s6 + $0x64] sm:$0xf] %vm1955_vm3, %v1931_v14  ;;  %v1356_v20 = vmax.f32 %v1272_v15, 0.0  ;;  %v1785_v21 = vmax.f32 %v1701_v16, 0.0 }
 0x161   :  { %v450_v26 = vmax.f32 %v367_v22, 0.0  ;;  %v879_v32 = vmax.f32 %v796_v24, 0.0 }
 0x162   :  { %v1834_v23 = vmax.f32 %v1356_v20, %v1785_v21 }
 0x163   :  { %v928_v44 = vmax.f32 %v450_v26, %v879_v32 }
 0x164   :  { %v1883_v25 = vmax.f32 %v927_v19, %v1834_v23  ;;  %v75_v23 = vld [vmem:[%s3442_s0 + $0xc0] sm:$0xf] }
 0x165   :  { %v1273_v27 = vpop.f32.mrf.mxu2  ;;  %v1702_v28 = vpop.f32.mrf.mxu3 }
 0x166   :  { %v1932_v31 = vpack.c.bf16 %v1883_v25, %v1883_v25  ;;  %v1274_v33 = vadd.f32 %v3173_v39, %v1273_v27  ;;  %v1703_v34 = vadd.f32 %v3173_v39, %v1702_v28  ;;  %v369_v35 = vpop.f32.mrf.mxu0  ;;  %v798_v36 = vpop.f32.mrf.mxu1 }
 0x167   :  { %v370_v42 = vadd.f32 %v3173_v39, %v369_v35  ;;  %v799_v43 = vadd.f32 %v3173_v39, %v798_v36  ;;  %v176_v35 = vunpack.c.l.b16 %v75_v23 }
 0x168   :  { %1982 = vst.msk [vmem:[%s3447_s6 + $0x68] sm:$0xf] %vm1955_vm3, %v1932_v31  ;;  %v1357_v40 = vmax.f32 %v1274_v33, 0.0  ;;  %v1786_v41 = vmax.f32 %v1703_v34, 0.0  ;;  %v1427_v31 = vld [vmem:[%s3445_s3 + $0xc0] sm:$0xf] }
 0x169   :  { %2131 = vmatmul.msk.bf16.gmra.mxu0 %vm207_vm2, %v2520_v29  ;;  %2252 = vmatmul.msk.bf16.gmra.mxu1 %vm207_vm2, %v2544_v30  ;;  %v451_v47 = vmax.f32 %v370_v42, 0.0  ;;  %v880_v48 = vmax.f32 %v799_v43, 0.0  ;;  %v520_v29 = vld [vmem:[%s3443_s1 + $0xc0] sm:$0xf] }
 0x16a   :  { %v1835_v45 = vmax.f32 %v1357_v40, %v1786_v41  ;;  %2373 = vmatmul.msk.bf16.gmra.mxu2 %vm207_vm2, %v2568_v37  ;;  %2494 = vmatmul.msk.bf16.gmra.mxu3 %vm207_vm2, %v2592_v38  ;;  %v998_v30 = vld [vmem:[%s3444_s2 + $0xc0] sm:$0xf]  ;;  %v618_v37 = vunpack.c.l.b16 %v520_v29  ;;  %v1525_v40 = vunpack.c.l.b16 %v1427_v31 }
 0x16b   :  { %v929_v56 = vmax.f32 %v451_v47, %v880_v48  ;;  %v1096_v38 = vunpack.c.l.b16 %v998_v30 }
 0x16c   :  { %v1884_v46 = vmax.f32 %v928_v44, %v1835_v45  ;;  %v201_v44 = vpack.c.b16 %v176_v35, %v176_v35  ;;  %v643_v48 = vpack.c.b16 %v618_v37, %v618_v37 }
 0x16d   :  { %v1276_v49 = vpop.f32.mrf.mxu2  ;;  %v1705_v50 = vpop.f32.mrf.mxu3 }
 0x16e   :  { %v1933_v51 = vpack.c.bf16 %v1884_v46, %v1884_v46  ;;  %v1277_v52 = vadd.f32 %v3173_v39, %v1276_v49  ;;  %v1706_v53 = vadd.f32 %v3173_v39, %v1705_v50  ;;  %v371_v54 = vpop.f32.mrf.mxu0  ;;  %v800_v55 = vpop.f32.mrf.mxu1  ;;  %v1121_v49 = vpack.c.b16 %v1096_v38, %v1096_v38 }
 0x16f   :  { %v372_v59 = vadd.f32 %v3173_v39, %v371_v54  ;;  %v801_v61 = vadd.f32 %v3173_v39, %v800_v55  ;;  %v1550_v50 = vpack.c.b16 %v1525_v40, %v1525_v40 }
 0x170   :  { %1983 = vst.msk [vmem:[%s3447_s6 + $0x6c] sm:$0xf] %vm1955_vm3, %v1933_v51  ;;  %v1358_v57 = vmax.f32 %v1277_v52, 0.0  ;;  %v1787_v58 = vmax.f32 %v1706_v53, 0.0 }
 0x171   :  { %v452_v63 = vmax.f32 %v372_v59, 0.0  ;;  %v881_v5 = vmax.f32 %v801_v61, 0.0 }
 0x172   :  { %v1836_v60 = vmax.f32 %v1358_v57, %v1787_v58 }
 0x173   :  { %v930_v16 = vmax.f32 %v452_v63, %v881_v5 }
 0x174   :  { %v1885_v62 = vmax.f32 %v929_v56, %v1836_v60 }
 0x175   :  { %v1278_v0 = vpop.f32.mrf.mxu2  ;;  %v1707_v1 = vpop.f32.mrf.mxu3 }
 0x176   :  { %v1934_v4 = vpack.c.bf16 %v1885_v62, %v1885_v62  ;;  %v1279_v6 = vadd.f32 %v3173_v39, %v1278_v0  ;;  %v1708_v7 = vadd.f32 %v3173_v39, %v1707_v1  ;;  %v374_v8 = vpop.f32.mrf.mxu0  ;;  %v803_v9 = vpop.f32.mrf.mxu1 }
 0x177   :  { %v375_v14 = vadd.f32 %v3173_v39, %v374_v8  ;;  %v804_v15 = vadd.f32 %v3173_v39, %v803_v9 }
 0x178   :  { %1984 = vst.msk [vmem:[%s3447_s6 + $0x70] sm:$0xf] %vm1955_vm3, %v1934_v4  ;;  %v1359_v12 = vmax.f32 %v1279_v6, 0.0  ;;  %v1788_v13 = vmax.f32 %v1708_v7, 0.0 }
 0x179   :  { %2132 = vmatmul.msk.bf16.gmra.mxu0 %vm207_vm2, %v2521_v2  ;;  %2253 = vmatmul.msk.bf16.gmra.mxu1 %vm207_vm2, %v2545_v3  ;;  %v453_v19 = vmax.f32 %v375_v14, 0.0  ;;  %v882_v20 = vmax.f32 %v804_v15, 0.0 }
 0x17a   :  { %v1837_v17 = vmax.f32 %v1359_v12, %v1788_v13  ;;  %2374 = vmatmul.msk.bf16.gmra.mxu2 %vm207_vm2, %v2569_v10  ;;  %2495 = vmatmul.msk.bf16.gmra.mxu3 %vm207_vm2, %v2593_v11 }
 0x17b   :  { %v931_v32 = vmax.f32 %v453_v19, %v882_v20 }
 0x17c   :  { %v1886_v18 = vmax.f32 %v930_v16, %v1837_v17 }
 0x17d   :  { %v1281_v21 = vpop.f32.mrf.mxu2  ;;  %v1710_v22 = vpop.f32.mrf.mxu3 }
 0x17e   :  { %v1935_v24 = vpack.c.bf16 %v1886_v18, %v1886_v18  ;;  %v1282_v25 = vadd.f32 %v3173_v39, %v1281_v21  ;;  %v1711_v26 = vadd.f32 %v3173_v39, %v1710_v22  ;;  %v376_v27 = vpop.f32.mrf.mxu0  ;;  %v805_v28 = vpop.f32.mrf.mxu1 }
 0x17f   :  { %v377_v36 = vadd.f32 %v3173_v39, %v376_v27  ;;  %v806_v42 = vadd.f32 %v3173_v39, %v805_v28 }
 0x180   :  { %1985 = vst.msk [vmem:[%s3447_s6 + $0x74] sm:$0xf] %vm1955_vm3, %v1935_v24  ;;  %v1360_v33 = vmax.f32 %v1282_v25, 0.0  ;;  %v1789_v34 = vmax.f32 %v1711_v26, 0.0 }
 0x181   :  { %v454_v45 = vmax.f32 %v377_v36, 0.0  ;;  %v883_v52 = vmax.f32 %v806_v42, 0.0 }
 0x182   :  { %v1838_v41 = vmax.f32 %v1360_v33, %v1789_v34 }
 0x183   :  { %v932_v61 = vmax.f32 %v454_v45, %v883_v52 }
 0x184   :  { %v1887_v43 = vmax.f32 %v931_v32, %v1838_v41 }
 0x185   :  { %v1283_v46 = vpop.f32.mrf.mxu2  ;;  %v1712_v47 = vpop.f32.mrf.mxu3 }
 0x186   :  { %v1936_v51 = vpack.c.bf16 %v1887_v43, %v1887_v43  ;;  %v1284_v53 = vadd.f32 %v3173_v39, %v1283_v46  ;;  %v1713_v54 = vadd.f32 %v3173_v39, %v1712_v47  ;;  %v379_v55 = vpop.f32.mrf.mxu0  ;;  %v808_v56 = vpop.f32.mrf.mxu1 }
 0x187   :  { %v380_v59 = vadd.f32 %v3173_v39, %v379_v55  ;;  %v809_v60 = vadd.f32 %v3173_v39, %v808_v56 }
 0x188   :  { %1986 = vst.msk [vmem:[%s3447_s6 + $0x78] sm:$0xf] %vm1955_vm3, %v1936_v51  ;;  %v1361_v57 = vmax.f32 %v1284_v53, 0.0  ;;  %v1790_v58 = vmax.f32 %v1713_v54, 0.0 }
 0x189   :  { %2133 = vmatmul.msk.bf16.gmra.mxu0 %vm207_vm2, %v201_v44  ;;  %2254 = vmatmul.msk.bf16.gmra.mxu1 %vm207_vm2, %v643_v48  ;;  %v455_v0 = vmax.f32 %v380_v59, 0.0  ;;  %v884_v1 = vmax.f32 %v809_v60, 0.0 }
 0x18a   :  { %v1839_v62 = vmax.f32 %v1361_v57, %v1790_v58  ;;  %2375 = vmatmul.msk.bf16.gmra.mxu2 %vm207_vm2, %v1121_v49  ;;  %2496 = vmatmul.msk.bf16.gmra.mxu3 %vm207_vm2, %v1550_v50 }
 0x18b   :  { %v933_v9 = vmax.f32 %v455_v0, %v884_v1 }
 0x18c   :  { %v1888_v63 = vmax.f32 %v932_v61, %v1839_v62 }
 0x18d   :  { %v1286_v2 = vpop.f32.mrf.mxu2  ;;  %v1715_v3 = vpop.f32.mrf.mxu3 }
 0x18e   :  { %v1937_v4 = vpack.c.bf16 %v1888_v63, %v1888_v63  ;;  %v1287_v5 = vadd.f32 %v3173_v39, %v1286_v2  ;;  %v1716_v6 = vadd.f32 %v3173_v39, %v1715_v3  ;;  %v381_v7 = vpop.f32.mrf.mxu0  ;;  %v810_v8 = vpop.f32.mrf.mxu1 }
 0x18f   :  { %v382_v12 = vadd.f32 %v3173_v39, %v381_v7  ;;  %v811_v14 = vadd.f32 %v3173_v39, %v810_v8 }
 0x190   :  { %1987 = vst.msk [vmem:[%s3447_s6 + $0x7c] sm:$0xf] %vm1955_vm3, %v1937_v4  ;;  %v1362_v10 = vmax.f32 %v1287_v5, 0.0  ;;  %v1791_v11 = vmax.f32 %v1716_v6, 0.0 }
 0x191   :  { %v456_v16 = vmax.f32 %v382_v12, 0.0  ;;  %v885_v20 = vmax.f32 %v811_v14, 0.0 }
 0x192   :  { %v1840_v13 = vmax.f32 %v1362_v10, %v1791_v11 }
 0x193   :  { %v934_v29 = vmax.f32 %v456_v16, %v885_v20 }
 0x194   :  { %v1889_v15 = vmax.f32 %v933_v9, %v1840_v13 }
 0x195   :  { %v1288_v17 = vpop.f32.mrf.mxu2  ;;  %v1717_v18 = vpop.f32.mrf.mxu3 }
 0x196   :  { %v1938_v19 = vpack.c.bf16 %v1889_v15, %v1889_v15  ;;  %v1289_v21 = vadd.f32 %v3173_v39, %v1288_v17  ;;  %v1718_v22 = vadd.f32 %v3173_v39, %v1717_v18  ;;  %v384_v23 = vpop.f32.mrf.mxu0  ;;  %v813_v24 = vpop.f32.mrf.mxu1 }
 0x197   :  { %v385_v27 = vadd.f32 %v3173_v39, %v384_v23  ;;  %v814_v28 = vadd.f32 %v3173_v39, %v813_v24 }
 0x198   :  { %1988 = vst.msk [vmem:[%s3447_s6 + $0x80] sm:$0xf] %vm1955_vm3, %v1938_v19  ;;  %v1363_v25 = vmax.f32 %v1289_v21, 0.0  ;;  %v1792_v26 = vmax.f32 %v1718_v22, 0.0 }
 0x199   :  { %v457_v32 = vmax.f32 %v385_v27, 0.0  ;;  %v886_v33 = vmax.f32 %v814_v28, 0.0 }
 0x19a   :  { %v1841_v30 = vmax.f32 %v1363_v25, %v1792_v26 }
 0x19b   :  { %v935_v42 = vmax.f32 %v457_v32, %v886_v33 }
 0x19c   :  { %v1890_v31 = vmax.f32 %v934_v29, %v1841_v30 }
 0x19d   :  { %v1291_v34 = vpop.f32.mrf.mxu2  ;;  %v1720_v35 = vpop.f32.mrf.mxu3 }
 0x19e   :  { %v1939_v36 = vpack.c.bf16 %v1890_v31, %v1890_v31  ;;  %v1292_v37 = vadd.f32 %v3173_v39, %v1291_v34  ;;  %v1721_v38 = vadd.f32 %v3173_v39, %v1720_v35  ;;  %v386_v40 = vpop.f32.mrf.mxu0  ;;  %v815_v41 = vpop.f32.mrf.mxu1 }
 0x19f   :  { %v387_v45 = vadd.f32 %v3173_v39, %v386_v40  ;;  %v816_v47 = vadd.f32 %v3173_v39, %v815_v41 }
 0x1a0   :  { %1989 = vst.msk [vmem:[%s3447_s6 + $0x84] sm:$0xf] %vm1955_vm3, %v1939_v36  ;;  %v1364_v43 = vmax.f32 %v1292_v37, 0.0  ;;  %v1793_v44 = vmax.f32 %v1721_v38, 0.0 }
 0x1a1   :  { %v458_v49 = vmax.f32 %v387_v45, 0.0  ;;  %v887_v53 = vmax.f32 %v816_v47, 0.0 }
 0x1a2   :  { %v1842_v46 = vmax.f32 %v1364_v43, %v1793_v44 }
 0x1a3   :  { %v936_v62 = vmax.f32 %v458_v49, %v887_v53 }
 0x1a4   :  { %v1891_v48 = vmax.f32 %v935_v42, %v1842_v46 }
 0x1a5   :  { %v1293_v50 = vpop.f32.mrf.mxu2  ;;  %v1722_v51 = vpop.f32.mrf.mxu3 }
 0x1a6   :  { %v1940_v52 = vpack.c.bf16 %v1891_v48, %v1891_v48  ;;  %v1294_v54 = vadd.f32 %v3173_v39, %v1293_v50  ;;  %v1723_v55 = vadd.f32 %v3173_v39, %v1722_v51  ;;  %v389_v56 = vpop.f32.mrf.mxu0  ;;  %v818_v57 = vpop.f32.mrf.mxu1 }
 0x1a7   :  { %v390_v60 = vadd.f32 %v3173_v39, %v389_v56  ;;  %v819_v61 = vadd.f32 %v3173_v39, %v818_v57 }
 0x1a8   :  { %1990 = vst.msk [vmem:[%s3447_s6 + $0x88] sm:$0xf] %vm1955_vm3, %v1940_v52  ;;  %v1365_v58 = vmax.f32 %v1294_v54, 0.0  ;;  %v1794_v59 = vmax.f32 %v1723_v55, 0.0 }
 0x1a9   :  { %v459_v1 = vmax.f32 %v390_v60, 0.0  ;;  %v888_v2 = vmax.f32 %v819_v61, 0.0 }
 0x1aa   :  { %v1843_v63 = vmax.f32 %v1365_v58, %v1794_v59 }
 0x1ab   :  { %v937_v10 = vmax.f32 %v459_v1, %v888_v2 }
 0x1ac   :  { %v1892_v0 = vmax.f32 %v936_v62, %v1843_v63 }
 0x1ad   :  { %v1296_v3 = vpop.f32.mrf.mxu2  ;;  %v1725_v4 = vpop.f32.mrf.mxu3 }
 0x1ae   :  { %v1941_v5 = vpack.c.bf16 %v1892_v0, %v1892_v0  ;;  %v1297_v6 = vadd.f32 %v3173_v39, %v1296_v3  ;;  %v1726_v7 = vadd.f32 %v3173_v39, %v1725_v4  ;;  %v391_v8 = vpop.f32.mrf.mxu0  ;;  %v820_v9 = vpop.f32.mrf.mxu1 }
 0x1af   :  { %v392_v13 = vadd.f32 %v3173_v39, %v391_v8  ;;  %v821_v15 = vadd.f32 %v3173_v39, %v820_v9 }
 0x1b0   :  { %1991 = vst.msk [vmem:[%s3447_s6 + $0x8c] sm:$0xf] %vm1955_vm3, %v1941_v5  ;;  %v1366_v11 = vmax.f32 %v1297_v6, 0.0  ;;  %v1795_v12 = vmax.f32 %v1726_v7, 0.0 }
 0x1b1   :  { %v460_v17 = vmax.f32 %v392_v13, 0.0  ;;  %v889_v21 = vmax.f32 %v821_v15, 0.0 }
 0x1b2   :  { %v1844_v14 = vmax.f32 %v1366_v11, %v1795_v12 }
 0x1b3   :  { %v938_v30 = vmax.f32 %v460_v17, %v889_v21 }
 0x1b4   :  { %v1893_v16 = vmax.f32 %v937_v10, %v1844_v14 }
 0x1b5   :  { %v1298_v18 = vpop.f32.mrf.mxu2  ;;  %v1727_v19 = vpop.f32.mrf.mxu3 }
 0x1b6   :  { %v1942_v20 = vpack.c.bf16 %v1893_v16, %v1893_v16  ;;  %v1299_v22 = vadd.f32 %v3173_v39, %v1298_v18  ;;  %v1728_v23 = vadd.f32 %v3173_v39, %v1727_v19  ;;  %v394_v24 = vpop.f32.mrf.mxu0  ;;  %v823_v25 = vpop.f32.mrf.mxu1 }
 0x1b7   :  { %v395_v28 = vadd.f32 %v3173_v39, %v394_v24  ;;  %v824_v29 = vadd.f32 %v3173_v39, %v823_v25 }
 0x1b8   :  { %1992 = vst.msk [vmem:[%s3447_s6 + $0x90] sm:$0xf] %vm1955_vm3, %v1942_v20  ;;  %v1367_v26 = vmax.f32 %v1299_v22, 0.0  ;;  %v1796_v27 = vmax.f32 %v1728_v23, 0.0 }
 0x1b9   :  { %v461_v33 = vmax.f32 %v395_v28, 0.0  ;;  %v890_v34 = vmax.f32 %v824_v29, 0.0 }
 0x1ba   :  { %v1845_v31 = vmax.f32 %v1367_v26, %v1796_v27 }
 0x1bb   :  { %v939_v43 = vmax.f32 %v461_v33, %v890_v34 }
 0x1bc   :  { %v1894_v32 = vmax.f32 %v938_v30, %v1845_v31 }
 0x1bd   :  { %v1301_v35 = vpop.f32.mrf.mxu2  ;;  %v1730_v36 = vpop.f32.mrf.mxu3 }
 0x1be   :  { %v1943_v37 = vpack.c.bf16 %v1894_v32, %v1894_v32  ;;  %v1302_v38 = vadd.f32 %v3173_v39, %v1301_v35  ;;  %v1731_v40 = vadd.f32 %v3173_v39, %v1730_v36  ;;  %v396_v41 = vpop.f32.mrf.mxu0  ;;  %v825_v42 = vpop.f32.mrf.mxu1 }
 0x1bf   :  { %v397_v46 = vadd.f32 %v3173_v39, %v396_v41  ;;  %v826_v48 = vadd.f32 %v3173_v39, %v825_v42 }
 0x1c0   :  { %1993 = vst.msk [vmem:[%s3447_s6 + $0x94] sm:$0xf] %vm1955_vm3, %v1943_v37  ;;  %v1368_v44 = vmax.f32 %v1302_v38, 0.0  ;;  %v1797_v45 = vmax.f32 %v1731_v40, 0.0 }
 0x1c1   :  { %v462_v50 = vmax.f32 %v397_v46, 0.0  ;;  %v891_v54 = vmax.f32 %v826_v48, 0.0 }
 0x1c2   :  { %v1846_v47 = vmax.f32 %v1368_v44, %v1797_v45 }
 0x1c3   :  { %v940_v63 = vmax.f32 %v462_v50, %v891_v54 }
 0x1c4   :  { %v1895_v49 = vmax.f32 %v939_v43, %v1846_v47 }
 0x1c5   :  { %v1303_v51 = vpop.f32.mrf.mxu2  ;;  %v1732_v52 = vpop.f32.mrf.mxu3 }
 0x1c6   :  { %v1944_v53 = vpack.c.bf16 %v1895_v49, %v1895_v49  ;;  %v1304_v55 = vadd.f32 %v3173_v39, %v1303_v51  ;;  %v1733_v56 = vadd.f32 %v3173_v39, %v1732_v52  ;;  %v399_v57 = vpop.f32.mrf.mxu0  ;;  %v828_v58 = vpop.f32.mrf.mxu1 }
 0x1c7   :  { %v400_v61 = vadd.f32 %v3173_v39, %v399_v57  ;;  %v829_v62 = vadd.f32 %v3173_v39, %v828_v58 }
 0x1c8   :  { %1994 = vst.msk [vmem:[%s3447_s6 + $0x98] sm:$0xf] %vm1955_vm3, %v1944_v53  ;;  %v1369_v59 = vmax.f32 %v1304_v55, 0.0  ;;  %v1798_v60 = vmax.f32 %v1733_v56, 0.0 }
 0x1c9   :  { %v463_v2 = vmax.f32 %v400_v61, 0.0  ;;  %v892_v3 = vmax.f32 %v829_v62, 0.0 }
 0x1ca   :  { %v1847_v0 = vmax.f32 %v1369_v59, %v1798_v60 }
 0x1cb   :  { %v941_v11 = vmax.f32 %v463_v2, %v892_v3 }
 0x1cc   :  { %v1896_v1 = vmax.f32 %v940_v63, %v1847_v0 }
 0x1cd   :  { %v1306_v4 = vpop.f32.mrf.mxu2  ;;  %v1735_v5 = vpop.f32.mrf.mxu3 }
 0x1ce   :  { %v1945_v6 = vpack.c.bf16 %v1896_v1, %v1896_v1  ;;  %v1307_v7 = vadd.f32 %v3173_v39, %v1306_v4  ;;  %v1736_v8 = vadd.f32 %v3173_v39, %v1735_v5  ;;  %v401_v9 = vpop.f32.mrf.mxu0  ;;  %v830_v10 = vpop.f32.mrf.mxu1 }
 0x1cf   :  { %v402_v14 = vadd.f32 %v3173_v39, %v401_v9  ;;  %v831_v16 = vadd.f32 %v3173_v39, %v830_v10 }
 0x1d0   :  { %1995 = vst.msk [vmem:[%s3447_s6 + $0x9c] sm:$0xf] %vm1955_vm3, %v1945_v6  ;;  %v1370_v12 = vmax.f32 %v1307_v7, 0.0  ;;  %v1799_v13 = vmax.f32 %v1736_v8, 0.0 }
 0x1d1   :  { %v464_v18 = vmax.f32 %v402_v14, 0.0  ;;  %v893_v22 = vmax.f32 %v831_v16, 0.0 }
 0x1d2   :  { %v1848_v15 = vmax.f32 %v1370_v12, %v1799_v13 }
 0x1d3   :  { %v942_v31 = vmax.f32 %v464_v18, %v893_v22 }
 0x1d4   :  { %v1897_v17 = vmax.f32 %v941_v11, %v1848_v15 }
 0x1d5   :  { %v1308_v19 = vpop.f32.mrf.mxu2  ;;  %v1737_v20 = vpop.f32.mrf.mxu3 }
 0x1d6   :  { %v1946_v21 = vpack.c.bf16 %v1897_v17, %v1897_v17  ;;  %v1309_v23 = vadd.f32 %v3173_v39, %v1308_v19  ;;  %v1738_v24 = vadd.f32 %v3173_v39, %v1737_v20  ;;  %v404_v25 = vpop.f32.mrf.mxu0  ;;  %v833_v26 = vpop.f32.mrf.mxu1 }
 0x1d7   :  { %v405_v29 = vadd.f32 %v3173_v39, %v404_v25  ;;  %v834_v30 = vadd.f32 %v3173_v39, %v833_v26 }
 0x1d8   :  { %1996 = vst.msk [vmem:[%s3447_s6 + $0xa0] sm:$0xf] %vm1955_vm3, %v1946_v21  ;;  %v1371_v27 = vmax.f32 %v1309_v23, 0.0  ;;  %v1800_v28 = vmax.f32 %v1738_v24, 0.0 }
 0x1d9   :  { %v465_v34 = vmax.f32 %v405_v29, 0.0  ;;  %v894_v35 = vmax.f32 %v834_v30, 0.0 }
 0x1da   :  { %v1849_v32 = vmax.f32 %v1371_v27, %v1800_v28 }
 0x1db   :  { %v943_v44 = vmax.f32 %v465_v34, %v894_v35 }
 0x1dc   :  { %v1898_v33 = vmax.f32 %v942_v31, %v1849_v32 }
 0x1dd   :  { %v1311_v36 = vpop.f32.mrf.mxu2  ;;  %v1740_v37 = vpop.f32.mrf.mxu3 }
 0x1de   :  { %v1947_v38 = vpack.c.bf16 %v1898_v33, %v1898_v33  ;;  %v1312_v40 = vadd.f32 %v3173_v39, %v1311_v36  ;;  %v1741_v41 = vadd.f32 %v3173_v39, %v1740_v37  ;;  %v406_v42 = vpop.f32.mrf.mxu0  ;;  %v835_v43 = vpop.f32.mrf.mxu1 }
 0x1df   :  { %v407_v47 = vadd.f32 %v3173_v39, %v406_v42  ;;  %v836_v49 = vadd.f32 %v3173_v39, %v835_v43 }
 0x1e0   :  { %1997 = vst.msk [vmem:[%s3447_s6 + $0xa4] sm:$0xf] %vm1955_vm3, %v1947_v38  ;;  %v1372_v45 = vmax.f32 %v1312_v40, 0.0  ;;  %v1801_v46 = vmax.f32 %v1741_v41, 0.0 }
 0x1e1   :  { %v466_v51 = vmax.f32 %v407_v47, 0.0  ;;  %v895_v55 = vmax.f32 %v836_v49, 0.0 }
 0x1e2   :  { %v1850_v48 = vmax.f32 %v1372_v45, %v1801_v46 }
 0x1e3   :  { %v944_v0 = vmax.f32 %v466_v51, %v895_v55 }
 0x1e4   :  { %v1899_v50 = vmax.f32 %v943_v44, %v1850_v48 }
 0x1e5   :  { %v1313_v52 = vpop.f32.mrf.mxu2  ;;  %v1742_v53 = vpop.f32.mrf.mxu3 }
 0x1e6   :  { %v1948_v54 = vpack.c.bf16 %v1899_v50, %v1899_v50  ;;  %v1314_v56 = vadd.f32 %v3173_v39, %v1313_v52  ;;  %v1743_v57 = vadd.f32 %v3173_v39, %v1742_v53  ;;  %v409_v58 = vpop.f32.mrf.mxu0  ;;  %v838_v59 = vpop.f32.mrf.mxu1 }
 0x1e7   :  { %v410_v62 = vadd.f32 %v3173_v39, %v409_v58  ;;  %v839_v63 = vadd.f32 %v3173_v39, %v838_v59 }
 0x1e8   :  { %1998 = vst.msk [vmem:[%s3447_s6 + $0xa8] sm:$0xf] %vm1955_vm3, %v1948_v54  ;;  %v1373_v60 = vmax.f32 %v1314_v56, 0.0  ;;  %v1802_v61 = vmax.f32 %v1743_v57, 0.0 }
 0x1e9   :  { %v467_v3 = vmax.f32 %v410_v62, 0.0  ;;  %v896_v4 = vmax.f32 %v839_v63, 0.0 }
 0x1ea   :  { %v1851_v1 = vmax.f32 %v1373_v60, %v1802_v61 }
 0x1eb   :  { %v945_v12 = vmax.f32 %v467_v3, %v896_v4 }
 0x1ec   :  { %v1900_v2 = vmax.f32 %v944_v0, %v1851_v1 }
 0x1ed   :  { %v1316_v5 = vpop.f32.mrf.mxu2  ;;  %v1745_v6 = vpop.f32.mrf.mxu3 }
 0x1ee   :  { %v1949_v7 = vpack.c.bf16 %v1900_v2, %v1900_v2  ;;  %v1317_v8 = vadd.f32 %v3173_v39, %v1316_v5  ;;  %v1746_v9 = vadd.f32 %v3173_v39, %v1745_v6  ;;  %v411_v10 = vpop.f32.mrf.mxu0  ;;  %v840_v11 = vpop.f32.mrf.mxu1 }
 0x1ef   :  { %v412_v15 = vadd.f32 %v3173_v39, %v411_v10  ;;  %v841_v17 = vadd.f32 %v3173_v39, %v840_v11 }
 0x1f0   :  { %1999 = vst.msk [vmem:[%s3447_s6 + $0xac] sm:$0xf] %vm1955_vm3, %v1949_v7  ;;  %v1374_v13 = vmax.f32 %v1317_v8, 0.0  ;;  %v1803_v14 = vmax.f32 %v1746_v9, 0.0 }
 0x1f1   :  { %v468_v19 = vmax.f32 %v412_v15, 0.0  ;;  %v897_v23 = vmax.f32 %v841_v17, 0.0 }
 0x1f2   :  { %v1852_v16 = vmax.f32 %v1374_v13, %v1803_v14 }
 0x1f3   :  { %v946_v32 = vmax.f32 %v468_v19, %v897_v23 }
 0x1f4   :  { %v1901_v18 = vmax.f32 %v945_v12, %v1852_v16 }
 0x1f5   :  { %v1318_v20 = vpop.f32.mrf.mxu2  ;;  %v1747_v21 = vpop.f32.mrf.mxu3 }
 0x1f6   :  { %v1950_v22 = vpack.c.bf16 %v1901_v18, %v1901_v18  ;;  %v1319_v24 = vadd.f32 %v3173_v39, %v1318_v20  ;;  %v1748_v25 = vadd.f32 %v3173_v39, %v1747_v21  ;;  %v414_v26 = vpop.f32.mrf.mxu0  ;;  %v843_v27 = vpop.f32.mrf.mxu1 }
 0x1f7   :  { %v415_v30 = vadd.f32 %v3173_v39, %v414_v26  ;;  %v844_v31 = vadd.f32 %v3173_v39, %v843_v27 }
 0x1f8   :  { %2000 = vst.msk [vmem:[%s3447_s6 + $0xb0] sm:$0xf] %vm1955_vm3, %v1950_v22  ;;  %v1375_v28 = vmax.f32 %v1319_v24, 0.0  ;;  %v1804_v29 = vmax.f32 %v1748_v25, 0.0 }
 0x1f9   :  { %v469_v35 = vmax.f32 %v415_v30, 0.0  ;;  %v898_v36 = vmax.f32 %v844_v31, 0.0 }
 0x1fa   :  { %v1853_v33 = vmax.f32 %v1375_v28, %v1804_v29 }
 0x1fb   :  { %v947_v45 = vmax.f32 %v469_v35, %v898_v36 }
 0x1fc   :  { %v1902_v34 = vmax.f32 %v946_v32, %v1853_v33 }
 0x1fd   :  { %v1321_v37 = vpop.f32.mrf.mxu2  ;;  %v1750_v38 = vpop.f32.mrf.mxu3 }
 0x1fe   :  { %v1951_v40 = vpack.c.bf16 %v1902_v34, %v1902_v34  ;;  %v1322_v41 = vadd.f32 %v3173_v39, %v1321_v37  ;;  %v1751_v42 = vadd.f32 %v3173_v39, %v1750_v38  ;;  %v416_v43 = vpop.f32.mrf.mxu0  ;;  %v845_v44 = vpop.f32.mrf.mxu1 }
 0x1ff   :  { %v417_v48 = vadd.f32 %v3173_v39, %v416_v43  ;;  %v846_v50 = vadd.f32 %v3173_v39, %v845_v44 }
 0x200   :  { %2001 = vst.msk [vmem:[%s3447_s6 + $0xb4] sm:$0xf] %vm1955_vm3, %v1951_v40  ;;  %v1376_v46 = vmax.f32 %v1322_v41, 0.0  ;;  %v1805_v47 = vmax.f32 %v1751_v42, 0.0 }
 0x201   :  { %v470_v52 = vmax.f32 %v417_v48, 0.0  ;;  %v899_v56 = vmax.f32 %v846_v50, 0.0 }
 0x202   :  { %v1854_v49 = vmax.f32 %v1376_v46, %v1805_v47 }
 0x203   :  { %v948_v1 = vmax.f32 %v470_v52, %v899_v56 }
 0x204   :  { %v1903_v51 = vmax.f32 %v947_v45, %v1854_v49 }
 0x205   :  { %v1323_v53 = vpop.f32.mrf.mxu2  ;;  %v1752_v54 = vpop.f32.mrf.mxu3 }
 0x206   :  { %v1952_v55 = vpack.c.bf16 %v1903_v51, %v1903_v51  ;;  %v1324_v57 = vadd.f32 %v3173_v39, %v1323_v53  ;;  %v1753_v58 = vadd.f32 %v3173_v39, %v1752_v54  ;;  %v419_v59 = vpop.f32.mrf.mxu0  ;;  %v848_v60 = vpop.f32.mrf.mxu1 }
 0x207   :  { %v420_v63 = vadd.f32 %v3173_v39, %v419_v59  ;;  %v849_v0 = vadd.f32 %v3173_v39, %v848_v60 }
 0x208   :  { %2002 = vst.msk [vmem:[%s3447_s6 + $0xb8] sm:$0xf] %vm1955_vm3, %v1952_v55  ;;  %v1377_v61 = vmax.f32 %v1324_v57, 0.0  ;;  %v1806_v62 = vmax.f32 %v1753_v58, 0.0 }
 0x209   :  { %v471_v4 = vmax.f32 %v420_v63, 0.0  ;;  %v900_v5 = vmax.f32 %v849_v0, 0.0 }
 0x20a   :  { %v1855_v2 = vmax.f32 %v1377_v61, %v1806_v62 }
 0x20b   :  { %v949_v13 = vmax.f32 %v471_v4, %v900_v5 }
 0x20c   :  { %v1904_v3 = vmax.f32 %v948_v1, %v1855_v2 }
 0x20d   :  { %v1326_v6 = vpop.f32.mrf.mxu2  ;;  %v1755_v7 = vpop.f32.mrf.mxu3 }
 0x20e   :  { %v1953_v8 = vpack.c.bf16 %v1904_v3, %v1904_v3  ;;  %v1327_v9 = vadd.f32 %v3173_v39, %v1326_v6  ;;  %v1756_v10 = vadd.f32 %v3173_v39, %v1755_v7  ;;  %v421_v11 = vpop.f32.mrf.mxu0  ;;  %v850_v12 = vpop.f32.mrf.mxu1 }
 0x210   :  { %2003 = vst.msk [vmem:[%s3447_s6 + $0xbc] sm:$0xf] %vm1955_vm3, %v1953_v8  ;;  %v1378_v14 = vmax.f32 %v1327_v9, 0.0  ;;  %v1807_v15 = vmax.f32 %v1756_v10, 0.0 }
 0x212   :  { %v1856_v16 = vmax.f32 %v1378_v14, %v1807_v15 }
 0x214   :  { %v1905_v17 = vmax.f32 %v949_v13, %v1856_v16 }
 0x215   :  { %v1328_v18 = vpop.f32.mrf.mxu2  ;;  %v1757_v19 = vpop.f32.mrf.mxu3 }
 0x216   :  { %v1954_v20 = vpack.c.bf16 %v1905_v17, %v1905_v17 }
 0x218   :  { %2004 = vst.msk [vmem:[%s3447_s6 + $0xc0] sm:$0xf] %vm1955_vm3, %v1954_v20 }

// kernel: cnn_forward.4
= control target key start
LH: loop header
LB: loop body
LE: loop exit
PB: predicated region body
PF: predicated region fallthrough
CT: control target
= control target key end

     0   :  { %vm173_vm0 = vcmask 130048   ;;  %vm925_vm1 = vcmask 257024   ;;  %s1834_s4 = inlined_call_operand.vmem [shape: bf16[144,32], index: 4, kind: input, shape index: {}]   ;;  %s1835_s1 = inlined_call_operand.vmem [shape: bf16[104,144], index: 1, kind: input, shape index: {}]   ;;  %s1836_s0 = inlined_call_operand.vmem [shape: bf16[104,144], index: 0, kind: input, shape index: {}]   ;;  %s1837_s5 = inlined_call_operand.vmem [shape: f32[1,32], index: 5, kind: input, shape index: {}]   ;;  %s1838_s2 = inlined_call_operand.vmem [shape: bf16[104,144], index: 2, kind: input, shape index: {}]   ;;  %s1839_s3 = inlined_call_operand.vmem [shape: bf16[104,144], index: 3, kind: input, shape index: {}]   ;;  %s1840_s6 = inlined_call_operand.vmem [shape: bf16[104,32], index: 6, kind: output, shape index: {}]  }
   0x1   :  { %v1206_v0 = vld [vmem:[%s1834_s4 + $0x38] sm:$0xff]  ;;  %v1298_v1 = vld [vmem:[%s1834_s4 + $0x30] sm:$0xff]  ;;  %v1207_v2 = vld [vmem:[%s1834_s4 + $0x40] sm:$0xff] }
   0x2   :  { %195 = vmatpush.bf16.msra.mxu0 %v1206_v0  ;;  %388 = vmatpush.bf16.msra.mxu2 %v1206_v0  ;;  %v1220_v3 = vld [vmem:[%s1835_s1 + $0x4] sm:$0xf]  ;;  %v1038_v4 = vld [vmem:[%s1835_s1 + $0x8] sm:$0xf0]  ;;  %v1202_v11 = vld [vmem:[%s1834_s4 + $0x18] sm:$0xff] }
   0x3   :  { %v1041_v5 = vor.u32 %v1220_v3, %v1038_v4  ;;  %v1208_v6 = vld [vmem:[%s1836_s0 + $0x4] sm:$0xf]  ;;  %v947_v7 = vld [vmem:[%s1836_s0 + $0x8] sm:$0xf0]  ;;  %438 = vmatpush.bf16.msra.mxu3 %v1207_v2  ;;  %245 = vmatpush.bf16.msra.mxu1 %v1207_v2  ;;  %v1222_v12 = vld [vmem:[%s1835_s1 + $0x14] sm:$0xf] }
   0x4   :  { %v950_v8 = vor.u32 %v1208_v6, %v947_v7  ;;  %v1204_v9 = vld [vmem:[%s1834_s4 + $0x28] sm:$0xff]  ;;  %v1203_v10 = vld [vmem:[%s1834_s4 + $0x20] sm:$0xff]  ;;  %v1046_v13 = vld [vmem:[%s1835_s1 + $0x18] sm:$0xf0] }
   0x5   :  { %v1210_v14 = vld [vmem:[%s1836_s0 + $0x14] sm:$0xf]  ;;  %v955_v15 = vld [vmem:[%s1836_s0 + $0x18] sm:$0xf0]  ;;  %v1049_v17 = vor.u32 %v1222_v12, %v1046_v13  ;;  %v1200_v19 = vld [vmem:[%s1834_s4 + $0x8] sm:$0xff] }
   0x6   :  { %196 = vmatpush.bf16.msra.mxu0 %v1298_v1  ;;  %389 = vmatpush.bf16.msra.mxu2 %v1298_v1  ;;  %v1201_v16 = vld [vmem:[%s1834_s4 + $0x10] sm:$0xff]  ;;  %v958_v18 = vor.u32 %v1210_v14, %v955_v15  ;;  %v1199_v20 = vld [vmem:[%s1834_s4] sm:$0xff]  ;;  %v1209_v22 = vld [vmem:[%s1836_s0 + $0x4] sm:$0xf0] }
   0x7   :  { %644 = vmatpush.bf16.msrb.mxu3 %v1207_v2  ;;  %594 = vmatpush.bf16.msrb.mxu1 %v1206_v0  ;;  %v945_v21 = vld [vmem:[%s1836_s0] sm:$0xf]  ;;  %v1221_v24 = vld [vmem:[%s1835_s1 + $0x4] sm:$0xf0]  ;;  %v1224_v27 = vld [vmem:[%s1835_s1 + $0x24] sm:$0xf] }
   0x8   :  { %1082 = vmatmul.msk.bf16.vlgmr.msra.gmra.mxu3 %vm173_vm0, %v1041_v5  ;;  %1027 = vmatmul.msk.bf16.vlgmr.msra.gmra.mxu1 %vm173_vm0, %v950_v8  ;;  %v1036_v23 = vld [vmem:[%s1835_s1] sm:$0xf]  ;;  %v946_v25 = vor.u32 %v1209_v22, %v945_v21  ;;  %v1054_v28 = vld [vmem:[%s1835_s1 + $0x28] sm:$0xf0]  ;;  %v1212_v29 = vld [vmem:[%s1836_s0 + $0x24] sm:$0xf] }
   0x9   :  { %v1037_v26 = vor.u32 %v1221_v24, %v1036_v23  ;;  %v963_v30 = vld [vmem:[%s1836_s0 + $0x28] sm:$0xf0]  ;;  %v1057_v31 = vor.u32 %v1224_v27, %v1054_v28  ;;  %v953_v33 = vld [vmem:[%s1836_s0 + $0x10] sm:$0xf]  ;;  %v1211_v34 = vld [vmem:[%s1836_s0 + $0x14] sm:$0xf0] }
   0xa   :  { %197 = vmatpush.bf16.msra.mxu0 %v1204_v9  ;;  %390 = vmatpush.bf16.msra.mxu2 %v1204_v9  ;;  %v966_v32 = vor.u32 %v1212_v29, %v963_v30  ;;  %v1044_v35 = vld [vmem:[%s1835_s1 + $0x10] sm:$0xf]  ;;  %v1223_v36 = vld [vmem:[%s1835_s1 + $0x14] sm:$0xf0]  ;;  %v954_v37 = vor.u32 %v1211_v34, %v953_v33  ;;  %v1226_v39 = vld [vmem:[%s1835_s1 + $0x34] sm:$0xf] }
   0xb   :  { %595 = vmatpush.bf16.msrb.mxu1 %v1298_v1  ;;  %v1045_v38 = vor.u32 %v1223_v36, %v1044_v35  ;;  %v1062_v40 = vld [vmem:[%s1835_s1 + $0x38] sm:$0xf0]  ;;  %v1214_v41 = vld [vmem:[%s1836_s0 + $0x34] sm:$0xf]  ;;  %v961_v45 = vld [vmem:[%s1836_s0 + $0x20] sm:$0xf] }
   0xc   :  { %v971_v42 = vld [vmem:[%s1836_s0 + $0x38] sm:$0xf0]  ;;  %v1065_v43 = vor.u32 %v1226_v39, %v1062_v40  ;;  %v1213_v46 = vld [vmem:[%s1836_s0 + $0x24] sm:$0xf0]  ;;  %v1052_v47 = vld [vmem:[%s1835_s1 + $0x20] sm:$0xf] }
   0xd   :  { %v974_v44 = vor.u32 %v1214_v41, %v971_v42  ;;  %v1225_v48 = vld [vmem:[%s1835_s1 + $0x24] sm:$0xf0]  ;;  %v962_v49 = vor.u32 %v1213_v46, %v961_v45  ;;  %v1228_v51 = vld [vmem:[%s1835_s1 + $0x44] sm:$0xf]  ;;  %v1070_v52 = vld [vmem:[%s1835_s1 + $0x48] sm:$0xf0] }
   0xe   :  { %198 = vmatpush.bf16.msra.mxu0 %v1203_v10  ;;  %391 = vmatpush.bf16.msra.mxu2 %v1203_v10  ;;  %v1053_v50 = vor.u32 %v1225_v48, %v1052_v47  ;;  %v1216_v53 = vld [vmem:[%s1836_s0 + $0x44] sm:$0xf]  ;;  %v979_v54 = vld [vmem:[%s1836_s0 + $0x48] sm:$0xf0]  ;;  %v1073_v55 = vor.u32 %v1228_v51, %v1070_v52  ;;  %v969_v57 = vld [vmem:[%s1836_s0 + $0x30] sm:$0xf] }
   0xf   :  { %596 = vmatpush.bf16.msrb.mxu1 %v1204_v9  ;;  %v982_v56 = vor.u32 %v1216_v53, %v979_v54  ;;  %v1215_v58 = vld [vmem:[%s1836_s0 + $0x34] sm:$0xf0]  ;;  %v1060_v59 = vld [vmem:[%s1835_s1 + $0x30] sm:$0xf]  ;;  %v1230_v63 = vld [vmem:[%s1835_s1 + $0x54] sm:$0xf] }
  0x10   :  { %v1227_v60 = vld [vmem:[%s1835_s1 + $0x34] sm:$0xf0]  ;;  %v970_v61 = vor.u32 %v1215_v58, %v969_v57  ;;  %v977_v5 = vld [vmem:[%s1836_s0 + $0x40] sm:$0xf]  ;;  %v1217_v6 = vld [vmem:[%s1836_s0 + $0x44] sm:$0xf0] }
  0x11   :  { %v1061_v62 = vor.u32 %v1227_v60, %v1060_v59  ;;  %v1068_v7 = vld [vmem:[%s1835_s1 + $0x40] sm:$0xf]  ;;  %v1229_v8 = vld [vmem:[%s1835_s1 + $0x44] sm:$0xf0]  ;;  %v1232_v23 = vld [vmem:[%s1838_s2 + $0x4] sm:$0xf] }
  0x12   :  { %199 = vmatpush.bf16.msra.mxu0 %v1202_v11  ;;  %392 = vmatpush.bf16.msra.mxu2 %v1202_v11  ;;  %v1069_v12 = vor.u32 %v1229_v8, %v1068_v7  ;;  %v1093_v24 = vld [vmem:[%s1838_s2 + $0x8] sm:$0xf0]  ;;  %v1234_v33 = vld [vmem:[%s1838_s2 + $0x14] sm:$0xf]  ;;  %v1101_v34 = vld [vmem:[%s1838_s2 + $0x18] sm:$0xf0] }
  0x13   :  { %597 = vmatpush.bf16.msrb.mxu1 %v1203_v10  ;;  %v1096_v27 = vor.u32 %v1232_v23, %v1093_v24  ;;  %v1099_v35 = vld [vmem:[%s1838_s2 + $0x10] sm:$0xf]  ;;  %v1235_v36 = vld [vmem:[%s1838_s2 + $0x14] sm:$0xf0]  ;;  %v1146_v40 = vld [vmem:[%s1839_s3] sm:$0xf] }
  0x14   :  { %v1245_v41 = vld [vmem:[%s1839_s3 + $0x4] sm:$0xf0]  ;;  %v1244_v42 = vld [vmem:[%s1839_s3 + $0x4] sm:$0xf]  ;;  %v1247_v57 = vld [vmem:[%s1839_s3 + $0x14] sm:$0xf0] }
  0x15   :  { %v1147_v46 = vor.u32 %v1245_v41, %v1146_v40  ;;  %v1236_v48 = vld [vmem:[%s1838_s2 + $0x24] sm:$0xf]  ;;  %v1237_v51 = vld [vmem:[%s1838_s2 + $0x24] sm:$0xf0]  ;;  %v1246_v58 = vld [vmem:[%s1839_s3 + $0x14] sm:$0xf] }
  0x16   :  { %200 = vmatpush.bf16.msra.mxu0 %v1201_v16  ;;  %393 = vmatpush.bf16.msra.mxu2 %v1201_v16  ;;  %v1156_v59 = vld [vmem:[%s1839_s3 + $0x18] sm:$0xf0]  ;;  %v1164_v23 = vld [vmem:[%s1839_s3 + $0x28] sm:$0xf0] }
  0x17   :  { %598 = vmatpush.bf16.msrb.mxu1 %v1202_v11 }
  0x18   :  { %1083 = vmatmul.msk.bf16.gmra.mxu3 %vm173_vm0, %v1049_v17  ;;  %1028 = vmatmul.msk.bf16.gmra.mxu1 %vm173_vm0, %v958_v18  ;;  %v985_v17 = vld [vmem:[%s1836_s0 + $0x50] sm:$0xf]  ;;  %v1219_v18 = vld [vmem:[%s1836_s0 + $0x54] sm:$0xf0] }
  0x19   :  { %v986_v21 = vor.u32 %v1219_v18, %v985_v17 }
  0x1a   :  { %201 = vmatpush.bf16.msra.mxu0 %v1200_v19  ;;  %394 = vmatpush.bf16.msra.mxu2 %v1200_v19 }
  0x1b   :  { %599 = vmatpush.bf16.msrb.mxu1 %v1201_v16 }
  0x1e   :  { %202 = vmatpush.bf16.msra.mxu0 %v1199_v20  ;;  %395 = vmatpush.bf16.msra.mxu2 %v1199_v20 }
  0x1f   :  { %600 = vmatpush.bf16.msrb.mxu1 %v1200_v19 }
  0x21   :  { %203 = vmatmul.bf16.vlgmr.msra.gmra.mxu0 %v946_v25  ;;  %396 = vmatmul.bf16.vlgmr.msra.gmra.mxu2 %v1037_v26  ;;  %v1091_v25 = vld [vmem:[%s1838_s2] sm:$0xf]  ;;  %v1233_v26 = vld [vmem:[%s1838_s2 + $0x4] sm:$0xf0] }
  0x22   :  { %837 = vmatpush.bf16.msrb.mxu2 %v1207_v2  ;;  %787 = vmatpush.bf16.msrb.mxu0 %v1206_v0  ;;  %v1078_v0 = vld [vmem:[%s1835_s1 + $0x58] sm:$0xf0]  ;;  %v1092_v28 = vor.u32 %v1233_v26, %v1091_v25 }
  0x23   :  { %601 = vmatpush.bf16.msrb.mxu1 %v1199_v20  ;;  %v987_v2 = vld [vmem:[%s1836_s0 + $0x58] sm:$0xf0]  ;;  %v1081_v3 = vor.u32 %v1230_v63, %v1078_v0  ;;  %v1159_v0 = vor.u32 %v1246_v58, %v1156_v59 }
  0x26   :  { %788 = vmatpush.bf16.msrb.mxu0 %v1298_v1  ;;  %v1218_v1 = vld [vmem:[%s1836_s0 + $0x54] sm:$0xf] }
  0x27   :  { %v990_v4 = vor.u32 %v1218_v1, %v987_v2 }
  0x28   :  { %1084 = vmatmul.msk.bf16.gmra.mxu3 %vm173_vm0, %v1057_v31  ;;  %1029 = vmatmul.msk.bf16.gmra.mxu1 %vm173_vm0, %v966_v32 }
  0x2a   :  { %789 = vmatpush.bf16.msrb.mxu0 %v1204_v9  ;;  %v306_v9 = vld [vmem:[%s1835_s1 + $0x60] sm:$0xff] }
  0x2b   :  { %v345_v13 = vunpack.c.h.b16 %v306_v9  ;;  %v344_v30 = vunpack.c.l.b16 %v306_v9 }
  0x2d   :  { %v359_v15 = vpack.c.b16 %v345_v13, %v345_v13  ;;  %v358_v32 = vpack.c.b16 %v344_v30, %v344_v30 }
  0x2e   :  { %790 = vmatpush.bf16.msrb.mxu0 %v1203_v10  ;;  %v55_v10 = vld [vmem:[%s1836_s0 + $0x60] sm:$0xff] }
  0x2f   :  { %v97_v14 = vunpack.c.h.b16 %v55_v10  ;;  %v96_v29 = vunpack.c.l.b16 %v55_v10 }
  0x31   :  { %208 = vmatmul.bf16.gmra.mxu0 %v954_v37  ;;  %401 = vmatmul.bf16.gmra.mxu2 %v1045_v38  ;;  %v110_v31 = vpack.c.b16 %v96_v29, %v96_v29  ;;  %v1104_v37 = vor.u32 %v1234_v33, %v1101_v34  ;;  %v1100_v38 = vor.u32 %v1235_v36, %v1099_v35  ;;  %v1240_v34 = vld [vmem:[%s1838_s2 + $0x44] sm:$0xf]  ;;  %v1125_v35 = vld [vmem:[%s1838_s2 + $0x48] sm:$0xf0]  ;;  %v1123_v36 = vld [vmem:[%s1838_s2 + $0x40] sm:$0xf] }
  0x32   :  { %791 = vmatpush.bf16.msrb.mxu0 %v1202_v11  ;;  %v978_v11 = vor.u32 %v1217_v6, %v977_v5  ;;  %v1115_v5 = vld [vmem:[%s1838_s2 + $0x30] sm:$0xf]  ;;  %v1239_v6 = vld [vmem:[%s1838_s2 + $0x34] sm:$0xf0] }
  0x33   :  { %v1116_v10 = vor.u32 %v1239_v6, %v1115_v5  ;;  %v1242_v5 = vld [vmem:[%s1838_s2 + $0x54] sm:$0xf]  ;;  %v1133_v6 = vld [vmem:[%s1838_s2 + $0x58] sm:$0xf0] }
  0x36   :  { %792 = vmatpush.bf16.msrb.mxu0 %v1201_v16  ;;  %v111_v16 = vpack.c.b16 %v97_v14, %v97_v14 }
  0x38   :  { %1085 = vmatmul.msk.bf16.gmra.mxu3 %vm173_vm0, %v1065_v43  ;;  %1030 = vmatmul.msk.bf16.gmra.mxu1 %vm173_vm0, %v974_v44  ;;  %v1148_v43 = vld [vmem:[%s1839_s3 + $0x8] sm:$0xf0] }
  0x39   :  { %v1151_v47 = vor.u32 %v1244_v42, %v1148_v43  ;;  %v1128_v43 = vor.u32 %v1240_v34, %v1125_v35  ;;  %v512_v34 = vld [vmem:[%s1838_s2 + $0x60] sm:$0xff] }
  0x3a   :  { %793 = vmatpush.bf16.msrb.mxu0 %v1200_v19  ;;  %v1076_v19 = vld [vmem:[%s1835_s1 + $0x50] sm:$0xf] }
  0x3e   :  { %794 = vmatpush.bf16.msrb.mxu0 %v1199_v20  ;;  %v1231_v20 = vld [vmem:[%s1835_s1 + $0x54] sm:$0xf0] }
  0x3f   :  { %v1077_v22 = vor.u32 %v1231_v20, %v1076_v19  ;;  %v1162_v20 = vld [vmem:[%s1839_s3 + $0x20] sm:$0xf] }
  0x41   :  { %213 = vmatmul.bf16.gmra.mxu0 %v962_v49  ;;  %406 = vmatmul.bf16.gmra.mxu2 %v1053_v50  ;;  %v1109_v49 = vld [vmem:[%s1838_s2 + $0x28] sm:$0xf0]  ;;  %v1107_v50 = vld [vmem:[%s1838_s2 + $0x20] sm:$0xf] }
  0x42   :  { %v1112_v53 = vor.u32 %v1236_v48, %v1109_v49  ;;  %v1108_v54 = vor.u32 %v1237_v51, %v1107_v50 }
  0x48   :  { %1086 = vmatmul.msk.bf16.gmra.mxu3 %vm173_vm0, %v1073_v55  ;;  %1031 = vmatmul.msk.bf16.gmra.mxu1 %vm173_vm0, %v982_v56  ;;  %v1154_v56 = vld [vmem:[%s1839_s3 + $0x10] sm:$0xf] }
  0x49   :  { %v1155_v63 = vor.u32 %v1247_v57, %v1154_v56  ;;  %v1250_v56 = vld [vmem:[%s1839_s3 + $0x34] sm:$0xf]  ;;  %v1172_v57 = vld [vmem:[%s1839_s3 + $0x38] sm:$0xf0] }
  0x51   :  { %218 = vmatmul.bf16.gmra.mxu0 %v970_v61  ;;  %411 = vmatmul.bf16.gmra.mxu2 %v1061_v62  ;;  %v1556_v61 = vld [vmem:[%s1837_s5] ss:$0 sm:$0xff] }
  0x58   :  { %1087 = vmatmul.msk.bf16.gmra.mxu3 %vm173_vm0, %v1081_v3  ;;  %1032 = vmatmul.msk.bf16.gmra.mxu1 %vm173_vm0, %v990_v4  ;;  %v1238_v3 = vld [vmem:[%s1838_s2 + $0x34] sm:$0xf]  ;;  %v1117_v4 = vld [vmem:[%s1838_s2 + $0x38] sm:$0xf0] }
  0x59   :  { %v1120_v9 = vor.u32 %v1238_v3, %v1117_v4 }
  0x61   :  { %223 = vmatmul.bf16.gmra.mxu0 %v978_v11  ;;  %416 = vmatmul.bf16.gmra.mxu2 %v1069_v12 }
  0x68   :  { %1088 = vmatmul.msk.bf16.gmra.mxu3 %vm173_vm0, %v359_v15  ;;  %1033 = vmatmul.msk.bf16.gmra.mxu1 %vm173_vm0, %v111_v16 }
  0x71   :  { %228 = vmatmul.bf16.gmra.mxu0 %v986_v21  ;;  %421 = vmatmul.bf16.gmra.mxu2 %v1077_v22  ;;  %v1249_v21 = vld [vmem:[%s1839_s3 + $0x24] sm:$0xf0]  ;;  %v1248_v22 = vld [vmem:[%s1839_s3 + $0x24] sm:$0xf] }
  0x72   :  { %v1163_v29 = vor.u32 %v1249_v21, %v1162_v20  ;;  %v1167_v30 = vor.u32 %v1248_v22, %v1164_v23 }
  0x78   :  { %1137 = vmatmul.msk.bf16.vlgmr.msrb.gmra.mxu3 %vm173_vm0, %v1096_v27  ;;  %602 = vmatmul.bf16.vlgmr.msrb.gmra.mxu1 %v1092_v28 }
  0x81   :  { %233 = vmatmul.bf16.gmra.mxu0 %v110_v31  ;;  %426 = vmatmul.bf16.gmra.mxu2 %v358_v32 }
  0x85   :  { %v247_v39 = vpop.f32.mrf.mxu1 }
  0x88   :  { %1138 = vmatmul.msk.bf16.gmra.mxu3 %vm173_vm0, %v1104_v37  ;;  %607 = vmatmul.bf16.gmra.mxu1 %v1100_v38  ;;  %v1241_v37 = vld [vmem:[%s1838_s2 + $0x44] sm:$0xf0] }
  0x8b   :  { %v440_v44 = vpop.f32.mrf.mxu3 }
  0x8d   :  { %v249_v45 = vpop.f32.mrf.mxu1 }
  0x91   :  { %795 = vmatmul.bf16.vlgmr.msrb.gmra.mxu0 %v1147_v46  ;;  %1192 = vmatmul.msk.bf16.vlgmr.msrb.gmra.mxu2 %vm173_vm0, %v1151_v47 }
  0x93   :  { %v442_v52 = vpop.f32.mrf.mxu3 }
  0x95   :  { %v252_v55 = vpop.f32.mrf.mxu1 }
  0x98   :  { %1139 = vmatmul.msk.bf16.gmra.mxu3 %vm173_vm0, %v1112_v53  ;;  %612 = vmatmul.bf16.gmra.mxu1 %v1108_v54  ;;  %v1170_v54 = vld [vmem:[%s1839_s3 + $0x30] sm:$0xf] }
  0x9b   :  { %v445_v60 = vpop.f32.mrf.mxu3 }
  0x9d   :  { %v1558_v62 = vpop.f32.mrf.mxu1 }
  0x9e   :  { %v204_v1 = vpop.f32.mrf.mxu0 }
  0x9f   :  { %v205_v2 = vadd.f32 %v1556_v61, %v204_v1  ;;  %v1175_v1 = vor.u32 %v1250_v56, %v1172_v57 }
  0xa1   :  { %v248_v7 = vadd.f32 %v247_v39, %v205_v2  ;;  %800 = vmatmul.bf16.gmra.mxu0 %v1155_v63  ;;  %1193 = vmatmul.msk.bf16.gmra.mxu2 %vm173_vm0, %v1159_v0 }
  0xa3   :  { %v1574_v8 = vpop.f32.mrf.mxu3  ;;  %v281_v17 = vmax.f32 %v248_v7, 0.0  ;;  %v1131_v7 = vld [vmem:[%s1838_s2 + $0x50] sm:$0xf] }
  0xa4   :  { %v397_v11 = vpop.f32.mrf.mxu2 }
  0xa5   :  { %v1576_v12 = vpop.f32.mrf.mxu1  ;;  %v398_v13 = vadd.f32 %v1556_v61, %v397_v11 }
  0xa6   :  { %v206_v14 = vpop.f32.mrf.mxu0 }
  0xa7   :  { %v441_v15 = vadd.f32 %v440_v44, %v398_v13  ;;  %v207_v16 = vadd.f32 %v1556_v61, %v206_v14  ;;  %v1124_v44 = vor.u32 %v1241_v37, %v1123_v36 }
  0xa8   :  { %1140 = vmatmul.msk.bf16.gmra.mxu3 %vm173_vm0, %v1120_v9  ;;  %617 = vmatmul.bf16.gmra.mxu1 %v1116_v10  ;;  %v1243_v9 = vld [vmem:[%s1838_s2 + $0x54] sm:$0xf0] }
  0xa9   :  { %v474_v18 = vmax.f32 %v441_v15, 0.0  ;;  %v250_v19 = vadd.f32 %v249_v45, %v207_v16  ;;  %v1136_v15 = vor.u32 %v1242_v5, %v1133_v6  ;;  %v1132_v16 = vor.u32 %v1243_v9, %v1131_v7 }
  0xab   :  { %v1593_v24 = vpop.f32.mrf.mxu3  ;;  %v1595_v25 = vmax.f32 %v281_v17, %v474_v18  ;;  %v282_v38 = vmax.f32 %v250_v19, 0.0 }
  0xac   :  { %v399_v26 = vpop.f32.mrf.mxu2 }
  0xad   :  { %v1597_v27 = vpop.f32.mrf.mxu1  ;;  %v400_v28 = vadd.f32 %v1556_v61, %v399_v26 }
  0xae   :  { %v209_v31 = vpop.f32.mrf.mxu0 }
  0xaf   :  { %v443_v32 = vadd.f32 %v442_v52, %v400_v28  ;;  %v210_v33 = vadd.f32 %v1556_v61, %v209_v31  ;;  %v1178_v28 = vld [vmem:[%s1839_s3 + $0x40] sm:$0xf] }
  0xb1   :  { %v475_v39 = vmax.f32 %v443_v32, 0.0  ;;  %v253_v40 = vadd.f32 %v252_v55, %v210_v33  ;;  %805 = vmatmul.bf16.gmra.mxu0 %v1163_v29  ;;  %1194 = vmatmul.msk.bf16.gmra.mxu2 %vm173_vm0, %v1167_v30  ;;  %v1251_v55 = vld [vmem:[%s1839_s3 + $0x34] sm:$0xf0]  ;;  %v1253_v29 = vld [vmem:[%s1839_s3 + $0x44] sm:$0xf0] }
  0xb2   :  { %v1171_v0 = vor.u32 %v1251_v55, %v1170_v54  ;;  %v1180_v30 = vld [vmem:[%s1839_s3 + $0x48] sm:$0xf0]  ;;  %v1179_v36 = vor.u32 %v1253_v29, %v1178_v28 }
  0xb3   :  { %v1614_v41 = vpop.f32.mrf.mxu3  ;;  %v1616_v42 = vmax.f32 %v282_v38, %v475_v39  ;;  %v283_v51 = vmax.f32 %v253_v40, 0.0 }
  0xb4   :  { %v402_v45 = vpop.f32.mrf.mxu2 }
  0xb5   :  { %v1618_v46 = vpop.f32.mrf.mxu1  ;;  %v403_v47 = vadd.f32 %v1556_v61, %v402_v45 }
  0xb6   :  { %v211_v48 = vpop.f32.mrf.mxu0 }
  0xb7   :  { %v446_v49 = vadd.f32 %v445_v60, %v403_v47  ;;  %v212_v50 = vadd.f32 %v1556_v61, %v211_v48 }
  0xb8   :  { %1141 = vmatmul.msk.bf16.gmra.mxu3 %vm173_vm0, %v1128_v43  ;;  %622 = vmatmul.bf16.gmra.mxu1 %v1124_v44  ;;  %v551_v43 = vunpack.c.h.b16 %v512_v34  ;;  %v550_v44 = vunpack.c.l.b16 %v512_v34 }
  0xb9   :  { %v476_v52 = vmax.f32 %v446_v49, 0.0  ;;  %v255_v53 = vadd.f32 %v1558_v62, %v212_v50 }
  0xbb   :  { %v1636_v58 = vpop.f32.mrf.mxu3  ;;  %v1638_v59 = vmax.f32 %v283_v51, %v476_v52  ;;  %v284_v10 = vmax.f32 %v255_v53, 0.0  ;;  %v565_v51 = vpack.c.b16 %v551_v43, %v551_v43  ;;  %v564_v52 = vpack.c.b16 %v550_v44, %v550_v44 }
  0xbc   :  { %v404_v60 = vpop.f32.mrf.mxu2 }
  0xbd   :  { %v1640_v62 = vpop.f32.mrf.mxu1  ;;  %v405_v63 = vadd.f32 %v1556_v61, %v404_v60 }
  0xbe   :  { %v214_v2 = vpop.f32.mrf.mxu0 }
  0xbf   :  { %v448_v3 = vadd.f32 %v1574_v8, %v405_v63  ;;  %v215_v4 = vadd.f32 %v1556_v61, %v214_v2  ;;  %v1188_v2 = vld [vmem:[%s1839_s3 + $0x58] sm:$0xf0] }
  0xc1   :  { %v477_v8 = vmax.f32 %v448_v3, 0.0  ;;  %v258_v11 = vadd.f32 %v1576_v12, %v215_v4  ;;  %810 = vmatmul.bf16.gmra.mxu0 %v1171_v0  ;;  %1195 = vmatmul.msk.bf16.gmra.mxu2 %vm173_vm0, %v1175_v1  ;;  %v1186_v0 = vld [vmem:[%s1839_s3 + $0x50] sm:$0xf]  ;;  %v1255_v1 = vld [vmem:[%s1839_s3 + $0x54] sm:$0xf0] }
  0xc2   :  { %v1187_v7 = vor.u32 %v1255_v1, %v1186_v0 }
  0xc3   :  { %v1659_v13 = vpop.f32.mrf.mxu3  ;;  %v1661_v14 = vmax.f32 %v284_v10, %v477_v8  ;;  %v285_v12 = vmax.f32 %v258_v11, 0.0 }
  0xc4   :  { %v407_v17 = vpop.f32.mrf.mxu2 }
  0xc5   :  { %v1663_v18 = vpop.f32.mrf.mxu1  ;;  %v408_v19 = vadd.f32 %v1556_v61, %v407_v17 }
  0xc6   :  { %v216_v20 = vpop.f32.mrf.mxu0 }
  0xc7   :  { %v451_v21 = vadd.f32 %v1593_v24, %v408_v19  ;;  %v217_v22 = vadd.f32 %v1556_v61, %v216_v20  ;;  %v1252_v24 = vld [vmem:[%s1839_s3 + $0x44] sm:$0xf] }
  0xc8   :  { %1142 = vmatmul.msk.bf16.gmra.mxu3 %vm173_vm0, %v1136_v15  ;;  %627 = vmatmul.bf16.gmra.mxu1 %v1132_v16  ;;  %v1183_v37 = vor.u32 %v1252_v24, %v1180_v30 }
  0xc9   :  { %v478_v23 = vmax.f32 %v451_v21, 0.0  ;;  %v260_v26 = vadd.f32 %v1597_v27, %v217_v22 }
  0xcb   :  { %v460_v31 = vpop.f32.mrf.mxu3  ;;  %v1682_v32 = vmax.f32 %v285_v12, %v478_v23  ;;  %v286_v45 = vmax.f32 %v260_v26, 0.0 }
  0xcc   :  { %v409_v27 = vpop.f32.mrf.mxu2 }
  0xcd   :  { %v269_v33 = vpop.f32.mrf.mxu1  ;;  %v410_v35 = vadd.f32 %v1556_v61, %v409_v27 }
  0xce   :  { %v219_v38 = vpop.f32.mrf.mxu0 }
  0xcf   :  { %v453_v39 = vadd.f32 %v1614_v41, %v410_v35  ;;  %v220_v40 = vadd.f32 %v1556_v61, %v219_v38 }
  0xd1   :  { %v479_v47 = vmax.f32 %v453_v39, 0.0  ;;  %v263_v48 = vadd.f32 %v1618_v46, %v220_v40  ;;  %815 = vmatmul.bf16.gmra.mxu0 %v1179_v36  ;;  %1196 = vmatmul.msk.bf16.gmra.mxu2 %vm173_vm0, %v1183_v37 }
  0xd3   :  { %v462_v49 = vpop.f32.mrf.mxu3  ;;  %v1692_v50 = vmax.f32 %v286_v45, %v479_v47  ;;  %v287_v46 = vmax.f32 %v263_v48, 0.0 }
  0xd4   :  { %v412_v53 = vpop.f32.mrf.mxu2 }
  0xd5   :  { %v272_v54 = vpop.f32.mrf.mxu1  ;;  %v413_v41 = vadd.f32 %v1556_v61, %v412_v53 }
  0xd6   :  { %v221_v55 = vpop.f32.mrf.mxu0 }
  0xd7   :  { %v456_v56 = vadd.f32 %v1636_v58, %v413_v41  ;;  %v222_v57 = vadd.f32 %v1556_v61, %v221_v55  ;;  %v1254_v58 = vld [vmem:[%s1839_s3 + $0x54] sm:$0xf] }
  0xd8   :  { %1143 = vmatmul.msk.bf16.gmra.mxu3 %vm173_vm0, %v565_v51  ;;  %632 = vmatmul.bf16.gmra.mxu1 %v564_v52  ;;  %v1191_v9 = vor.u32 %v1254_v58, %v1188_v2 }
  0xd9   :  { %v480_v60 = vmax.f32 %v456_v56, 0.0  ;;  %v265_v63 = vadd.f32 %v1640_v62, %v222_v57 }
  0xdb   :  { %v465_v3 = vpop.f32.mrf.mxu3  ;;  %v1711_v4 = vmax.f32 %v287_v46, %v480_v60  ;;  %v288_v15 = vmax.f32 %v265_v63, 0.0 }
  0xdc   :  { %v414_v62 = vpop.f32.mrf.mxu2 }
  0xdd   :  { %v274_v5 = vpop.f32.mrf.mxu1  ;;  %v415_v6 = vadd.f32 %v1556_v61, %v414_v62 }
  0xde   :  { %v224_v10 = vpop.f32.mrf.mxu0 }
  0xdf   :  { %v458_v8 = vadd.f32 %v1659_v13, %v415_v6  ;;  %v225_v11 = vadd.f32 %v1556_v61, %v224_v10  ;;  %v705_v13 = vld [vmem:[%s1839_s3 + $0x60] sm:$0xff] }
  0xe0   :  { %v743_v29 = vunpack.c.l.b16 %v705_v13  ;;  %v744_v27 = vunpack.c.h.b16 %v705_v13 }
  0xe1   :  { %v481_v16 = vmax.f32 %v458_v8, 0.0  ;;  %v268_v17 = vadd.f32 %v1663_v18, %v225_v11  ;;  %820 = vmatmul.bf16.gmra.mxu0 %v1187_v7  ;;  %1197 = vmatmul.msk.bf16.gmra.mxu2 %vm173_vm0, %v1191_v9 }
  0xe2   :  { %v757_v39 = vpack.c.b16 %v743_v29, %v743_v29  ;;  %v758_v40 = vpack.c.b16 %v744_v27, %v744_v27 }
  0xe3   :  { %v467_v19 = vpop.f32.mrf.mxu3  ;;  %v1718_v20 = vmax.f32 %v288_v15, %v481_v16  ;;  %v289_v18 = vmax.f32 %v268_v17, 0.0 }
  0xe4   :  { %v417_v21 = vpop.f32.mrf.mxu2 }
  0xe5   :  { %v277_v22 = vpop.f32.mrf.mxu1  ;;  %v418_v12 = vadd.f32 %v1556_v61, %v417_v21 }
  0xe6   :  { %v226_v23 = vpop.f32.mrf.mxu0 }
  0xe7   :  { %v461_v26 = vadd.f32 %v460_v31, %v418_v12  ;;  %v227_v28 = vadd.f32 %v1556_v61, %v226_v23 }
  0xe9   :  { %v482_v24 = vmax.f32 %v461_v26, 0.0  ;;  %v270_v30 = vadd.f32 %v269_v33, %v227_v28 }
  0xeb   :  { %v470_v34 = vpop.f32.mrf.mxu3  ;;  %v1725_v35 = vmax.f32 %v289_v18, %v482_v24  ;;  %v290_v45 = vmax.f32 %v270_v30, 0.0 }
  0xec   :  { %v419_v36 = vpop.f32.mrf.mxu2 }
  0xed   :  { %v279_v37 = vpop.f32.mrf.mxu1  ;;  %v420_v38 = vadd.f32 %v1556_v61, %v419_v36 }
  0xee   :  { %v229_v43 = vpop.f32.mrf.mxu0 }
  0xef   :  { %v463_v44 = vadd.f32 %v462_v49, %v420_v38  ;;  %v230_v31 = vadd.f32 %v1556_v61, %v229_v43 }
  0xf1   :  { %v483_v47 = vmax.f32 %v463_v44, 0.0  ;;  %v273_v48 = vadd.f32 %v272_v54, %v230_v31  ;;  %825 = vmatmul.bf16.gmra.mxu0 %v757_v39  ;;  %1198 = vmatmul.msk.bf16.gmra.mxu2 %vm173_vm0, %v758_v40 }
  0xf3   :  { %v472_v33 = vpop.f32.mrf.mxu3  ;;  %v1730_v51 = vmax.f32 %v290_v45, %v483_v47  ;;  %v291_v49 = vmax.f32 %v273_v48, 0.0 }
  0xf4   :  { %v422_v52 = vpop.f32.mrf.mxu2 }
  0xf5   :  { %v603_v53 = vpop.f32.mrf.mxu1  ;;  %v423_v41 = vadd.f32 %v1556_v61, %v422_v52 }
  0xf6   :  { %v231_v55 = vpop.f32.mrf.mxu0  ;;  %v604_v28 = vadd.f32 %v1556_v61, %v603_v53 }
  0xf7   :  { %v466_v56 = vadd.f32 %v465_v3, %v423_v41  ;;  %v232_v57 = vadd.f32 %v1556_v61, %v231_v55 }
  0xf9   :  { %v484_v46 = vmax.f32 %v466_v56, 0.0  ;;  %v275_v60 = vadd.f32 %v274_v5, %v232_v57 }
  0xfb   :  { %v646_v63 = vpop.f32.mrf.mxu3  ;;  %v1734_v0 = vmax.f32 %v291_v49, %v484_v46  ;;  %v292_v7 = vmax.f32 %v275_v60, 0.0 }
  0xfc   :  { %v424_v54 = vpop.f32.mrf.mxu2 }
  0xfd   :  { %v605_v1 = vpop.f32.mrf.mxu1  ;;  %v425_v58 = vadd.f32 %v1556_v61, %v424_v54 }
  0xfe   :  { %v234_v2 = vpop.f32.mrf.mxu0 }
  0xff   :  { %v468_v62 = vadd.f32 %v467_v19, %v425_v58  ;;  %v235_v6 = vadd.f32 %v1556_v61, %v234_v2 }
 0x101   :  { %v485_v9 = vmax.f32 %v468_v62, 0.0  ;;  %v278_v10 = vadd.f32 %v277_v22, %v235_v6  ;;  %v647_v22 = vadd.f32 %v646_v63, %v604_v28 }
 0x103   :  { %v648_v3 = vpop.f32.mrf.mxu3  ;;  %v1738_v8 = vmax.f32 %v292_v7, %v485_v9  ;;  %v293_v21 = vmax.f32 %v278_v10, 0.0  ;;  %v680_v36 = vmax.f32 %v647_v22, 0.0 }
 0x104   :  { %v427_v11 = vpop.f32.mrf.mxu2 }
 0x105   :  { %v608_v15 = vpop.f32.mrf.mxu1  ;;  %v428_v5 = vadd.f32 %v1556_v61, %v427_v11 }
 0x106   :  { %v236_v16 = vpop.f32.mrf.mxu0  ;;  %v609_v52 = vadd.f32 %v1556_v61, %v608_v15 }
 0x107   :  { %v471_v17 = vadd.f32 %v470_v34, %v428_v5  ;;  %v606_v34 = vadd.f32 %v1556_v61, %v605_v1 }
 0x109   :  { %v486_v12 = vmax.f32 %v471_v17, 0.0  ;;  %v649_v44 = vadd.f32 %v648_v3, %v606_v34 }
 0x10b   :  { %v651_v13 = vpop.f32.mrf.mxu3  ;;  %v1741_v23 = vmax.f32 %v293_v21, %v486_v12  ;;  %v681_v55 = vmax.f32 %v649_v44, 0.0 }
 0x10c   :  { %v429_v19 = vpop.f32.mrf.mxu2  ;;  %v652_v57 = vadd.f32 %v651_v13, %v609_v52 }
 0x10d   :  { %v610_v26 = vpop.f32.mrf.mxu1 }
 0x10e   :  { %v796_v29 = vpop.f32.mrf.mxu0  ;;  %v682_v1 = vmax.f32 %v652_v57, 0.0  ;;  %v611_v6 = vadd.f32 %v1556_v61, %v610_v26 }
 0x10f   :  { %v797_v18 = vadd.f32 %v1556_v61, %v796_v29 }
 0x113   :  { %v653_v24 = vpop.f32.mrf.mxu3 }
 0x114   :  { %v839_v30 = vpop.f32.mrf.mxu2  ;;  %v654_v3 = vadd.f32 %v653_v24, %v611_v6 }
 0x115   :  { %v613_v27 = vpop.f32.mrf.mxu1  ;;  %v840_v37 = vadd.f32 %v839_v30, %v797_v18 }
 0x116   :  { %v798_v38 = vpop.f32.mrf.mxu0  ;;  %v614_v17 = vadd.f32 %v1556_v61, %v613_v27  ;;  %v683_v13 = vmax.f32 %v654_v3, 0.0 }
 0x117   :  { %v873_v39 = vmax.f32 %v840_v37, 0.0  ;;  %v799_v45 = vadd.f32 %v1556_v61, %v798_v38 }
 0x119   :  { %v886_v40 = vmax.f32 %v680_v36, %v873_v39 }
 0x11b   :  { %v656_v43 = vpop.f32.mrf.mxu3  ;;  %v899_v31 = vmax.f32 %v1595_v25, %v886_v40 }
 0x11c   :  { %v841_v47 = vpop.f32.mrf.mxu2  ;;  %v657_v26 = vadd.f32 %v656_v43, %v614_v17 }
 0x11d   :  { %v615_v48 = vpop.f32.mrf.mxu1  ;;  %v912_v33 = vpack.c.bf16 %v899_v31, %v899_v31  ;;  %v842_v53 = vadd.f32 %v841_v47, %v799_v45 }
 0x11e   :  { %v801_v41 = vpop.f32.mrf.mxu0  ;;  %v684_v30 = vmax.f32 %v657_v26, 0.0  ;;  %v616_v38 = vadd.f32 %v1556_v61, %v615_v48 }
 0x11f   :  { %926 = vst.msk [vmem:[%s1840_s6] sm:$0xf] %vm925_vm1, %v912_v33  ;;  %v874_v56 = vmax.f32 %v842_v53, 0.0  ;;  %v802_v25 = vadd.f32 %v1556_v61, %v801_v41 }
 0x121   :  { %v887_v49 = vmax.f32 %v681_v55, %v874_v56 }
 0x123   :  { %v658_v46 = vpop.f32.mrf.mxu3  ;;  %v900_v60 = vmax.f32 %v1616_v42, %v887_v49 }
 0x124   :  { %v844_v63 = vpop.f32.mrf.mxu2  ;;  %v659_v43 = vadd.f32 %v658_v46, %v616_v38 }
 0x125   :  { %v618_v54 = vpop.f32.mrf.mxu1  ;;  %v913_v58 = vpack.c.bf16 %v900_v60, %v900_v60  ;;  %v845_v2 = vadd.f32 %v844_v63, %v802_v25 }
 0x126   :  { %v803_v62 = vpop.f32.mrf.mxu0  ;;  %v619_v33 = vadd.f32 %v1556_v61, %v618_v54  ;;  %v685_v41 = vmax.f32 %v659_v43, 0.0 }
 0x127   :  { %927 = vst.msk [vmem:[%s1840_s6 + $0x4] sm:$0xf] %vm925_vm1, %v913_v58  ;;  %v875_v7 = vmax.f32 %v845_v2, 0.0  ;;  %v804_v42 = vadd.f32 %v1556_v61, %v803_v62 }
 0x129   :  { %v888_v9 = vmax.f32 %v682_v1, %v875_v7 }
 0x12b   :  { %v661_v10 = vpop.f32.mrf.mxu3  ;;  %v901_v11 = vmax.f32 %v1638_v59, %v888_v9 }
 0x12c   :  { %v846_v15 = vpop.f32.mrf.mxu2  ;;  %v662_v55 = vadd.f32 %v661_v10, %v619_v33 }
 0x12d   :  { %v620_v5 = vpop.f32.mrf.mxu1  ;;  %v914_v16 = vpack.c.bf16 %v901_v11, %v901_v11  ;;  %v847_v21 = vadd.f32 %v846_v15, %v804_v42 }
 0x12e   :  { %v806_v12 = vpop.f32.mrf.mxu0  ;;  %v686_v60 = vmax.f32 %v662_v55, 0.0  ;;  %v621_v58 = vadd.f32 %v1556_v61, %v620_v5 }
 0x12f   :  { %928 = vst.msk [vmem:[%s1840_s6 + $0x8] sm:$0xf] %vm925_vm1, %v914_v16  ;;  %v876_v19 = vmax.f32 %v847_v21, 0.0  ;;  %v807_v59 = vadd.f32 %v1556_v61, %v806_v12 }
 0x131   :  { %v889_v28 = vmax.f32 %v683_v13, %v876_v19 }
 0x133   :  { %v663_v29 = vpop.f32.mrf.mxu3  ;;  %v902_v22 = vmax.f32 %v1661_v14, %v889_v28 }
 0x134   :  { %v849_v18 = vpop.f32.mrf.mxu2  ;;  %v664_v7 = vadd.f32 %v663_v29, %v621_v58 }
 0x135   :  { %v623_v24 = vpop.f32.mrf.mxu1  ;;  %v915_v27 = vpack.c.bf16 %v902_v22, %v902_v22  ;;  %v850_v36 = vadd.f32 %v849_v18, %v807_v59 }
 0x136   :  { %v808_v37 = vpop.f32.mrf.mxu0  ;;  %v624_v42 = vadd.f32 %v1556_v61, %v623_v24  ;;  %v687_v17 = vmax.f32 %v664_v7, 0.0 }
 0x137   :  { %929 = vst.msk [vmem:[%s1840_s6 + $0xc] sm:$0xf] %vm925_vm1, %v915_v27  ;;  %v877_v34 = vmax.f32 %v850_v36, 0.0  ;;  %v809_v14 = vadd.f32 %v1556_v61, %v808_v37 }
 0x139   :  { %v890_v39 = vmax.f32 %v684_v30, %v877_v34 }
 0x13b   :  { %v666_v40 = vpop.f32.mrf.mxu3  ;;  %v903_v44 = vmax.f32 %v1682_v32, %v890_v39 }
 0x13c   :  { %v851_v31 = vpop.f32.mrf.mxu2  ;;  %v667_v21 = vadd.f32 %v666_v40, %v624_v42 }
 0x13d   :  { %v625_v45 = vpop.f32.mrf.mxu1  ;;  %v916_v47 = vpack.c.bf16 %v903_v44, %v903_v44  ;;  %v852_v52 = vadd.f32 %v851_v31, %v809_v14 }
 0x13e   :  { %v811_v53 = vpop.f32.mrf.mxu0  ;;  %v688_v59 = vmax.f32 %v667_v21, 0.0  ;;  %v626_v24 = vadd.f32 %v1556_v61, %v625_v45 }
 0x13f   :  { %930 = vst.msk [vmem:[%s1840_s6 + $0x10] sm:$0xf] %vm925_vm1, %v916_v47  ;;  %v878_v48 = vmax.f32 %v852_v52, 0.0  ;;  %v812_v32 = vadd.f32 %v1556_v61, %v811_v53 }
 0x141   :  { %v891_v56 = vmax.f32 %v685_v41, %v878_v48 }
 0x143   :  { %v668_v57 = vpop.f32.mrf.mxu3  ;;  %v904_v49 = vmax.f32 %v1692_v50, %v891_v56 }
 0x144   :  { %v854_v25 = vpop.f32.mrf.mxu2  ;;  %v669_v37 = vadd.f32 %v668_v57, %v626_v24 }
 0x145   :  { %v628_v46 = vpop.f32.mrf.mxu1  ;;  %v917_v63 = vpack.c.bf16 %v904_v49, %v904_v49  ;;  %v855_v54 = vadd.f32 %v854_v25, %v812_v32 }
 0x146   :  { %v813_v1 = vpop.f32.mrf.mxu0  ;;  %v629_v43 = vadd.f32 %v1556_v61, %v628_v46  ;;  %v689_v31 = vmax.f32 %v669_v37, 0.0 }
 0x147   :  { %931 = vst.msk [vmem:[%s1840_s6 + $0x14] sm:$0xf] %vm925_vm1, %v917_v63  ;;  %v879_v2 = vmax.f32 %v855_v54, 0.0  ;;  %v814_v50 = vadd.f32 %v1556_v61, %v813_v1 }
 0x149   :  { %v892_v62 = vmax.f32 %v686_v60, %v879_v2 }
 0x14b   :  { %v671_v6 = vpop.f32.mrf.mxu3  ;;  %v905_v9 = vmax.f32 %v1711_v4, %v892_v62 }
 0x14c   :  { %v856_v10 = vpop.f32.mrf.mxu2  ;;  %v672_v47 = vadd.f32 %v671_v6, %v629_v43 }
 0x14d   :  { %v630_v3 = vpop.f32.mrf.mxu1  ;;  %v918_v11 = vpack.c.bf16 %v905_v9, %v905_v9  ;;  %v857_v15 = vadd.f32 %v856_v10, %v814_v50 }
 0x14e   :  { %v816_v16 = vpop.f32.mrf.mxu0  ;;  %v690_v48 = vmax.f32 %v672_v47, 0.0  ;;  %v631_v57 = vadd.f32 %v1556_v61, %v630_v3 }
 0x14f   :  { %932 = vst.msk [vmem:[%s1840_s6 + $0x18] sm:$0xf] %vm925_vm1, %v918_v11  ;;  %v880_v5 = vmax.f32 %v857_v15, 0.0  ;;  %v817_v4 = vadd.f32 %v1556_v61, %v816_v16 }
 0x151   :  { %v893_v12 = vmax.f32 %v687_v17, %v880_v5 }
 0x153   :  { %v673_v13 = vpop.f32.mrf.mxu3  ;;  %v906_v19 = vmax.f32 %v1718_v20, %v893_v12 }
 0x154   :  { %v859_v26 = vpop.f32.mrf.mxu2  ;;  %v674_v46 = vadd.f32 %v673_v13, %v631_v57 }
 0x155   :  { %v633_v28 = vpop.f32.mrf.mxu1  ;;  %v919_v29 = vpack.c.bf16 %v906_v19, %v906_v19  ;;  %v860_v22 = vadd.f32 %v859_v26, %v817_v4 }
 0x156   :  { %v818_v18 = vpop.f32.mrf.mxu0  ;;  %v634_v1 = vadd.f32 %v1556_v61, %v633_v28  ;;  %v691_v62 = vmax.f32 %v674_v46, 0.0 }
 0x157   :  { %933 = vst.msk [vmem:[%s1840_s6 + $0x1c] sm:$0xf] %vm925_vm1, %v919_v29  ;;  %v881_v30 = vmax.f32 %v860_v22, 0.0  ;;  %v819_v20 = vadd.f32 %v1556_v61, %v818_v18 }
 0x159   :  { %v894_v27 = vmax.f32 %v688_v59, %v881_v30 }
 0x15b   :  { %v676_v36 = vpop.f32.mrf.mxu3  ;;  %v907_v38 = vmax.f32 %v1725_v35, %v894_v27 }
 0x15c   :  { %v861_v34 = vpop.f32.mrf.mxu2  ;;  %v677_v7 = vadd.f32 %v676_v36, %v634_v1 }
 0x15d   :  { %v635_v39 = vpop.f32.mrf.mxu1  ;;  %v920_v40 = vpack.c.bf16 %v907_v38, %v907_v38  ;;  %v862_v44 = vadd.f32 %v861_v34, %v819_v20 }
 0x15e   :  { %v821_v14 = vpop.f32.mrf.mxu0  ;;  %v692_v3 = vmax.f32 %v677_v7, 0.0 }
 0x15f   :  { %934 = vst.msk [vmem:[%s1840_s6 + $0x20] sm:$0xf] %vm925_vm1, %v920_v40  ;;  %v882_v45 = vmax.f32 %v862_v44, 0.0  ;;  %v822_v35 = vadd.f32 %v1556_v61, %v821_v14 }
 0x161   :  { %v895_v33 = vmax.f32 %v689_v31, %v882_v45 }
 0x163   :  { %v678_v52 = vpop.f32.mrf.mxu3  ;;  %v908_v53 = vmax.f32 %v1730_v51, %v895_v33 }
 0x164   :  { %v864_v41 = vpop.f32.mrf.mxu2 }
 0x165   :  { %v921_v55 = vpack.c.bf16 %v908_v53, %v908_v53  ;;  %v865_v56 = vadd.f32 %v864_v41, %v822_v35 }
 0x166   :  { %v823_v32 = vpop.f32.mrf.mxu0 }
 0x167   :  { %935 = vst.msk [vmem:[%s1840_s6 + $0x24] sm:$0xf] %vm925_vm1, %v921_v55  ;;  %v883_v49 = vmax.f32 %v865_v56, 0.0  ;;  %v824_v63 = vadd.f32 %v1556_v61, %v823_v32 }
 0x169   :  { %v896_v25 = vmax.f32 %v690_v48, %v883_v49 }
 0x16b   :  { %v909_v60 = vmax.f32 %v1734_v0, %v896_v25 }
 0x16c   :  { %v866_v51 = vpop.f32.mrf.mxu2 }
 0x16d   :  { %v922_v54 = vpack.c.bf16 %v909_v60, %v909_v60  ;;  %v867_v58 = vadd.f32 %v866_v51, %v824_v63 }
 0x16e   :  { %v826_v2 = vpop.f32.mrf.mxu0 }
 0x16f   :  { %936 = vst.msk [vmem:[%s1840_s6 + $0x28] sm:$0xf] %vm925_vm1, %v922_v54  ;;  %v884_v6 = vmax.f32 %v867_v58, 0.0  ;;  %v827_v50 = vadd.f32 %v1556_v61, %v826_v2 }
 0x171   :  { %v897_v9 = vmax.f32 %v691_v62, %v884_v6 }
 0x173   :  { %v910_v0 = vmax.f32 %v1738_v8, %v897_v9 }
 0x174   :  { %v869_v10 = vpop.f32.mrf.mxu2 }
 0x175   :  { %v923_v11 = vpack.c.bf16 %v910_v0, %v910_v0  ;;  %v870_v42 = vadd.f32 %v869_v10, %v827_v50 }
 0x176   :  { %v828_v15 = vpop.f32.mrf.mxu0 }
 0x177   :  { %937 = vst.msk [vmem:[%s1840_s6 + $0x2c] sm:$0xf] %vm925_vm1, %v923_v11  ;;  %v885_v16 = vmax.f32 %v870_v42, 0.0 }
 0x179   :  { %v898_v17 = vmax.f32 %v692_v3, %v885_v16 }
 0x17b   :  { %v911_v5 = vmax.f32 %v1741_v23, %v898_v17 }
 0x17c   :  { %v871_v21 = vpop.f32.mrf.mxu2 }
 0x17d   :  { %v924_v12 = vpack.c.bf16 %v911_v5, %v911_v5 }
 0x17f   :  { %938 = vst.msk [vmem:[%s1840_s6 + $0x30] sm:$0xf] %vm925_vm1, %v924_v12 }

// kernel: cnn_forward.5
= control target key start
LH: loop header
LB: loop body
LE: loop exit
PB: predicated region body
PF: predicated region fallthrough
CT: control target
= control target key end

     0   :  { %vm861_vm0 = vcmask 261120   ;;  %s2033_s1 = inlined_call_operand.vmem [shape: bf16[1568,128], index: 1, kind: input, shape index: {}]   ;;  %s2034_s2 = inlined_call_operand.vmem [shape: f32[1,128], index: 2, kind: input, shape index: {}]   ;;  %s2035_s0 = inlined_call_operand.vmem [shape: bf16[8,1568], index: 0, kind: input, shape index: {}]   ;;  %s2036_s4 = inlined_call_operand.vmem [shape: f32[1,128], index: 4, kind: input, shape index: {}]   ;;  %s2037_s3 = inlined_call_operand.vmem [shape: bf16[128,128], index: 3, kind: input, shape index: {}]   ;;  %s2038_s5 = inlined_call_operand.vmem [shape: f32[8,128], index: 5, kind: output, shape index: {}]  }
   0x1   :  { %v1554_v0 = vld [vmem:[%s2033_s1 + $0x38] sm:$0xff]  ;;  %v1553_v4 = vld [vmem:[%s2033_s1 + $0x30] sm:$0xff]  ;;  %v1552_v8 = vld [vmem:[%s2033_s1 + $0x28] sm:$0xff] }
   0x2   :  { %v1570_v1 = vld [vmem:[%s2033_s1 + $0xb8] sm:$0xff]  ;;  %865 = vmatpush.bf16.msra.mxu0 %v1554_v0  ;;  %v1569_v5 = vld [vmem:[%s2033_s1 + $0xb0] sm:$0xff]  ;;  %v1568_v9 = vld [vmem:[%s2033_s1 + $0xa8] sm:$0xff] }
   0x3   :  { %v1578_v2 = vld [vmem:[%s2033_s1 + $0xf8] sm:$0xff]  ;;  %891 = vmatpush.bf16.msra.mxu2 %v1570_v1  ;;  %v1577_v6 = vld [vmem:[%s2033_s1 + $0xf0] sm:$0xff]  ;;  %v1576_v10 = vld [vmem:[%s2033_s1 + $0xe8] sm:$0xff] }
   0x4   :  { %v1562_v3 = vld [vmem:[%s2033_s1 + $0x78] sm:$0xff]  ;;  %904 = vmatpush.bf16.msra.mxu3 %v1578_v2  ;;  %v1561_v7 = vld [vmem:[%s2033_s1 + $0x70] sm:$0xff]  ;;  %v1560_v11 = vld [vmem:[%s2033_s1 + $0x68] sm:$0xff] }
   0x5   :  { %878 = vmatpush.bf16.msra.mxu1 %v1562_v3  ;;  %v1551_v12 = vld [vmem:[%s2033_s1 + $0x20] sm:$0xff]  ;;  %v1550_v16 = vld [vmem:[%s2033_s1 + $0x18] sm:$0xff]  ;;  %v1549_v20 = vld [vmem:[%s2033_s1 + $0x10] sm:$0xff] }
   0x6   :  { %866 = vmatpush.bf16.msra.mxu0 %v1553_v4  ;;  %v1567_v13 = vld [vmem:[%s2033_s1 + $0xa0] sm:$0xff]  ;;  %v1566_v17 = vld [vmem:[%s2033_s1 + $0x98] sm:$0xff]  ;;  %v1565_v21 = vld [vmem:[%s2033_s1 + $0x90] sm:$0xff] }
   0x7   :  { %892 = vmatpush.bf16.msra.mxu2 %v1569_v5  ;;  %v1575_v14 = vld [vmem:[%s2033_s1 + $0xe0] sm:$0xff]  ;;  %v1574_v18 = vld [vmem:[%s2033_s1 + $0xd8] sm:$0xff]  ;;  %v1573_v22 = vld [vmem:[%s2033_s1 + $0xd0] sm:$0xff] }
   0x8   :  { %905 = vmatpush.bf16.msra.mxu3 %v1577_v6  ;;  %v1559_v15 = vld [vmem:[%s2033_s1 + $0x60] sm:$0xff]  ;;  %v1558_v19 = vld [vmem:[%s2033_s1 + $0x58] sm:$0xff]  ;;  %v1557_v23 = vld [vmem:[%s2033_s1 + $0x50] sm:$0xff] }
   0x9   :  { %879 = vmatpush.bf16.msra.mxu1 %v1561_v7  ;;  %v1548_v24 = vld [vmem:[%s2033_s1 + $0x8] sm:$0xff]  ;;  %v21_v29 = vld [vmem:[%s2035_s0] sm:$0xff]  ;;  %v1586_v35 = vld [vmem:[%s2033_s1 + $0x138] sm:$0xff] }
   0xa   :  { %867 = vmatpush.bf16.msra.mxu0 %v1552_v8  ;;  %v1564_v25 = vld [vmem:[%s2033_s1 + $0x88] sm:$0xff]  ;;  %v1547_v31 = vld [vmem:[%s2033_s1] sm:$0xff]  ;;  %v235_v33 = vunpack.c.l.b16 %v21_v29  ;;  %v1602_v37 = vld [vmem:[%s2033_s1 + $0x1b8] sm:$0xff]  ;;  %v236_v41 = vunpack.c.h.b16 %v21_v29 }
   0xb   :  { %893 = vmatpush.bf16.msra.mxu2 %v1568_v9  ;;  %v22_v26 = vld [vmem:[%s2035_s0 + $0x8] sm:$0xff]  ;;  %v1563_v32 = vld [vmem:[%s2033_s1 + $0x80] sm:$0xff]  ;;  %v1610_v38 = vld [vmem:[%s2033_s1 + $0x1f8] sm:$0xff] }
   0xc   :  { %906 = vmatpush.bf16.msra.mxu3 %v1576_v10  ;;  %v1572_v27 = vld [vmem:[%s2033_s1 + $0xc8] sm:$0xff]  ;;  %v237_v30 = vunpack.c.l.b16 %v22_v26  ;;  %v1571_v34 = vld [vmem:[%s2033_s1 + $0xc0] sm:$0xff]  ;;  %v238_v36 = vunpack.c.h.b16 %v22_v26  ;;  %v1594_v42 = vld [vmem:[%s2033_s1 + $0x178] sm:$0xff]  ;;  %v248_v43 = vpack.c.b16 %v235_v33, %v235_v33  ;;  %v249_v48 = vpack.c.b16 %v236_v41, %v236_v41 }
   0xd   :  { %880 = vmatpush.bf16.msra.mxu1 %v1560_v11  ;;  %v1556_v28 = vld [vmem:[%s2033_s1 + $0x48] sm:$0xff]  ;;  %v1555_v39 = vld [vmem:[%s2033_s1 + $0x40] sm:$0xff]  ;;  %v1585_v44 = vld [vmem:[%s2033_s1 + $0x130] sm:$0xff] }
   0xe   :  { %868 = vmatpush.bf16.msra.mxu0 %v1551_v12  ;;  %v250_v40 = vpack.c.b16 %v237_v30, %v237_v30  ;;  %v251_v45 = vpack.c.b16 %v238_v36, %v238_v36  ;;  %v1601_v46 = vld [vmem:[%s2033_s1 + $0x1b0] sm:$0xff]  ;;  %v1584_v50 = vld [vmem:[%s2033_s1 + $0x128] sm:$0xff]  ;;  %v1583_v54 = vld [vmem:[%s2033_s1 + $0x120] sm:$0xff] }
   0xf   :  { %894 = vmatpush.bf16.msra.mxu2 %v1567_v13  ;;  %v1609_v47 = vld [vmem:[%s2033_s1 + $0x1f0] sm:$0xff]  ;;  %v1600_v51 = vld [vmem:[%s2033_s1 + $0x1a8] sm:$0xff]  ;;  %v1599_v55 = vld [vmem:[%s2033_s1 + $0x1a0] sm:$0xff] }
  0x10   :  { %907 = vmatpush.bf16.msra.mxu3 %v1575_v14  ;;  %v1593_v49 = vld [vmem:[%s2033_s1 + $0x170] sm:$0xff]  ;;  %v1608_v52 = vld [vmem:[%s2033_s1 + $0x1e8] sm:$0xff]  ;;  %v1607_v56 = vld [vmem:[%s2033_s1 + $0x1e0] sm:$0xff] }
  0x11   :  { %881 = vmatpush.bf16.msra.mxu1 %v1559_v15  ;;  %v1592_v53 = vld [vmem:[%s2033_s1 + $0x168] sm:$0xff]  ;;  %v1591_v57 = vld [vmem:[%s2033_s1 + $0x160] sm:$0xff]  ;;  %v1582_v58 = vld [vmem:[%s2033_s1 + $0x118] sm:$0xff] }
  0x12   :  { %869 = vmatpush.bf16.msra.mxu0 %v1550_v16  ;;  %v1598_v59 = vld [vmem:[%s2033_s1 + $0x198] sm:$0xff]  ;;  %v1581_v62 = vld [vmem:[%s2033_s1 + $0x110] sm:$0xff]  ;;  %v1580_v2 = vld [vmem:[%s2033_s1 + $0x108] sm:$0xff] }
  0x13   :  { %895 = vmatpush.bf16.msra.mxu2 %v1566_v17  ;;  %v1606_v60 = vld [vmem:[%s2033_s1 + $0x1d8] sm:$0xff]  ;;  %v1597_v63 = vld [vmem:[%s2033_s1 + $0x190] sm:$0xff]  ;;  %v1596_v3 = vld [vmem:[%s2033_s1 + $0x188] sm:$0xff] }
  0x14   :  { %908 = vmatpush.bf16.msra.mxu3 %v1574_v18  ;;  %v1590_v61 = vld [vmem:[%s2033_s1 + $0x158] sm:$0xff]  ;;  %v1605_v0 = vld [vmem:[%s2033_s1 + $0x1d0] sm:$0xff]  ;;  %v1604_v4 = vld [vmem:[%s2033_s1 + $0x1c8] sm:$0xff] }
  0x15   :  { %882 = vmatpush.bf16.msra.mxu1 %v1558_v19  ;;  %v1589_v1 = vld [vmem:[%s2033_s1 + $0x150] sm:$0xff]  ;;  %v24_v5 = vld [vmem:[%s2035_s0 + $0x18] sm:$0xff]  ;;  %v1588_v7 = vld [vmem:[%s2033_s1 + $0x148] sm:$0xff] }
  0x16   :  { %870 = vmatpush.bf16.msra.mxu0 %v1549_v20  ;;  %v23_v6 = vld [vmem:[%s2035_s0 + $0x10] sm:$0xff]  ;;  %v1579_v8 = vld [vmem:[%s2033_s1 + $0x100] sm:$0xff]  ;;  %v241_v9 = vunpack.c.l.b16 %v24_v5  ;;  %v242_v13 = vunpack.c.h.b16 %v24_v5  ;;  %v1618_v14 = vld [vmem:[%s2033_s1 + $0x238] sm:$0xff] }
  0x17   :  { %896 = vmatpush.bf16.msra.mxu2 %v1565_v21  ;;  %v1595_v10 = vld [vmem:[%s2033_s1 + $0x180] sm:$0xff]  ;;  %v239_v12 = vunpack.c.l.b16 %v23_v6  ;;  %v1634_v15 = vld [vmem:[%s2033_s1 + $0x2b8] sm:$0xff]  ;;  %v240_v18 = vunpack.c.h.b16 %v23_v6  ;;  %v1632_v29 = vld [vmem:[%s2033_s1 + $0x2a8] sm:$0xff] }
  0x18   :  { %909 = vmatpush.bf16.msra.mxu3 %v1573_v22  ;;  %v1603_v11 = vld [vmem:[%s2033_s1 + $0x1c0] sm:$0xff]  ;;  %v1642_v16 = vld [vmem:[%s2033_s1 + $0x2f8] sm:$0xff]  ;;  %v254_v20 = vpack.c.b16 %v241_v9, %v241_v9  ;;  %v255_v22 = vpack.c.b16 %v242_v13, %v242_v13  ;;  %v1640_v30 = vld [vmem:[%s2033_s1 + $0x2e8] sm:$0xff] }
  0x19   :  { %883 = vmatpush.bf16.msra.mxu1 %v1557_v23  ;;  %v1587_v17 = vld [vmem:[%s2033_s1 + $0x140] sm:$0xff]  ;;  %v1626_v19 = vld [vmem:[%s2033_s1 + $0x278] sm:$0xff]  ;;  %v252_v21 = vpack.c.b16 %v239_v12, %v239_v12  ;;  %v1617_v23 = vld [vmem:[%s2033_s1 + $0x230] sm:$0xff]  ;;  %v253_v26 = vpack.c.b16 %v240_v18, %v240_v18 }
  0x1a   :  { %871 = vmatpush.bf16.msra.mxu0 %v1548_v24  ;;  %v1633_v24 = vld [vmem:[%s2033_s1 + $0x2b0] sm:$0xff]  ;;  %v1631_v33 = vld [vmem:[%s2033_s1 + $0x2a0] sm:$0xff]  ;;  %v1614_v36 = vld [vmem:[%s2033_s1 + $0x218] sm:$0xff] }
  0x1b   :  { %897 = vmatpush.bf16.msra.mxu2 %v1564_v25  ;;  %v1641_v25 = vld [vmem:[%s2033_s1 + $0x2f0] sm:$0xff]  ;;  %v1652_v6 = vld [vmem:[%s2037_s3 + $0x38] sm:$0xff]  ;;  %v1650_v13 = vld [vmem:[%s2037_s3 + $0x28] sm:$0xff] }
  0x1c   :  { %910 = vmatpush.bf16.msra.mxu3 %v1572_v27  ;;  %v1625_v27 = vld [vmem:[%s2033_s1 + $0x270] sm:$0xff] }
  0x1d   :  { %884 = vmatpush.bf16.msra.mxu1 %v1556_v28  ;;  %v1616_v28 = vld [vmem:[%s2033_s1 + $0x228] sm:$0xff]  ;;  %v1629_v41 = vld [vmem:[%s2033_s1 + $0x290] sm:$0xff] }
  0x1e   :  { %872 = vmatpush.bf16.msra.mxu0 %v1547_v31  ;;  %v1624_v31 = vld [vmem:[%s2033_s1 + $0x268] sm:$0xff] }
  0x1f   :  { %898 = vmatpush.bf16.msra.mxu2 %v1563_v32  ;;  %v1615_v32 = vld [vmem:[%s2033_s1 + $0x220] sm:$0xff] }
  0x20   :  { %911 = vmatpush.bf16.msra.mxu3 %v1571_v34  ;;  %v1639_v34 = vld [vmem:[%s2033_s1 + $0x2e0] sm:$0xff] }
  0x21   :  { %885 = vmatpush.bf16.msra.mxu1 %v1555_v39  ;;  %873 = vmatmul.bf16.vlgmr.msra.gmra.mxu0 %v248_v43  ;;  %v1622_v39 = vld [vmem:[%s2033_s1 + $0x258] sm:$0xff]  ;;  %v1621_v43 = vld [vmem:[%s2033_s1 + $0x250] sm:$0xff] }
  0x22   :  { %917 = vmatpush.bf16.msrb.mxu0 %v1586_v35  ;;  %899 = vmatmul.bf16.vlgmr.msra.gmra.mxu2 %v250_v40  ;;  %v1623_v35 = vld [vmem:[%s2033_s1 + $0x260] sm:$0xff]  ;;  %v1613_v40 = vld [vmem:[%s2033_s1 + $0x210] sm:$0xff] }
  0x23   :  { %943 = vmatpush.bf16.msrb.mxu2 %v1602_v37  ;;  %912 = vmatmul.bf16.vlgmr.msra.gmra.mxu3 %v251_v45  ;;  %v1630_v37 = vld [vmem:[%s2033_s1 + $0x298] sm:$0xff]  ;;  %v1628_v45 = vld [vmem:[%s2033_s1 + $0x288] sm:$0xff] }
  0x24   :  { %956 = vmatpush.bf16.msrb.mxu3 %v1610_v38  ;;  %886 = vmatmul.bf16.vlgmr.msra.gmra.mxu1 %v249_v48  ;;  %v1638_v38 = vld [vmem:[%s2033_s1 + $0x2d8] sm:$0xff]  ;;  %v1636_v48 = vld [vmem:[%s2033_s1 + $0x2c8] sm:$0xff] }
  0x25   :  { %930 = vmatpush.bf16.msrb.mxu1 %v1594_v42  ;;  %v1637_v42 = vld [vmem:[%s2033_s1 + $0x2d0] sm:$0xff] }
  0x26   :  { %918 = vmatpush.bf16.msrb.mxu0 %v1585_v44  ;;  %v1612_v44 = vld [vmem:[%s2033_s1 + $0x208] sm:$0xff] }
  0x27   :  { %944 = vmatpush.bf16.msrb.mxu2 %v1601_v46  ;;  %v25_v46 = vld [vmem:[%s2035_s0 + $0x20] sm:$0xff] }
  0x28   :  { %957 = vmatpush.bf16.msrb.mxu3 %v1609_v47  ;;  %v26_v47 = vld [vmem:[%s2035_s0 + $0x28] sm:$0xff] }
  0x29   :  { %931 = vmatpush.bf16.msrb.mxu1 %v1593_v49  ;;  %v1620_v49 = vld [vmem:[%s2033_s1 + $0x248] sm:$0xff] }
  0x2a   :  { %919 = vmatpush.bf16.msrb.mxu0 %v1584_v50  ;;  %v243_v50 = vunpack.c.l.b16 %v25_v46 }
  0x2b   :  { %945 = vmatpush.bf16.msrb.mxu2 %v1600_v51  ;;  %v245_v51 = vunpack.c.l.b16 %v26_v47 }
  0x2c   :  { %958 = vmatpush.bf16.msrb.mxu3 %v1608_v52  ;;  %v1611_v52 = vld [vmem:[%s2033_s1 + $0x200] sm:$0xff] }
  0x2d   :  { %932 = vmatpush.bf16.msrb.mxu1 %v1592_v53  ;;  %v1627_v53 = vld [vmem:[%s2033_s1 + $0x280] sm:$0xff] }
  0x2e   :  { %920 = vmatpush.bf16.msrb.mxu0 %v1583_v54  ;;  %v246_v54 = vunpack.c.h.b16 %v26_v47 }
  0x2f   :  { %946 = vmatpush.bf16.msrb.mxu2 %v1599_v55  ;;  %v1635_v55 = vld [vmem:[%s2033_s1 + $0x2c0] sm:$0xff] }
  0x30   :  { %959 = vmatpush.bf16.msrb.mxu3 %v1607_v56  ;;  %v1644_v56 = vld [vmem:[%s2033_s1 + $0x308] sm:$0xff] }
  0x31   :  { %933 = vmatpush.bf16.msrb.mxu1 %v1591_v57  ;;  %v244_v57 = vunpack.c.h.b16 %v25_v46 }
  0x32   :  { %921 = vmatpush.bf16.msrb.mxu0 %v1582_v58  ;;  %v1619_v58 = vld [vmem:[%s2033_s1 + $0x240] sm:$0xff] }
  0x33   :  { %947 = vmatpush.bf16.msrb.mxu2 %v1598_v59  ;;  %v256_v59 = vpack.c.b16 %v243_v50, %v243_v50 }
  0x34   :  { %960 = vmatpush.bf16.msrb.mxu3 %v1606_v60  ;;  %v258_v60 = vpack.c.b16 %v245_v51, %v245_v51 }
  0x35   :  { %934 = vmatpush.bf16.msrb.mxu1 %v1590_v61  ;;  %v259_v61 = vpack.c.b16 %v246_v54, %v246_v54 }
  0x36   :  { %922 = vmatpush.bf16.msrb.mxu0 %v1581_v62  ;;  %v257_v62 = vpack.c.b16 %v244_v57, %v244_v57 }
  0x37   :  { %948 = vmatpush.bf16.msrb.mxu2 %v1597_v63  ;;  %v1643_v63 = vld [vmem:[%s2033_s1 + $0x300] sm:$0xff] }
  0x38   :  { %961 = vmatpush.bf16.msrb.mxu3 %v1605_v0  ;;  %v27_v0 = vld [vmem:[%s2035_s0 + $0x30] sm:$0xf] }
  0x39   :  { %935 = vmatpush.bf16.msrb.mxu1 %v1589_v1  ;;  %v247_v1 = vunpack.c.l.b16 %v27_v0 }
  0x3a   :  { %923 = vmatpush.bf16.msrb.mxu0 %v1580_v2 }
  0x3b   :  { %949 = vmatpush.bf16.msrb.mxu2 %v1596_v3  ;;  %v260_v2 = vpack.c.b16 %v247_v1, %v247_v1 }
  0x3c   :  { %962 = vmatpush.bf16.msrb.mxu3 %v1604_v4 }
  0x3d   :  { %936 = vmatpush.bf16.msrb.mxu1 %v1588_v7 }
  0x3e   :  { %924 = vmatpush.bf16.msrb.mxu0 %v1579_v8 }
  0x3f   :  { %950 = vmatpush.bf16.msrb.mxu2 %v1595_v10  ;;  %v1651_v10 = vld [vmem:[%s2037_s3 + $0x30] sm:$0xff] }
  0x40   :  { %963 = vmatpush.bf16.msrb.mxu3 %v1603_v11 }
  0x41   :  { %937 = vmatpush.bf16.msrb.mxu1 %v1587_v17  ;;  %925 = vmatmul.bf16.vlgmr.msrb.gmra.mxu0 %v252_v21 }
  0x42   :  { %969 = vmatpush.bf16.msra.mxu0 %v1618_v14  ;;  %951 = vmatmul.bf16.vlgmr.msrb.gmra.mxu2 %v254_v20  ;;  %v1653_v14 = vld [vmem:[%s2034_s2] ss:$0 sm:$0xff] }
  0x43   :  { %995 = vmatpush.bf16.msra.mxu2 %v1634_v15  ;;  %964 = vmatmul.bf16.vlgmr.msrb.gmra.mxu3 %v255_v22  ;;  %v1649_v15 = vld [vmem:[%s2037_s3 + $0x20] sm:$0xff]  ;;  %v1647_v22 = vld [vmem:[%s2037_s3 + $0x10] sm:$0xff] }
  0x44   :  { %1008 = vmatpush.bf16.msra.mxu3 %v1642_v16  ;;  %938 = vmatmul.bf16.vlgmr.msrb.gmra.mxu1 %v253_v26 }
  0x45   :  { %982 = vmatpush.bf16.msra.mxu1 %v1626_v19  ;;  %v1648_v19 = vld [vmem:[%s2037_s3 + $0x18] sm:$0xff] }
  0x46   :  { %970 = vmatpush.bf16.msra.mxu0 %v1617_v23 }
  0x47   :  { %996 = vmatpush.bf16.msra.mxu2 %v1633_v24 }
  0x48   :  { %1009 = vmatpush.bf16.msra.mxu3 %v1641_v25 }
  0x49   :  { %983 = vmatpush.bf16.msra.mxu1 %v1625_v27  ;;  %v1646_v27 = vld [vmem:[%s2037_s3 + $0x8] sm:$0xff] }
  0x4a   :  { %971 = vmatpush.bf16.msra.mxu0 %v1616_v28 }
  0x4b   :  { %997 = vmatpush.bf16.msra.mxu2 %v1632_v29 }
  0x4c   :  { %1010 = vmatpush.bf16.msra.mxu3 %v1640_v30 }
  0x4d   :  { %984 = vmatpush.bf16.msra.mxu1 %v1624_v31  ;;  %v1645_v31 = vld [vmem:[%s2037_s3] sm:$0xff] }
  0x4e   :  { %972 = vmatpush.bf16.msra.mxu0 %v1615_v32 }
  0x4f   :  { %998 = vmatpush.bf16.msra.mxu2 %v1631_v33 }
  0x50   :  { %1011 = vmatpush.bf16.msra.mxu3 %v1639_v34 }
  0x51   :  { %985 = vmatpush.bf16.msra.mxu1 %v1623_v35 }
  0x52   :  { %973 = vmatpush.bf16.msra.mxu0 %v1614_v36 }
  0x53   :  { %999 = vmatpush.bf16.msra.mxu2 %v1630_v37 }
  0x54   :  { %1012 = vmatpush.bf16.msra.mxu3 %v1638_v38 }
  0x55   :  { %986 = vmatpush.bf16.msra.mxu1 %v1622_v39 }
  0x56   :  { %974 = vmatpush.bf16.msra.mxu0 %v1613_v40 }
  0x57   :  { %1000 = vmatpush.bf16.msra.mxu2 %v1629_v41 }
  0x58   :  { %1013 = vmatpush.bf16.msra.mxu3 %v1637_v42 }
  0x59   :  { %987 = vmatpush.bf16.msra.mxu1 %v1621_v43 }
  0x5a   :  { %975 = vmatpush.bf16.msra.mxu0 %v1612_v44 }
  0x5b   :  { %1001 = vmatpush.bf16.msra.mxu2 %v1628_v45 }
  0x5c   :  { %1014 = vmatpush.bf16.msra.mxu3 %v1636_v48 }
  0x5d   :  { %988 = vmatpush.bf16.msra.mxu1 %v1620_v49 }
  0x5e   :  { %976 = vmatpush.bf16.msra.mxu0 %v1611_v52 }
  0x5f   :  { %1002 = vmatpush.bf16.msra.mxu2 %v1627_v53  ;;  %v1654_v53 = vld [vmem:[%s2036_s4] ss:$0 sm:$0xff] }
  0x60   :  { %1015 = vmatpush.bf16.msra.mxu3 %v1635_v55 }
  0x61   :  { %989 = vmatpush.bf16.msra.mxu1 %v1619_v58  ;;  %977 = vmatmul.bf16.vlgmr.msra.gmra.mxu0 %v256_v59 }
  0x62   :  { %1027 = vmatpush.bf16.msrb.mxu0 %v1644_v56  ;;  %1003 = vmatmul.bf16.vlgmr.msra.gmra.mxu2 %v258_v60 }
  0x63   :  { %1016 = vmatmul.bf16.vlgmr.msra.gmra.mxu3 %v259_v61 }
  0x64   :  { %990 = vmatmul.bf16.vlgmr.msra.gmra.mxu1 %v257_v62 }
  0x65   :  { %1104 = vmatpush.bf16.msrb.mxu1 %v1652_v6 }
  0x66   :  { %1028 = vmatpush.bf16.msrb.mxu0 %v1643_v63 }
  0x69   :  { %1105 = vmatpush.bf16.msrb.mxu1 %v1651_v10 }
  0x6d   :  { %1106 = vmatpush.bf16.msrb.mxu1 %v1650_v13 }
  0x71   :  { %1514 = vmatmul.msk.bf16.vlgmr.msrb.gmra.mxu0 %vm861_vm0, %v260_v2  ;;  %1107 = vmatpush.bf16.msrb.mxu1 %v1649_v15 }
  0x75   :  { %1108 = vmatpush.bf16.msrb.mxu1 %v1648_v19 }
  0x79   :  { %1109 = vmatpush.bf16.msrb.mxu1 %v1647_v22 }
  0x7d   :  { %1110 = vmatpush.bf16.msrb.mxu1 %v1646_v27 }
  0x81   :  { %1111 = vmatpush.bf16.msrb.mxu1 %v1645_v31 }
  0x9e   :  { %v874_v3 = vpop.f32.mrf.mxu0 }
  0x9f   :  { %v875_v18 = vadd.f32 %v1653_v14, %v874_v3 }
  0xa1   :  { %v887_v4 = vpop.f32.mrf.mxu1 }
  0xa2   :  { %v888_v23 = vadd.f32 %v887_v4, %v875_v18 }
  0xa5   :  { %v900_v5 = vpop.f32.mrf.mxu2 }
  0xa6   :  { %v913_v7 = vpop.f32.mrf.mxu3  ;;  %v876_v8 = vpop.f32.mrf.mxu0  ;;  %v901_v26 = vadd.f32 %v900_v5, %v888_v23 }
  0xa8   :  { %v914_v30 = vadd.f32 %v913_v7, %v901_v26 }
  0xa9   :  { %v889_v9 = vpop.f32.mrf.mxu1 }
  0xad   :  { %v902_v11 = vpop.f32.mrf.mxu2 }
  0xae   :  { %v915_v12 = vpop.f32.mrf.mxu3 }
  0xbe   :  { %v926_v16 = vpop.f32.mrf.mxu0 }
  0xbf   :  { %v927_v32 = vadd.f32 %v926_v16, %v914_v30 }
  0xc1   :  { %v939_v17 = vpop.f32.mrf.mxu1 }
  0xc2   :  { %v940_v33 = vadd.f32 %v939_v17, %v927_v32 }
  0xc5   :  { %v952_v20 = vpop.f32.mrf.mxu2 }
  0xc6   :  { %v965_v21 = vpop.f32.mrf.mxu3  ;;  %v928_v24 = vpop.f32.mrf.mxu0  ;;  %v953_v34 = vadd.f32 %v952_v20, %v940_v33 }
  0xc8   :  { %v966_v37 = vadd.f32 %v965_v21, %v953_v34 }
  0xc9   :  { %v941_v25 = vpop.f32.mrf.mxu1 }
  0xcd   :  { %v954_v28 = vpop.f32.mrf.mxu2 }
  0xce   :  { %v967_v29 = vpop.f32.mrf.mxu3 }
  0xde   :  { %v978_v35 = vpop.f32.mrf.mxu0 }
  0xdf   :  { %v979_v38 = vadd.f32 %v978_v35, %v966_v37 }
  0xe1   :  { %v991_v36 = vpop.f32.mrf.mxu1 }
  0xe2   :  { %v992_v42 = vadd.f32 %v991_v36, %v979_v38 }
  0xe5   :  { %v1004_v39 = vpop.f32.mrf.mxu2 }
  0xe6   :  { %v1017_v40 = vpop.f32.mrf.mxu3  ;;  %v980_v41 = vpop.f32.mrf.mxu0  ;;  %v1005_v44 = vadd.f32 %v1004_v39, %v992_v42 }
  0xe8   :  { %v1018_v46 = vadd.f32 %v1017_v40, %v1005_v44 }
  0xe9   :  { %v993_v43 = vpop.f32.mrf.mxu1 }
  0xed   :  { %v1006_v45 = vpop.f32.mrf.mxu2 }
  0xee   :  { %v1019_v47 = vpop.f32.mrf.mxu3  ;;  %v1030_v48 = vpop.f32.mrf.mxu0 }
  0xef   :  { %v1031_v49 = vadd.f32 %v1030_v48, %v1018_v46 }
  0xf1   :  { %v1034_v50 = vmax.f32 %v1031_v49, 0.0 }
  0xf3   :  { %v1035_v51 = vpack.c.bf16 %v1034_v50, %v1034_v50 }
  0xf5   :  { %1112 = vmatmul.bf16.vlgmr.msrb.gmra.mxu1 %v1035_v51 }
  0xf6   :  { %v1032_v52 = vpop.f32.mrf.mxu0 }
 0x172   :  { %v1113_v54 = vpop.f32.mrf.mxu1 }
 0x173   :  { %v1114_v55 = vadd.f32 %v1654_v53, %v1113_v54 }
 0x175   :  { %1117 = vst [vmem:[%s2038_s5] sm:$0xff] %v1114_v55 }
 0x17a   :  { %v1115_v56 = vpop.f32.mrf.mxu1 }

</bundles_post_ra>
